<compile_context>
chip_gen: v5e
topology: v5e:2x2
jax: 0.10.0
libtpu: 0.0.40
codegen_flags: <defaults>
</compile_context>

<pallas_src>
import math

import jax
import jax.numpy as jnp
from jax.experimental import pallas as pl
from jax.experimental.pallas import tpu as pltpu  # noqa: F401  (TPU backend; defaults suffice here)

# ----------------- small, __init__-consistent hyper-parameters -----------------
B = 2            # batch
CHANS = 4        # EEG channels ("chans")
TIMESTAMP = 8    # sequence length after the CNN ("timestamp")
CLS = 5          # classes
LAYERS = 2       # transformer layers
SIZE1 = 8        # F1
SIZE2 = 8        # D
F1 = SIZE1
DEPTH = SIZE2
F2 = SIZE1 * SIZE2           # d_model = 64
NHEAD = max(1, F2 // 8)      # 8 heads
HEAD_DIM = F2 // NHEAD       # 8
FFN = 4 * F2                 # 256
FEEL1 = 7                    # temporal kernel 1 (odd -> 'same')
FEEL2 = 5                    # temporal kernel 2 (odd -> 'same')
P1 = 2
P2 = 5
T_RAW = TIMESTAMP * P1 * P2  # 80 raw time samples
T1 = T_RAW // P1             # 40
NUM_BANDS = 3
WAVELET_LEN = 15
KCOMB = WAVELET_LEN + FEEL1 - 1   # composed (wavelet ∘ temporal conv) kernel length = 21
BN_EPS = 1e-5
LN_EPS = 1e-5
NEG_INF = -1e9
CLS_PAD = 128                # classifier output padded to a lane-dense 128 (sliced to CLS outside)
ATTN_SCALE = 1.0 / math.sqrt(HEAD_DIM)
BT = B * T_RAW               # 160
BT1 = B * T1                 # 80
BT2 = B * TIMESTAMP          # 16


# =============================== the single fused Pallas kernel ===============================

def _elu(v):
    return jnp.where(v > 0, v, jnp.exp(jnp.minimum(v, 0.0)) - 1.0)


def _layernorm(v, g, b):
    mu = jnp.mean(v, axis=-1, keepdims=True)
    vc = v - mu
    var = jnp.mean(vc * vc, axis=-1, keepdims=True)
    return vc * jax.lax.rsqrt(var + LN_EPS) * g + b


def _fused_forward_kernel(
        # data-dependent inputs
        cols_ref, bias_ref, poolm_ref,
        # CNN front-end constants (pre-folded at init)
        wa_ref, ba_ref, bn2s_ref, bn2b_ref, pool1_ref,
        shift_ref, w34_ref, bn3s_ref, bn3b_ref, pool2_ref, pe_ref,
        # transformer stack (params stacked along the layer axis)
        w_in_ref, b_in_ref, w_out_ref, b_out_ref, ln1g_ref, ln1b_ref,
        w_ff1_ref, b_ff1_ref, w_ff2_ref, b_ff2_ref, ln2g_ref, ln2b_ref,
        # classifier (lane-padded)
        wcls_ref, bcls_ref,
        # output
        out_ref):
    f32 = jnp.float32

    # ---- CNN front-end: (wavelet FIR ∘ temporal conv ∘ BN1 ∘ depthwise-spatial conv) as ONE matmul ----
    y = jnp.dot(cols_ref[...], wa_ref[...], preferred_element_type=f32) + ba_ref[...]   # (B*T, 64)
    y = _elu(y * bn2s_ref[...] + bn2b_ref[...])                                         # BN2 + ELU epilogue
    y = jnp.dot(pool1_ref[...], y, preferred_element_type=f32)                          # AvgPool(P1) -> (B*T1, 64)

    # depthwise temporal conv (FEEL2 taps) + pointwise conv: MXU-only via batch-aware shift matrices
    z = jnp.dot(jnp.dot(shift_ref[0], y, preferred_element_type=f32),
                w34_ref[0], preferred_element_type=f32)
    for k in range(1, FEEL2):
        z = z + jnp.dot(jnp.dot(shift_ref[k], y, preferred_element_type=f32),
                        w34_ref[k], preferred_element_type=f32)
    z = _elu(z * bn3s_ref[...] + bn3b_ref[...])                                         # BN3 + ELU epilogue
    h = jnp.dot(pool2_ref[...], z, preferred_element_type=f32)                          # AvgPool(P2) -> (B*T2, 64)
    h = h + pe_ref[...]                                                                 # positional encoding (dropout = id)

    # ---- transformer encoder stack (post-norm, relu FFN, eval mode), fully unrolled, no grid ----
    bias = bias_ref[...]                     # (B*T2, B*T2): key-padding + cross-batch masking, additive
    for l in range(LAYERS):
        qkv = jnp.dot(h, w_in_ref[l], preferred_element_type=f32) + b_in_ref[l]         # (B*T2, 192)
        wo = w_out_ref[l]                                                               # (64, 64)
        attn = None
        for hh in range(NHEAD):              # static head split: free lane slices of the 192-wide QKV
            q = qkv[:, hh * HEAD_DIM:(hh + 1) * HEAD_DIM]
            kk = qkv[:, F2 + hh * HEAD_DIM:F2 + (hh + 1) * HEAD_DIM]
            v = qkv[:, 2 * F2 + hh * HEAD_DIM:2 * F2 + (hh + 1) * HEAD_DIM]
            s = jax.lax.dot_general(q, kk, (((1,), (1,)), ((), ())),
                                    preferred_element_type=f32) * ATTN_SCALE + bias
            s = s - jnp.max(s, axis=-1, keepdims=True)
            p = jnp.exp(s)
            p = p / jnp.sum(p, axis=-1, keepdims=True)
            o_h = jnp.dot(p, v, preferred_element_type=f32)                             # (B*T2, HEAD_DIM)
            # head merge folded directly into the output projection (no concat / reshape)
            contrib = jnp.dot(o_h, wo[hh * HEAD_DIM:(hh + 1) * HEAD_DIM, :],
                              preferred_element_type=f32)
            attn = contrib if attn is None else attn + contrib
        attn = attn + b_out_ref[l]
        h = _layernorm(h + attn, ln1g_ref[l], ln1b_ref[l])
        ff = jnp.maximum(jnp.dot(h, w_ff1_ref[l], preferred_element_type=f32) + b_ff1_ref[l], 0.0)
        ff = jnp.dot(ff, w_ff2_ref[l], preferred_element_type=f32) + b_ff2_ref[l]
        h = _layernorm(h + ff, ln2g_ref[l], ln2b_ref[l])

    # ---- masked mean pool (constant pooling matrix, zero-mask guarded) + classifier (128-lane slab) ----
    pooled = jnp.dot(poolm_ref[...], h, preferred_element_type=f32)                     # (B, 64)
    out_ref[...] = jnp.dot(pooled, wcls_ref[...], preferred_element_type=f32) + bcls_ref[...]


# =============================== forward (one pallas_call + tiny XLA glue) ===============================

def forward(fused, x, mask):
    f32 = jnp.float32
    # im2col of the raw EEG over the composed 21-tap window (the only XLA-side data prep).
    pad = KCOMB // 2
    xpad = jnp.pad(x, ((0, 0), (0, 0), (pad, pad)))
    cols = jnp.stack([xpad[:, :, j:j + T_RAW] for j in range(KCOMB)], axis=-1)   # (B, C, T, K)
    cols = cols.transpose(0, 2, 1, 3).reshape(BT, CHANS * KCOMB)                 # rows (b,t), features (c,k)

    # src_key_padding_mask -> additive bias over (query=(b,t), key=(b',s)); cross-batch pairs are also
    # masked, so one (B*T2, B*T2) attention per head is exactly equivalent to per-batch attention.
    m = (mask > 0).astype(f32)
    eye_b = jnp.eye(B, dtype=f32)
    ok = eye_b[:, None, :, None] * m[None, None, :, :]
    ok = jnp.broadcast_to(ok, (B, TIMESTAMP, B, TIMESTAMP)).reshape(BT2, BT2)
    attn_bias = jnp.where(ok > 0, 0.0, NEG_INF).astype(f32)

    # masked mean-pool as a (B, B*T2) matrix; denominator clamped to avoid NaN on all-padded rows.
    den = jnp.maximum(jnp.sum(m, axis=1, keepdims=True), 1.0)
    poolm = (eye_b[:, :, None] * (m / den)[None, :, :]).reshape(B, BT2)

    out = pl.pallas_call(
        _fused_forward_kernel,
        out_shape=jax.ShapeDtypeStruct((B, CLS_PAD), f32),
    )(cols, attn_bias, poolm,
      fused["w_a"], fused["b_a"], fused["bn2_s"], fused["bn2_b"], fused["pool1"],
      fused["shifts"], fused["w34"], fused["bn3_s"], fused["bn3_b"], fused["pool2"], fused["pe"],
      fused["w_in"], fused["b_in"], fused["w_out"], fused["b_out"], fused["ln1_g"], fused["ln1_b"],
      fused["w_ff1"], fused["b_ff1"], fused["w_ff2"], fused["b_ff2"], fused["ln2_g"], fused["ln2_b"],
      fused["w_cls"], fused["b_cls"])
    return out[:, :CLS]


# =============================== parameter init (module-structured) ===============================

class KeyGen:
    def __init__(self, key):
        self.key = key

    def __call__(self):
        self.key, sub = jax.random.split(self.key)
        return sub


def wavelet_filterbank(length):
    # fixed 3-band (theta/alpha/beta) real-Morlet FIR filters along time
    fs = 100.0
    t = (jnp.arange(length, dtype=jnp.float32) - (length - 1) / 2.0) / fs
    freqs = jnp.array([6.0, 10.0, 22.0], jnp.float32)
    widths = jnp.array([0.05, 0.04, 0.02], jnp.float32)
    filt = (jnp.cos(2.0 * jnp.pi * freqs[:, None] * t[None, :])
            * jnp.exp(-t[None, :] ** 2 / (2.0 * widths[:, None] ** 2)))
    return filt / jnp.sum(jnp.abs(filt), axis=1, keepdims=True)     # (3, length)


def sinusoidal_pe(max_len, d_model):
    pos = jnp.arange(max_len, dtype=jnp.float32)[:, None]
    div = jnp.exp(jnp.arange(0, d_model, 2, dtype=jnp.float32) * (-math.log(10000.0) / d_model))
    pe = jnp.zeros((max_len, d_model), jnp.float32)
    pe = pe.at[:, 0::2].set(jnp.sin(pos * div))
    pe = pe.at[:, 1::2].set(jnp.cos(pos * div))
    return pe


def init_bn(kg, ch):
    gamma = 1.0 + 0.1 * jax.random.normal(kg(), (ch,))
    beta = 0.1 * jax.random.normal(kg(), (ch,))
    mean = 0.1 * jax.random.normal(kg(), (ch,))
    var = 1.0 + 0.1 * jnp.abs(jax.random.normal(kg(), (ch,)))
    scale = gamma / jnp.sqrt(var + BN_EPS)
    shift = beta - mean * scale
    return scale, shift


def init_layer(kg):
    s = 0.1
    return dict(
        w_in=s * jax.random.normal(kg(), (F2, 3 * F2)),   # stored as (in, out)
        b_in=s * jax.random.normal(kg(), (3 * F2,)),
        w_out=s * jax.random.normal(kg(), (F2, F2)),
        b_out=s * jax.random.normal(kg(), (F2,)),
        ln1_g=1.0 + 0.05 * jax.random.normal(kg(), (F2,)),
        ln1_b=0.05 * jax.random.normal(kg(), (F2,)),
        w_ff1=s * jax.random.normal(kg(), (F2, FFN)),
        b_ff1=s * jax.random.normal(kg(), (FFN,)),
        w_ff2=s * jax.random.normal(kg(), (FFN, F2)),
        b_ff2=s * jax.random.normal(kg(), (F2,)),
        ln2_g=1.0 + 0.05 * jax.random.normal(kg(), (F2,)),
        ln2_b=0.05 * jax.random.normal(kg(), (F2,)),
    )


def init_params(key):
    kg = KeyGen(key)
    s = 0.1
    p = {}
    p["wfilt"] = wavelet_filterbank(WAVELET_LEN)                       # (3, Lw)
    p["w1"] = s * jax.random.normal(kg(), (F1, NUM_BANDS, FEEL1))      # temporal conv
    p["bn1_scale"], p["bn1_shift"] = init_bn(kg, F1)
    p["w2"] = s * jax.random.normal(kg(), (F1, DEPTH, CHANS))          # depthwise spatial conv
    p["bn2_scale"], p["bn2_shift"] = init_bn(kg, F1 * DEPTH)
    p["w3"] = s * jax.random.normal(kg(), (FEEL2, F1 * DEPTH))         # depthwise temporal (k, ch)
    p["w4"] = s * jax.random.normal(kg(), (F1 * DEPTH, F2))            # pointwise (in, out)
    p["bn3_scale"], p["bn3_shift"] = init_bn(kg, F2)
    p["pe"] = sinusoidal_pe(TIMESTAMP, F2)
    p["layers"] = [init_layer(kg) for _ in range(LAYERS)]
    p["w_cls"] = s * jax.random.normal(kg(), (F2, CLS))
    p["b_cls"] = s * jax.random.normal(kg(), (CLS,))
    return jax.tree_util.tree_map(lambda a: a.astype(jnp.float32), p)


# =============================== one-time weight folding for the fused kernel ===============================

def fuse_params(p):
    """Exact (linear-algebraic) re-packing of the module parameters into the constants the kernel uses."""
    f32 = jnp.float32

    # 1) compose wavelet FIR with the temporal conv: wc[f, j] = sum_band conv_full(w1[f,band], filt[band])[j]
    wc = jnp.zeros((F1, KCOMB), f32)
    for f in range(F1):
        for band in range(NUM_BANDS):
            wc = wc.at[f].add(jnp.convolve(p["w1"][f, band], p["wfilt"][band], mode="full"))

    # 2) fold BN1 (affine, no nonlinearity before the depthwise-spatial conv) and the depthwise-spatial
    #    conv into a single (CHANS*KCOMB, F1*DEPTH) matrix + bias acting on im2col'd raw input.
    w_a = jnp.einsum("fj,fdc->cjfd", wc * p["bn1_scale"][:, None], p["w2"])
    w_a = w_a.reshape(CHANS * KCOMB, F1 * DEPTH)
    b_a = (p["bn1_shift"][:, None] * jnp.sum(p["w2"], axis=2)).reshape(1, F1 * DEPTH)

    # 3) average-pool matrices, block-diagonal over the batch (time windows never cross batch rows)
    eye_b = jnp.eye(B, dtype=f32)
    bp1 = (jnp.arange(T_RAW)[None, :] // P1 == jnp.arange(T1)[:, None]).astype(f32) / P1
    pool1 = jnp.kron(eye_b, bp1)                                         # (B*T1, B*T)
    bp2 = (jnp.arange(T1)[None, :] // P2 == jnp.arange(TIMESTAMP)[:, None]).astype(f32) / P2
    pool2 = jnp.kron(eye_b, bp2)                                         # (B*T2, B*T1)

    # 4) depthwise temporal 'same' conv as batch-aware shift matrices; pointwise conv folded per tap.
    shifts = jnp.stack([jnp.kron(eye_b, jnp.eye(T1, k=k - FEEL2 // 2, dtype=f32))
                        for k in range(FEEL2)])                          # (FEEL2, B*T1, B*T1)
    w34 = p["w3"][:, :, None] * p["w4"][None, :, :]                      # (FEEL2, CH, F2)

    # 5) transformer params stacked per layer (biases/LN params kept 2-D so the kernel sees 2-D blocks)
    layers = p["layers"]

    def stack_w(key):
        return jnp.stack([lp[key] for lp in layers])

    def stack_v(key):
        return jnp.stack([lp[key].reshape(1, -1) for lp in layers])

    fused = dict(
        w_a=w_a, b_a=b_a,
        bn2_s=p["bn2_scale"].reshape(1, -1), bn2_b=p["bn2_shift"].reshape(1, -1),
        pool1=pool1,
        shifts=shifts, w34=w34,
        bn3_s=p["bn3_scale"].reshape(1, -1), bn3_b=p["bn3_shift"].reshape(1, -1),
        pool2=pool2,
        pe=jnp.tile(p["pe"][:TIMESTAMP], (B, 1)),                        # (B*T2, F2)
        w_in=stack_w("w_in"), b_in=stack_v("b_in"),
        w_out=stack_w("w_out"), b_out=stack_v("b_out"),
        ln1_g=stack_v("ln1_g"), ln1_b=stack_v("ln1_b"),
        w_ff1=stack_w("w_ff1"), b_ff1=stack_v("b_ff1"),
        w_ff2=stack_w("w_ff2"), b_ff2=stack_v("b_ff2"),
        ln2_g=stack_v("ln2_g"), ln2_b=stack_v("ln2_b"),
        w_cls=jnp.pad(p["w_cls"], ((0, 0), (0, CLS_PAD - CLS))),         # lane-dense classifier slab
        b_cls=jnp.pad(p["b_cls"], (0, CLS_PAD - CLS)).reshape(1, CLS_PAD),
    )
    return jax.tree_util.tree_map(lambda a: a.astype(f32), fused)


# =============================== main ===============================

if __name__ == "__main__":
    key = jax.random.PRNGKey(0)
    kx, kp = jax.random.split(key)
    params = init_params(kp)
    fused = fuse_params(params)

    x = jax.random.normal(kx, (B, CHANS, T_RAW), dtype=jnp.float32)
    # mask: first example fully valid, second example has 2 padded timesteps
    mask = jnp.array(
        [[1.0] * TIMESTAMP,
         [1.0] * (TIMESTAMP - 2) + [0.0, 0.0]],
        dtype=jnp.float32,
    )

    logits = jax.jit(forward)(fused, x, mask)
    jax.block_until_ready(logits)
    assert logits.shape == (B, CLS)
    assert bool(jnp.all(jnp.isfinite(logits)))
    print("KERNEL_OK")
</pallas_src>

<mosaic_0001>
module attributes {stable_mosaic.version = 11 : i64} {
  func.func @_fused_forward_kernel(%arg0: memref<160x84xf32, #tpu.memory_space<vmem>>, %arg1: memref<16x16xf32, #tpu.memory_space<vmem>>, %arg2: memref<2x16xf32, #tpu.memory_space<vmem>>, %arg3: memref<84x64xf32, #tpu.memory_space<vmem>>, %arg4: memref<1x64xf32, #tpu.memory_space<vmem>>, %arg5: memref<1x64xf32, #tpu.memory_space<vmem>>, %arg6: memref<1x64xf32, #tpu.memory_space<vmem>>, %arg7: memref<80x160xf32, #tpu.memory_space<vmem>>, %arg8: memref<5x80x80xf32, #tpu.memory_space<vmem>>, %arg9: memref<5x64x64xf32, #tpu.memory_space<vmem>>, %arg10: memref<1x64xf32, #tpu.memory_space<vmem>>, %arg11: memref<1x64xf32, #tpu.memory_space<vmem>>, %arg12: memref<16x80xf32, #tpu.memory_space<vmem>>, %arg13: memref<16x64xf32, #tpu.memory_space<vmem>>, %arg14: memref<2x64x192xf32, #tpu.memory_space<vmem>>, %arg15: memref<2x1x192xf32, #tpu.memory_space<vmem>>, %arg16: memref<2x64x64xf32, #tpu.memory_space<vmem>>, %arg17: memref<2x1x64xf32, #tpu.memory_space<vmem>>, %arg18: memref<2x1x64xf32, #tpu.memory_space<vmem>>, %arg19: memref<2x1x64xf32, #tpu.memory_space<vmem>>, %arg20: memref<2x64x256xf32, #tpu.memory_space<vmem>>, %arg21: memref<2x1x256xf32, #tpu.memory_space<vmem>>, %arg22: memref<2x256x64xf32, #tpu.memory_space<vmem>>, %arg23: memref<2x1x64xf32, #tpu.memory_space<vmem>>, %arg24: memref<2x1x64xf32, #tpu.memory_space<vmem>>, %arg25: memref<2x1x64xf32, #tpu.memory_space<vmem>>, %arg26: memref<64x128xf32, #tpu.memory_space<vmem>>, %arg27: memref<1x128xf32, #tpu.memory_space<vmem>>, %arg28: memref<2x128xf32, #tpu.memory_space<vmem>>) attributes {dimension_semantics = [], scalar_prefetch = 0 : i64, scratch_operands = 0 : i64, tpu.core_type = #tpu.core_type<tc>} {
    %c0 = arith.constant 0 : index
    %c0_0 = arith.constant 0 : index
    %0 = vector.load %arg0[%c0, %c0_0] : memref<160x84xf32, #tpu.memory_space<vmem>>, vector<160x84xf32>
    %c0_1 = arith.constant 0 : index
    %c0_2 = arith.constant 0 : index
    %1 = vector.load %arg3[%c0_1, %c0_2] : memref<84x64xf32, #tpu.memory_space<vmem>>, vector<84x64xf32>
    %cst = arith.constant dense<0.000000e+00> : vector<160x64xf32>
    %2 = tpu.matmul %0, %1, %cst {dimension_numbers = #tpu.dot_dimension_numbers<[1], [0], [0], [1], [0, 0, 1, 1], [], []>} : vector<160x84xf32>, vector<84x64xf32>, vector<160x64xf32> -> vector<160x64xf32>
    %c0_3 = arith.constant 0 : index
    %c0_4 = arith.constant 0 : index
    %3 = vector.load %arg4[%c0_3, %c0_4] : memref<1x64xf32, #tpu.memory_space<vmem>>, vector<1x64xf32>
    %4 = vector.broadcast %3 : vector<1x64xf32> to vector<160x64xf32>
    %5 = arith.addf %2, %4 : vector<160x64xf32>
    %c0_5 = arith.constant 0 : index
    %c0_6 = arith.constant 0 : index
    %6 = vector.load %arg5[%c0_5, %c0_6] : memref<1x64xf32, #tpu.memory_space<vmem>>, vector<1x64xf32>
    %7 = vector.broadcast %6 : vector<1x64xf32> to vector<160x64xf32>
    %8 = arith.mulf %5, %7 : vector<160x64xf32>
    %c0_7 = arith.constant 0 : index
    %c0_8 = arith.constant 0 : index
    %9 = vector.load %arg6[%c0_7, %c0_8] : memref<1x64xf32, #tpu.memory_space<vmem>>, vector<1x64xf32>
    %10 = vector.broadcast %9 : vector<1x64xf32> to vector<160x64xf32>
    %11 = arith.addf %8, %10 : vector<160x64xf32>
    %cst_9 = arith.constant 0.000000e+00 : f32
    %12 = vector.broadcast %cst_9 : f32 to vector<160x64xf32>
    %13 = arith.cmpf ogt, %11, %12 : vector<160x64xf32>
    %cst_10 = arith.constant 0.000000e+00 : f32
    %14 = vector.broadcast %cst_10 : f32 to vector<160x64xf32>
    %15 = arith.minimumf %11, %14 : vector<160x64xf32>
    %16 = math.exp %15 : vector<160x64xf32>
    %cst_11 = arith.constant 1.000000e+00 : f32
    %17 = vector.broadcast %cst_11 : f32 to vector<160x64xf32>
    %18 = arith.subf %16, %17 : vector<160x64xf32>
    %19 = arith.select %13, %11, %18 : vector<160x64xi1>, vector<160x64xf32>
    %c0_12 = arith.constant 0 : index
    %c0_13 = arith.constant 0 : index
    %20 = vector.load %arg7[%c0_12, %c0_13] : memref<80x160xf32, #tpu.memory_space<vmem>>, vector<80x160xf32>
    %cst_14 = arith.constant dense<0.000000e+00> : vector<80x64xf32>
    %21 = tpu.matmul %20, %19, %cst_14 {dimension_numbers = #tpu.dot_dimension_numbers<[1], [0], [0], [1], [0, 0, 1, 1], [], []>} : vector<80x160xf32>, vector<160x64xf32>, vector<80x64xf32> -> vector<80x64xf32>
    %c0_15 = arith.constant 0 : index
    %c0_16 = arith.constant 0 : index
    %c0_17 = arith.constant 0 : index
    %22 = vector.load %arg8[%c0_15, %c0_16, %c0_17] : memref<5x80x80xf32, #tpu.memory_space<vmem>>, vector<1x80x80xf32>
    %23 = vector.shape_cast %22 : vector<1x80x80xf32> to vector<80x80xf32>
    %cst_18 = arith.constant dense<0.000000e+00> : vector<80x64xf32>
    %24 = tpu.matmul %23, %21, %cst_18 {dimension_numbers = #tpu.dot_dimension_numbers<[1], [0], [0], [1], [0, 0, 1, 1], [], []>} : vector<80x80xf32>, vector<80x64xf32>, vector<80x64xf32> -> vector<80x64xf32>
    %c0_19 = arith.constant 0 : index
    %c0_20 = arith.constant 0 : index
    %c0_21 = arith.constant 0 : index
    %25 = vector.load %arg9[%c0_19, %c0_20, %c0_21] : memref<5x64x64xf32, #tpu.memory_space<vmem>>, vector<1x64x64xf32>
    %26 = vector.shape_cast %25 : vector<1x64x64xf32> to vector<64x64xf32>
    %cst_22 = arith.constant dense<0.000000e+00> : vector<80x64xf32>
    %27 = tpu.matmul %24, %26, %cst_22 {dimension_numbers = #tpu.dot_dimension_numbers<[1], [0], [0], [1], [0, 0, 1, 1], [], []>} : vector<80x64xf32>, vector<64x64xf32>, vector<80x64xf32> -> vector<80x64xf32>
    %c1 = arith.constant 1 : index
    %c0_23 = arith.constant 0 : index
    %c0_24 = arith.constant 0 : index
    %28 = vector.load %arg8[%c1, %c0_23, %c0_24] : memref<5x80x80xf32, #tpu.memory_space<vmem>>, vector<1x80x80xf32>
    %29 = vector.shape_cast %28 : vector<1x80x80xf32> to vector<80x80xf32>
    %cst_25 = arith.constant dense<0.000000e+00> : vector<80x64xf32>
    %30 = tpu.matmul %29, %21, %cst_25 {dimension_numbers = #tpu.dot_dimension_numbers<[1], [0], [0], [1], [0, 0, 1, 1], [], []>} : vector<80x80xf32>, vector<80x64xf32>, vector<80x64xf32> -> vector<80x64xf32>
    %c1_26 = arith.constant 1 : index
    %c0_27 = arith.constant 0 : index
    %c0_28 = arith.constant 0 : index
    %31 = vector.load %arg9[%c1_26, %c0_27, %c0_28] : memref<5x64x64xf32, #tpu.memory_space<vmem>>, vector<1x64x64xf32>
    %32 = vector.shape_cast %31 : vector<1x64x64xf32> to vector<64x64xf32>
    %cst_29 = arith.constant dense<0.000000e+00> : vector<80x64xf32>
    %33 = tpu.matmul %30, %32, %cst_29 {dimension_numbers = #tpu.dot_dimension_numbers<[1], [0], [0], [1], [0, 0, 1, 1], [], []>} : vector<80x64xf32>, vector<64x64xf32>, vector<80x64xf32> -> vector<80x64xf32>
    %34 = arith.addf %27, %33 : vector<80x64xf32>
    %c2 = arith.constant 2 : index
    %c0_30 = arith.constant 0 : index
    %c0_31 = arith.constant 0 : index
    %35 = vector.load %arg8[%c2, %c0_30, %c0_31] : memref<5x80x80xf32, #tpu.memory_space<vmem>>, vector<1x80x80xf32>
    %36 = vector.shape_cast %35 : vector<1x80x80xf32> to vector<80x80xf32>
    %cst_32 = arith.constant dense<0.000000e+00> : vector<80x64xf32>
    %37 = tpu.matmul %36, %21, %cst_32 {dimension_numbers = #tpu.dot_dimension_numbers<[1], [0], [0], [1], [0, 0, 1, 1], [], []>} : vector<80x80xf32>, vector<80x64xf32>, vector<80x64xf32> -> vector<80x64xf32>
    %c2_33 = arith.constant 2 : index
    %c0_34 = arith.constant 0 : index
    %c0_35 = arith.constant 0 : index
    %38 = vector.load %arg9[%c2_33, %c0_34, %c0_35] : memref<5x64x64xf32, #tpu.memory_space<vmem>>, vector<1x64x64xf32>
    %39 = vector.shape_cast %38 : vector<1x64x64xf32> to vector<64x64xf32>
    %cst_36 = arith.constant dense<0.000000e+00> : vector<80x64xf32>
    %40 = tpu.matmul %37, %39, %cst_36 {dimension_numbers = #tpu.dot_dimension_numbers<[1], [0], [0], [1], [0, 0, 1, 1], [], []>} : vector<80x64xf32>, vector<64x64xf32>, vector<80x64xf32> -> vector<80x64xf32>
    %41 = arith.addf %34, %40 : vector<80x64xf32>
    %c3 = arith.constant 3 : index
    %c0_37 = arith.constant 0 : index
    %c0_38 = arith.constant 0 : index
    %42 = vector.load %arg8[%c3, %c0_37, %c0_38] : memref<5x80x80xf32, #tpu.memory_space<vmem>>, vector<1x80x80xf32>
    %43 = vector.shape_cast %42 : vector<1x80x80xf32> to vector<80x80xf32>
    %cst_39 = arith.constant dense<0.000000e+00> : vector<80x64xf32>
    %44 = tpu.matmul %43, %21, %cst_39 {dimension_numbers = #tpu.dot_dimension_numbers<[1], [0], [0], [1], [0, 0, 1, 1], [], []>} : vector<80x80xf32>, vector<80x64xf32>, vector<80x64xf32> -> vector<80x64xf32>
    %c3_40 = arith.constant 3 : index
    %c0_41 = arith.constant 0 : index
    %c0_42 = arith.constant 0 : index
    %45 = vector.load %arg9[%c3_40, %c0_41, %c0_42] : memref<5x64x64xf32, #tpu.memory_space<vmem>>, vector<1x64x64xf32>
    %46 = vector.shape_cast %45 : vector<1x64x64xf32> to vector<64x64xf32>
    %cst_43 = arith.constant dense<0.000000e+00> : vector<80x64xf32>
    %47 = tpu.matmul %44, %46, %cst_43 {dimension_numbers = #tpu.dot_dimension_numbers<[1], [0], [0], [1], [0, 0, 1, 1], [], []>} : vector<80x64xf32>, vector<64x64xf32>, vector<80x64xf32> -> vector<80x64xf32>
    %48 = arith.addf %41, %47 : vector<80x64xf32>
    %c4 = arith.constant 4 : index
    %c0_44 = arith.constant 0 : index
    %c0_45 = arith.constant 0 : index
    %49 = vector.load %arg8[%c4, %c0_44, %c0_45] : memref<5x80x80xf32, #tpu.memory_space<vmem>>, vector<1x80x80xf32>
    %50 = vector.shape_cast %49 : vector<1x80x80xf32> to vector<80x80xf32>
    %cst_46 = arith.constant dense<0.000000e+00> : vector<80x64xf32>
    %51 = tpu.matmul %50, %21, %cst_46 {dimension_numbers = #tpu.dot_dimension_numbers<[1], [0], [0], [1], [0, 0, 1, 1], [], []>} : vector<80x80xf32>, vector<80x64xf32>, vector<80x64xf32> -> vector<80x64xf32>
    %c4_47 = arith.constant 4 : index
    %c0_48 = arith.constant 0 : index
    %c0_49 = arith.constant 0 : index
    %52 = vector.load %arg9[%c4_47, %c0_48, %c0_49] : memref<5x64x64xf32, #tpu.memory_space<vmem>>, vector<1x64x64xf32>
    %53 = vector.shape_cast %52 : vector<1x64x64xf32> to vector<64x64xf32>
    %cst_50 = arith.constant dense<0.000000e+00> : vector<80x64xf32>
    %54 = tpu.matmul %51, %53, %cst_50 {dimension_numbers = #tpu.dot_dimension_numbers<[1], [0], [0], [1], [0, 0, 1, 1], [], []>} : vector<80x64xf32>, vector<64x64xf32>, vector<80x64xf32> -> vector<80x64xf32>
    %55 = arith.addf %48, %54 : vector<80x64xf32>
    %c0_51 = arith.constant 0 : index
    %c0_52 = arith.constant 0 : index
    %56 = vector.load %arg10[%c0_51, %c0_52] : memref<1x64xf32, #tpu.memory_space<vmem>>, vector<1x64xf32>
    %57 = vector.broadcast %56 : vector<1x64xf32> to vector<80x64xf32>
    %58 = arith.mulf %55, %57 : vector<80x64xf32>
    %c0_53 = arith.constant 0 : index
    %c0_54 = arith.constant 0 : index
    %59 = vector.load %arg11[%c0_53, %c0_54] : memref<1x64xf32, #tpu.memory_space<vmem>>, vector<1x64xf32>
    %60 = vector.broadcast %59 : vector<1x64xf32> to vector<80x64xf32>
    %61 = arith.addf %58, %60 : vector<80x64xf32>
    %cst_55 = arith.constant 0.000000e+00 : f32
    %62 = vector.broadcast %cst_55 : f32 to vector<80x64xf32>
    %63 = arith.cmpf ogt, %61, %62 : vector<80x64xf32>
    %cst_56 = arith.constant 0.000000e+00 : f32
    %64 = vector.broadcast %cst_56 : f32 to vector<80x64xf32>
    %65 = arith.minimumf %61, %64 : vector<80x64xf32>
    %66 = math.exp %65 : vector<80x64xf32>
    %cst_57 = arith.constant 1.000000e+00 : f32
    %67 = vector.broadcast %cst_57 : f32 to vector<80x64xf32>
    %68 = arith.subf %66, %67 : vector<80x64xf32>
    %69 = arith.select %63, %61, %68 : vector<80x64xi1>, vector<80x64xf32>
    %c0_58 = arith.constant 0 : index
    %c0_59 = arith.constant 0 : index
    %70 = vector.load %arg12[%c0_58, %c0_59] : memref<16x80xf32, #tpu.memory_space<vmem>>, vector<16x80xf32>
    %cst_60 = arith.constant dense<0.000000e+00> : vector<16x64xf32>
    %71 = tpu.matmul %70, %69, %cst_60 {dimension_numbers = #tpu.dot_dimension_numbers<[1], [0], [0], [1], [0, 0, 1, 1], [], []>} : vector<16x80xf32>, vector<80x64xf32>, vector<16x64xf32> -> vector<16x64xf32>
    %c0_61 = arith.constant 0 : index
    %c0_62 = arith.constant 0 : index
    %72 = vector.load %arg13[%c0_61, %c0_62] : memref<16x64xf32, #tpu.memory_space<vmem>>, vector<16x64xf32>
    %73 = arith.addf %71, %72 : vector<16x64xf32>
    %c0_63 = arith.constant 0 : index
    %c0_64 = arith.constant 0 : index
    %74 = vector.load %arg1[%c0_63, %c0_64] : memref<16x16xf32, #tpu.memory_space<vmem>>, vector<16x16xf32>
    %c0_65 = arith.constant 0 : index
    %c0_66 = arith.constant 0 : index
    %c0_67 = arith.constant 0 : index
    %75 = vector.load %arg14[%c0_65, %c0_66, %c0_67] : memref<2x64x192xf32, #tpu.memory_space<vmem>>, vector<1x64x192xf32>
    %76 = vector.shape_cast %75 : vector<1x64x192xf32> to vector<64x192xf32>
    %cst_68 = arith.constant dense<0.000000e+00> : vector<16x192xf32>
    %77 = tpu.matmul %73, %76, %cst_68 {dimension_numbers = #tpu.dot_dimension_numbers<[1], [0], [0], [1], [0, 0, 1, 1], [], []>} : vector<16x64xf32>, vector<64x192xf32>, vector<16x192xf32> -> vector<16x192xf32>
    %c0_69 = arith.constant 0 : index
    %c0_70 = arith.constant 0 : index
    %c0_71 = arith.constant 0 : index
    %78 = vector.load %arg15[%c0_69, %c0_70, %c0_71] : memref<2x1x192xf32, #tpu.memory_space<vmem>>, vector<1x1x192xf32>
    %79 = vector.shape_cast %78 : vector<1x1x192xf32> to vector<1x192xf32>
    %80 = vector.broadcast %79 : vector<1x192xf32> to vector<16x192xf32>
    %81 = arith.addf %77, %80 : vector<16x192xf32>
    %c0_72 = arith.constant 0 : index
    %c0_73 = arith.constant 0 : index
    %c0_74 = arith.constant 0 : index
    %82 = vector.load %arg16[%c0_72, %c0_73, %c0_74] : memref<2x64x64xf32, #tpu.memory_space<vmem>>, vector<1x64x64xf32>
    %83 = vector.shape_cast %82 : vector<1x64x64xf32> to vector<64x64xf32>
    %84 = vector.extract_strided_slice %81 {offsets = [0, 0], sizes = [16, 8], strides = [1, 1]} : vector<16x192xf32> to vector<16x8xf32>
    %85 = vector.extract_strided_slice %81 {offsets = [0, 64], sizes = [16, 8], strides = [1, 1]} : vector<16x192xf32> to vector<16x8xf32>
    %86 = vector.extract_strided_slice %81 {offsets = [0, 128], sizes = [16, 8], strides = [1, 1]} : vector<16x192xf32> to vector<16x8xf32>
    %cst_75 = arith.constant dense<0.000000e+00> : vector<16x16xf32>
    %87 = tpu.matmul %84, %85, %cst_75 {dimension_numbers = #tpu.dot_dimension_numbers<[1], [1], [0], [0], [0, 0, 1, 0], [], []>} : vector<16x8xf32>, vector<16x8xf32>, vector<16x16xf32> -> vector<16x16xf32>
    %cst_76 = arith.constant 0.353553385 : f32
    %88 = vector.broadcast %cst_76 : f32 to vector<16x16xf32>
    %89 = arith.mulf %87, %88 : vector<16x16xf32>
    %90 = arith.addf %89, %74 : vector<16x16xf32>
    %cst_77 = arith.constant dense<0xFF800000> : vector<16xf32>
    %91 = vector.multi_reduction <maximumf>, %90, %cst_77 [1] : vector<16x16xf32> to vector<16xf32>
    %92 = vector.shape_cast %91 : vector<16xf32> to vector<16x1xf32>
    %93 = vector.broadcast %92 : vector<16x1xf32> to vector<16x16xf32>
    %94 = arith.subf %90, %93 : vector<16x16xf32>
    %95 = math.exp %94 : vector<16x16xf32>
    %cst_78 = arith.constant dense<0.000000e+00> : vector<16xf32>
    %96 = vector.multi_reduction <add>, %95, %cst_78 [1] : vector<16x16xf32> to vector<16xf32>
    %97 = vector.shape_cast %96 : vector<16xf32> to vector<16x1xf32>
    %98 = vector.broadcast %97 : vector<16x1xf32> to vector<16x16xf32>
    %99 = arith.divf %95, %98 : vector<16x16xf32>
    %cst_79 = arith.constant dense<0.000000e+00> : vector<16x8xf32>
    %100 = tpu.matmul %99, %86, %cst_79 {dimension_numbers = #tpu.dot_dimension_numbers<[1], [0], [0], [1], [0, 0, 1, 1], [], []>} : vector<16x16xf32>, vector<16x8xf32>, vector<16x8xf32> -> vector<16x8xf32>
    %101 = vector.extract_strided_slice %83 {offsets = [0, 0], sizes = [8, 64], strides = [1, 1]} : vector<64x64xf32> to vector<8x64xf32>
    %cst_80 = arith.constant dense<0.000000e+00> : vector<16x64xf32>
    %102 = tpu.matmul %100, %101, %cst_80 {dimension_numbers = #tpu.dot_dimension_numbers<[1], [0], [0], [1], [0, 0, 1, 1], [], []>} : vector<16x8xf32>, vector<8x64xf32>, vector<16x64xf32> -> vector<16x64xf32>
    %103 = vector.extract_strided_slice %81 {offsets = [0, 8], sizes = [16, 8], strides = [1, 1]} : vector<16x192xf32> to vector<16x8xf32>
    %104 = vector.extract_strided_slice %81 {offsets = [0, 72], sizes = [16, 8], strides = [1, 1]} : vector<16x192xf32> to vector<16x8xf32>
    %105 = vector.extract_strided_slice %81 {offsets = [0, 136], sizes = [16, 8], strides = [1, 1]} : vector<16x192xf32> to vector<16x8xf32>
    %cst_81 = arith.constant dense<0.000000e+00> : vector<16x16xf32>
    %106 = tpu.matmul %103, %104, %cst_81 {dimension_numbers = #tpu.dot_dimension_numbers<[1], [1], [0], [0], [0, 0, 1, 0], [], []>} : vector<16x8xf32>, vector<16x8xf32>, vector<16x16xf32> -> vector<16x16xf32>
    %cst_82 = arith.constant 0.353553385 : f32
    %107 = vector.broadcast %cst_82 : f32 to vector<16x16xf32>
    %108 = arith.mulf %106, %107 : vector<16x16xf32>
    %109 = arith.addf %108, %74 : vector<16x16xf32>
    %cst_83 = arith.constant dense<0xFF800000> : vector<16xf32>
    %110 = vector.multi_reduction <maximumf>, %109, %cst_83 [1] : vector<16x16xf32> to vector<16xf32>
    %111 = vector.shape_cast %110 : vector<16xf32> to vector<16x1xf32>
    %112 = vector.broadcast %111 : vector<16x1xf32> to vector<16x16xf32>
    %113 = arith.subf %109, %112 : vector<16x16xf32>
    %114 = math.exp %113 : vector<16x16xf32>
    %cst_84 = arith.constant dense<0.000000e+00> : vector<16xf32>
    %115 = vector.multi_reduction <add>, %114, %cst_84 [1] : vector<16x16xf32> to vector<16xf32>
    %116 = vector.shape_cast %115 : vector<16xf32> to vector<16x1xf32>
    %117 = vector.broadcast %116 : vector<16x1xf32> to vector<16x16xf32>
    %118 = arith.divf %114, %117 : vector<16x16xf32>
    %cst_85 = arith.constant dense<0.000000e+00> : vector<16x8xf32>
    %119 = tpu.matmul %118, %105, %cst_85 {dimension_numbers = #tpu.dot_dimension_numbers<[1], [0], [0], [1], [0, 0, 1, 1], [], []>} : vector<16x16xf32>, vector<16x8xf32>, vector<16x8xf32> -> vector<16x8xf32>
    %120 = vector.extract_strided_slice %83 {offsets = [8, 0], sizes = [8, 64], strides = [1, 1]} : vector<64x64xf32> to vector<8x64xf32>
    %cst_86 = arith.constant dense<0.000000e+00> : vector<16x64xf32>
    %121 = tpu.matmul %119, %120, %cst_86 {dimension_numbers = #tpu.dot_dimension_numbers<[1], [0], [0], [1], [0, 0, 1, 1], [], []>} : vector<16x8xf32>, vector<8x64xf32>, vector<16x64xf32> -> vector<16x64xf32>
    %122 = arith.addf %102, %121 : vector<16x64xf32>
    %123 = vector.extract_strided_slice %81 {offsets = [0, 16], sizes = [16, 8], strides = [1, 1]} : vector<16x192xf32> to vector<16x8xf32>
    %124 = vector.extract_strided_slice %81 {offsets = [0, 80], sizes = [16, 8], strides = [1, 1]} : vector<16x192xf32> to vector<16x8xf32>
    %125 = vector.extract_strided_slice %81 {offsets = [0, 144], sizes = [16, 8], strides = [1, 1]} : vector<16x192xf32> to vector<16x8xf32>
    %cst_87 = arith.constant dense<0.000000e+00> : vector<16x16xf32>
    %126 = tpu.matmul %123, %124, %cst_87 {dimension_numbers = #tpu.dot_dimension_numbers<[1], [1], [0], [0], [0, 0, 1, 0], [], []>} : vector<16x8xf32>, vector<16x8xf32>, vector<16x16xf32> -> vector<16x16xf32>
    %cst_88 = arith.constant 0.353553385 : f32
    %127 = vector.broadcast %cst_88 : f32 to vector<16x16xf32>
    %128 = arith.mulf %126, %127 : vector<16x16xf32>
    %129 = arith.addf %128, %74 : vector<16x16xf32>
    %cst_89 = arith.constant dense<0xFF800000> : vector<16xf32>
    %130 = vector.multi_reduction <maximumf>, %129, %cst_89 [1] : vector<16x16xf32> to vector<16xf32>
    %131 = vector.shape_cast %130 : vector<16xf32> to vector<16x1xf32>
    %132 = vector.broadcast %131 : vector<16x1xf32> to vector<16x16xf32>
    %133 = arith.subf %129, %132 : vector<16x16xf32>
    %134 = math.exp %133 : vector<16x16xf32>
    %cst_90 = arith.constant dense<0.000000e+00> : vector<16xf32>
    %135 = vector.multi_reduction <add>, %134, %cst_90 [1] : vector<16x16xf32> to vector<16xf32>
    %136 = vector.shape_cast %135 : vector<16xf32> to vector<16x1xf32>
    %137 = vector.broadcast %136 : vector<16x1xf32> to vector<16x16xf32>
    %138 = arith.divf %134, %137 : vector<16x16xf32>
    %cst_91 = arith.constant dense<0.000000e+00> : vector<16x8xf32>
    %139 = tpu.matmul %138, %125, %cst_91 {dimension_numbers = #tpu.dot_dimension_numbers<[1], [0], [0], [1], [0, 0, 1, 1], [], []>} : vector<16x16xf32>, vector<16x8xf32>, vector<16x8xf32> -> vector<16x8xf32>
    %140 = vector.extract_strided_slice %83 {offsets = [16, 0], sizes = [8, 64], strides = [1, 1]} : vector<64x64xf32> to vector<8x64xf32>
    %cst_92 = arith.constant dense<0.000000e+00> : vector<16x64xf32>
    %141 = tpu.matmul %139, %140, %cst_92 {dimension_numbers = #tpu.dot_dimension_numbers<[1], [0], [0], [1], [0, 0, 1, 1], [], []>} : vector<16x8xf32>, vector<8x64xf32>, vector<16x64xf32> -> vector<16x64xf32>
    %142 = arith.addf %122, %141 : vector<16x64xf32>
    %143 = vector.extract_strided_slice %81 {offsets = [0, 24], sizes = [16, 8], strides = [1, 1]} : vector<16x192xf32> to vector<16x8xf32>
    %144 = vector.extract_strided_slice %81 {offsets = [0, 88], sizes = [16, 8], strides = [1, 1]} : vector<16x192xf32> to vector<16x8xf32>
    %145 = vector.extract_strided_slice %81 {offsets = [0, 152], sizes = [16, 8], strides = [1, 1]} : vector<16x192xf32> to vector<16x8xf32>
    %cst_93 = arith.constant dense<0.000000e+00> : vector<16x16xf32>
    %146 = tpu.matmul %143, %144, %cst_93 {dimension_numbers = #tpu.dot_dimension_numbers<[1], [1], [0], [0], [0, 0, 1, 0], [], []>} : vector<16x8xf32>, vector<16x8xf32>, vector<16x16xf32> -> vector<16x16xf32>
    %cst_94 = arith.constant 0.353553385 : f32
    %147 = vector.broadcast %cst_94 : f32 to vector<16x16xf32>
    %148 = arith.mulf %146, %147 : vector<16x16xf32>
    %149 = arith.addf %148, %74 : vector<16x16xf32>
    %cst_95 = arith.constant dense<0xFF800000> : vector<16xf32>
    %150 = vector.multi_reduction <maximumf>, %149, %cst_95 [1] : vector<16x16xf32> to vector<16xf32>
    %151 = vector.shape_cast %150 : vector<16xf32> to vector<16x1xf32>
    %152 = vector.broadcast %151 : vector<16x1xf32> to vector<16x16xf32>
    %153 = arith.subf %149, %152 : vector<16x16xf32>
    %154 = math.exp %153 : vector<16x16xf32>
    %cst_96 = arith.constant dense<0.000000e+00> : vector<16xf32>
    %155 = vector.multi_reduction <add>, %154, %cst_96 [1] : vector<16x16xf32> to vector<16xf32>
    %156 = vector.shape_cast %155 : vector<16xf32> to vector<16x1xf32>
    %157 = vector.broadcast %156 : vector<16x1xf32> to vector<16x16xf32>
    %158 = arith.divf %154, %157 : vector<16x16xf32>
    %cst_97 = arith.constant dense<0.000000e+00> : vector<16x8xf32>
    %159 = tpu.matmul %158, %145, %cst_97 {dimension_numbers = #tpu.dot_dimension_numbers<[1], [0], [0], [1], [0, 0, 1, 1], [], []>} : vector<16x16xf32>, vector<16x8xf32>, vector<16x8xf32> -> vector<16x8xf32>
    %160 = vector.extract_strided_slice %83 {offsets = [24, 0], sizes = [8, 64], strides = [1, 1]} : vector<64x64xf32> to vector<8x64xf32>
    %cst_98 = arith.constant dense<0.000000e+00> : vector<16x64xf32>
    %161 = tpu.matmul %159, %160, %cst_98 {dimension_numbers = #tpu.dot_dimension_numbers<[1], [0], [0], [1], [0, 0, 1, 1], [], []>} : vector<16x8xf32>, vector<8x64xf32>, vector<16x64xf32> -> vector<16x64xf32>
    %162 = arith.addf %142, %161 : vector<16x64xf32>
    %163 = vector.extract_strided_slice %81 {offsets = [0, 32], sizes = [16, 8], strides = [1, 1]} : vector<16x192xf32> to vector<16x8xf32>
    %164 = vector.extract_strided_slice %81 {offsets = [0, 96], sizes = [16, 8], strides = [1, 1]} : vector<16x192xf32> to vector<16x8xf32>
    %165 = vector.extract_strided_slice %81 {offsets = [0, 160], sizes = [16, 8], strides = [1, 1]} : vector<16x192xf32> to vector<16x8xf32>
    %cst_99 = arith.constant dense<0.000000e+00> : vector<16x16xf32>
    %166 = tpu.matmul %163, %164, %cst_99 {dimension_numbers = #tpu.dot_dimension_numbers<[1], [1], [0], [0], [0, 0, 1, 0], [], []>} : vector<16x8xf32>, vector<16x8xf32>, vector<16x16xf32> -> vector<16x16xf32>
    %cst_100 = arith.constant 0.353553385 : f32
    %167 = vector.broadcast %cst_100 : f32 to vector<16x16xf32>
    %168 = arith.mulf %166, %167 : vector<16x16xf32>
    %169 = arith.addf %168, %74 : vector<16x16xf32>
    %cst_101 = arith.constant dense<0xFF800000> : vector<16xf32>
    %170 = vector.multi_reduction <maximumf>, %169, %cst_101 [1] : vector<16x16xf32> to vector<16xf32>
    %171 = vector.shape_cast %170 : vector<16xf32> to vector<16x1xf32>
    %172 = vector.broadcast %171 : vector<16x1xf32> to vector<16x16xf32>
    %173 = arith.subf %169, %172 : vector<16x16xf32>
    %174 = math.exp %173 : vector<16x16xf32>
    %cst_102 = arith.constant dense<0.000000e+00> : vector<16xf32>
    %175 = vector.multi_reduction <add>, %174, %cst_102 [1] : vector<16x16xf32> to vector<16xf32>
    %176 = vector.shape_cast %175 : vector<16xf32> to vector<16x1xf32>
    %177 = vector.broadcast %176 : vector<16x1xf32> to vector<16x16xf32>
    %178 = arith.divf %174, %177 : vector<16x16xf32>
    %cst_103 = arith.constant dense<0.000000e+00> : vector<16x8xf32>
    %179 = tpu.matmul %178, %165, %cst_103 {dimension_numbers = #tpu.dot_dimension_numbers<[1], [0], [0], [1], [0, 0, 1, 1], [], []>} : vector<16x16xf32>, vector<16x8xf32>, vector<16x8xf32> -> vector<16x8xf32>
    %180 = vector.extract_strided_slice %83 {offsets = [32, 0], sizes = [8, 64], strides = [1, 1]} : vector<64x64xf32> to vector<8x64xf32>
    %cst_104 = arith.constant dense<0.000000e+00> : vector<16x64xf32>
    %181 = tpu.matmul %179, %180, %cst_104 {dimension_numbers = #tpu.dot_dimension_numbers<[1], [0], [0], [1], [0, 0, 1, 1], [], []>} : vector<16x8xf32>, vector<8x64xf32>, vector<16x64xf32> -> vector<16x64xf32>
    %182 = arith.addf %162, %181 : vector<16x64xf32>
    %183 = vector.extract_strided_slice %81 {offsets = [0, 40], sizes = [16, 8], strides = [1, 1]} : vector<16x192xf32> to vector<16x8xf32>
    %184 = vector.extract_strided_slice %81 {offsets = [0, 104], sizes = [16, 8], strides = [1, 1]} : vector<16x192xf32> to vector<16x8xf32>
    %185 = vector.extract_strided_slice %81 {offsets = [0, 168], sizes = [16, 8], strides = [1, 1]} : vector<16x192xf32> to vector<16x8xf32>
    %cst_105 = arith.constant dense<0.000000e+00> : vector<16x16xf32>
    %186 = tpu.matmul %183, %184, %cst_105 {dimension_numbers = #tpu.dot_dimension_numbers<[1], [1], [0], [0], [0, 0, 1, 0], [], []>} : vector<16x8xf32>, vector<16x8xf32>, vector<16x16xf32> -> vector<16x16xf32>
    %cst_106 = arith.constant 0.353553385 : f32
    %187 = vector.broadcast %cst_106 : f32 to vector<16x16xf32>
    %188 = arith.mulf %186, %187 : vector<16x16xf32>
    %189 = arith.addf %188, %74 : vector<16x16xf32>
    %cst_107 = arith.constant dense<0xFF800000> : vector<16xf32>
    %190 = vector.multi_reduction <maximumf>, %189, %cst_107 [1] : vector<16x16xf32> to vector<16xf32>
    %191 = vector.shape_cast %190 : vector<16xf32> to vector<16x1xf32>
    %192 = vector.broadcast %191 : vector<16x1xf32> to vector<16x16xf32>
    %193 = arith.subf %189, %192 : vector<16x16xf32>
    %194 = math.exp %193 : vector<16x16xf32>
    %cst_108 = arith.constant dense<0.000000e+00> : vector<16xf32>
    %195 = vector.multi_reduction <add>, %194, %cst_108 [1] : vector<16x16xf32> to vector<16xf32>
    %196 = vector.shape_cast %195 : vector<16xf32> to vector<16x1xf32>
    %197 = vector.broadcast %196 : vector<16x1xf32> to vector<16x16xf32>
    %198 = arith.divf %194, %197 : vector<16x16xf32>
    %cst_109 = arith.constant dense<0.000000e+00> : vector<16x8xf32>
    %199 = tpu.matmul %198, %185, %cst_109 {dimension_numbers = #tpu.dot_dimension_numbers<[1], [0], [0], [1], [0, 0, 1, 1], [], []>} : vector<16x16xf32>, vector<16x8xf32>, vector<16x8xf32> -> vector<16x8xf32>
    %200 = vector.extract_strided_slice %83 {offsets = [40, 0], sizes = [8, 64], strides = [1, 1]} : vector<64x64xf32> to vector<8x64xf32>
    %cst_110 = arith.constant dense<0.000000e+00> : vector<16x64xf32>
    %201 = tpu.matmul %199, %200, %cst_110 {dimension_numbers = #tpu.dot_dimension_numbers<[1], [0], [0], [1], [0, 0, 1, 1], [], []>} : vector<16x8xf32>, vector<8x64xf32>, vector<16x64xf32> -> vector<16x64xf32>
    %202 = arith.addf %182, %201 : vector<16x64xf32>
    %203 = vector.extract_strided_slice %81 {offsets = [0, 48], sizes = [16, 8], strides = [1, 1]} : vector<16x192xf32> to vector<16x8xf32>
    %204 = vector.extract_strided_slice %81 {offsets = [0, 112], sizes = [16, 8], strides = [1, 1]} : vector<16x192xf32> to vector<16x8xf32>
    %205 = vector.extract_strided_slice %81 {offsets = [0, 176], sizes = [16, 8], strides = [1, 1]} : vector<16x192xf32> to vector<16x8xf32>
    %cst_111 = arith.constant dense<0.000000e+00> : vector<16x16xf32>
    %206 = tpu.matmul %203, %204, %cst_111 {dimension_numbers = #tpu.dot_dimension_numbers<[1], [1], [0], [0], [0, 0, 1, 0], [], []>} : vector<16x8xf32>, vector<16x8xf32>, vector<16x16xf32> -> vector<16x16xf32>
    %cst_112 = arith.constant 0.353553385 : f32
    %207 = vector.broadcast %cst_112 : f32 to vector<16x16xf32>
    %208 = arith.mulf %206, %207 : vector<16x16xf32>
    %209 = arith.addf %208, %74 : vector<16x16xf32>
    %cst_113 = arith.constant dense<0xFF800000> : vector<16xf32>
    %210 = vector.multi_reduction <maximumf>, %209, %cst_113 [1] : vector<16x16xf32> to vector<16xf32>
    %211 = vector.shape_cast %210 : vector<16xf32> to vector<16x1xf32>
    %212 = vector.broadcast %211 : vector<16x1xf32> to vector<16x16xf32>
    %213 = arith.subf %209, %212 : vector<16x16xf32>
    %214 = math.exp %213 : vector<16x16xf32>
    %cst_114 = arith.constant dense<0.000000e+00> : vector<16xf32>
    %215 = vector.multi_reduction <add>, %214, %cst_114 [1] : vector<16x16xf32> to vector<16xf32>
    %216 = vector.shape_cast %215 : vector<16xf32> to vector<16x1xf32>
    %217 = vector.broadcast %216 : vector<16x1xf32> to vector<16x16xf32>
    %218 = arith.divf %214, %217 : vector<16x16xf32>
    %cst_115 = arith.constant dense<0.000000e+00> : vector<16x8xf32>
    %219 = tpu.matmul %218, %205, %cst_115 {dimension_numbers = #tpu.dot_dimension_numbers<[1], [0], [0], [1], [0, 0, 1, 1], [], []>} : vector<16x16xf32>, vector<16x8xf32>, vector<16x8xf32> -> vector<16x8xf32>
    %220 = vector.extract_strided_slice %83 {offsets = [48, 0], sizes = [8, 64], strides = [1, 1]} : vector<64x64xf32> to vector<8x64xf32>
    %cst_116 = arith.constant dense<0.000000e+00> : vector<16x64xf32>
    %221 = tpu.matmul %219, %220, %cst_116 {dimension_numbers = #tpu.dot_dimension_numbers<[1], [0], [0], [1], [0, 0, 1, 1], [], []>} : vector<16x8xf32>, vector<8x64xf32>, vector<16x64xf32> -> vector<16x64xf32>
    %222 = arith.addf %202, %221 : vector<16x64xf32>
    %223 = vector.extract_strided_slice %81 {offsets = [0, 56], sizes = [16, 8], strides = [1, 1]} : vector<16x192xf32> to vector<16x8xf32>
    %224 = vector.extract_strided_slice %81 {offsets = [0, 120], sizes = [16, 8], strides = [1, 1]} : vector<16x192xf32> to vector<16x8xf32>
    %225 = vector.extract_strided_slice %81 {offsets = [0, 184], sizes = [16, 8], strides = [1, 1]} : vector<16x192xf32> to vector<16x8xf32>
    %cst_117 = arith.constant dense<0.000000e+00> : vector<16x16xf32>
    %226 = tpu.matmul %223, %224, %cst_117 {dimension_numbers = #tpu.dot_dimension_numbers<[1], [1], [0], [0], [0, 0, 1, 0], [], []>} : vector<16x8xf32>, vector<16x8xf32>, vector<16x16xf32> -> vector<16x16xf32>
    %cst_118 = arith.constant 0.353553385 : f32
    %227 = vector.broadcast %cst_118 : f32 to vector<16x16xf32>
    %228 = arith.mulf %226, %227 : vector<16x16xf32>
    %229 = arith.addf %228, %74 : vector<16x16xf32>
    %cst_119 = arith.constant dense<0xFF800000> : vector<16xf32>
    %230 = vector.multi_reduction <maximumf>, %229, %cst_119 [1] : vector<16x16xf32> to vector<16xf32>
    %231 = vector.shape_cast %230 : vector<16xf32> to vector<16x1xf32>
    %232 = vector.broadcast %231 : vector<16x1xf32> to vector<16x16xf32>
    %233 = arith.subf %229, %232 : vector<16x16xf32>
    %234 = math.exp %233 : vector<16x16xf32>
    %cst_120 = arith.constant dense<0.000000e+00> : vector<16xf32>
    %235 = vector.multi_reduction <add>, %234, %cst_120 [1] : vector<16x16xf32> to vector<16xf32>
    %236 = vector.shape_cast %235 : vector<16xf32> to vector<16x1xf32>
    %237 = vector.broadcast %236 : vector<16x1xf32> to vector<16x16xf32>
    %238 = arith.divf %234, %237 : vector<16x16xf32>
    %cst_121 = arith.constant dense<0.000000e+00> : vector<16x8xf32>
    %239 = tpu.matmul %238, %225, %cst_121 {dimension_numbers = #tpu.dot_dimension_numbers<[1], [0], [0], [1], [0, 0, 1, 1], [], []>} : vector<16x16xf32>, vector<16x8xf32>, vector<16x8xf32> -> vector<16x8xf32>
    %240 = vector.extract_strided_slice %83 {offsets = [56, 0], sizes = [8, 64], strides = [1, 1]} : vector<64x64xf32> to vector<8x64xf32>
    %cst_122 = arith.constant dense<0.000000e+00> : vector<16x64xf32>
    %241 = tpu.matmul %239, %240, %cst_122 {dimension_numbers = #tpu.dot_dimension_numbers<[1], [0], [0], [1], [0, 0, 1, 1], [], []>} : vector<16x8xf32>, vector<8x64xf32>, vector<16x64xf32> -> vector<16x64xf32>
    %242 = arith.addf %222, %241 : vector<16x64xf32>
    %c0_123 = arith.constant 0 : index
    %c0_124 = arith.constant 0 : index
    %c0_125 = arith.constant 0 : index
    %243 = vector.load %arg17[%c0_123, %c0_124, %c0_125] : memref<2x1x64xf32, #tpu.memory_space<vmem>>, vector<1x1x64xf32>
    %244 = vector.shape_cast %243 : vector<1x1x64xf32> to vector<1x64xf32>
    %245 = vector.broadcast %244 : vector<1x64xf32> to vector<16x64xf32>
    %246 = arith.addf %242, %245 : vector<16x64xf32>
    %247 = arith.addf %73, %246 : vector<16x64xf32>
    %c0_126 = arith.constant 0 : index
    %c0_127 = arith.constant 0 : index
    %c0_128 = arith.constant 0 : index
    %248 = vector.load %arg18[%c0_126, %c0_127, %c0_128] : memref<2x1x64xf32, #tpu.memory_space<vmem>>, vector<1x1x64xf32>
    %249 = vector.shape_cast %248 : vector<1x1x64xf32> to vector<1x64xf32>
    %c0_129 = arith.constant 0 : index
    %c0_130 = arith.constant 0 : index
    %c0_131 = arith.constant 0 : index
    %250 = vector.load %arg19[%c0_129, %c0_130, %c0_131] : memref<2x1x64xf32, #tpu.memory_space<vmem>>, vector<1x1x64xf32>
    %251 = vector.shape_cast %250 : vector<1x1x64xf32> to vector<1x64xf32>
    %cst_132 = arith.constant dense<0.000000e+00> : vector<16xf32>
    %252 = vector.multi_reduction <add>, %247, %cst_132 [1] : vector<16x64xf32> to vector<16xf32>
    %253 = vector.shape_cast %252 : vector<16xf32> to vector<16x1xf32>
    %cst_133 = arith.constant 6.400000e+01 : f32
    %254 = vector.broadcast %cst_133 : f32 to vector<16x1xf32>
    %255 = arith.divf %253, %254 : vector<16x1xf32>
    %256 = vector.broadcast %255 : vector<16x1xf32> to vector<16x64xf32>
    %257 = arith.subf %247, %256 : vector<16x64xf32>
    %258 = arith.mulf %257, %257 : vector<16x64xf32>
    %cst_134 = arith.constant dense<0.000000e+00> : vector<16xf32>
    %259 = vector.multi_reduction <add>, %258, %cst_134 [1] : vector<16x64xf32> to vector<16xf32>
    %260 = vector.shape_cast %259 : vector<16xf32> to vector<16x1xf32>
    %cst_135 = arith.constant 6.400000e+01 : f32
    %261 = vector.broadcast %cst_135 : f32 to vector<16x1xf32>
    %262 = arith.divf %260, %261 : vector<16x1xf32>
    %cst_136 = arith.constant 9.99999974E-6 : f32
    %263 = vector.broadcast %cst_136 : f32 to vector<16x1xf32>
    %264 = arith.addf %262, %263 : vector<16x1xf32>
    %265 = math.rsqrt %264 : vector<16x1xf32>
    %266 = vector.broadcast %265 : vector<16x1xf32> to vector<16x64xf32>
    %267 = arith.mulf %257, %266 : vector<16x64xf32>
    %268 = vector.broadcast %249 : vector<1x64xf32> to vector<16x64xf32>
    %269 = arith.mulf %267, %268 : vector<16x64xf32>
    %270 = vector.broadcast %251 : vector<1x64xf32> to vector<16x64xf32>
    %271 = arith.addf %269, %270 : vector<16x64xf32>
    %c0_137 = arith.constant 0 : index
    %c0_138 = arith.constant 0 : index
    %c0_139 = arith.constant 0 : index
    %272 = vector.load %arg20[%c0_137, %c0_138, %c0_139] : memref<2x64x256xf32, #tpu.memory_space<vmem>>, vector<1x64x256xf32>
    %273 = vector.shape_cast %272 : vector<1x64x256xf32> to vector<64x256xf32>
    %cst_140 = arith.constant dense<0.000000e+00> : vector<16x256xf32>
    %274 = tpu.matmul %271, %273, %cst_140 {dimension_numbers = #tpu.dot_dimension_numbers<[1], [0], [0], [1], [0, 0, 1, 1], [], []>} : vector<16x64xf32>, vector<64x256xf32>, vector<16x256xf32> -> vector<16x256xf32>
    %c0_141 = arith.constant 0 : index
    %c0_142 = arith.constant 0 : index
    %c0_143 = arith.constant 0 : index
    %275 = vector.load %arg21[%c0_141, %c0_142, %c0_143] : memref<2x1x256xf32, #tpu.memory_space<vmem>>, vector<1x1x256xf32>
    %276 = vector.shape_cast %275 : vector<1x1x256xf32> to vector<1x256xf32>
    %277 = vector.broadcast %276 : vector<1x256xf32> to vector<16x256xf32>
    %278 = arith.addf %274, %277 : vector<16x256xf32>
    %cst_144 = arith.constant 0.000000e+00 : f32
    %279 = vector.broadcast %cst_144 : f32 to vector<16x256xf32>
    %280 = arith.maximumf %278, %279 : vector<16x256xf32>
    %c0_145 = arith.constant 0 : index
    %c0_146 = arith.constant 0 : index
    %c0_147 = arith.constant 0 : index
    %281 = vector.load %arg22[%c0_145, %c0_146, %c0_147] : memref<2x256x64xf32, #tpu.memory_space<vmem>>, vector<1x256x64xf32>
    %282 = vector.shape_cast %281 : vector<1x256x64xf32> to vector<256x64xf32>
    %cst_148 = arith.constant dense<0.000000e+00> : vector<16x64xf32>
    %283 = tpu.matmul %280, %282, %cst_148 {dimension_numbers = #tpu.dot_dimension_numbers<[1], [0], [0], [1], [0, 0, 1, 1], [], []>} : vector<16x256xf32>, vector<256x64xf32>, vector<16x64xf32> -> vector<16x64xf32>
    %c0_149 = arith.constant 0 : index
    %c0_150 = arith.constant 0 : index
    %c0_151 = arith.constant 0 : index
    %284 = vector.load %arg23[%c0_149, %c0_150, %c0_151] : memref<2x1x64xf32, #tpu.memory_space<vmem>>, vector<1x1x64xf32>
    %285 = vector.shape_cast %284 : vector<1x1x64xf32> to vector<1x64xf32>
    %286 = vector.broadcast %285 : vector<1x64xf32> to vector<16x64xf32>
    %287 = arith.addf %283, %286 : vector<16x64xf32>
    %288 = arith.addf %271, %287 : vector<16x64xf32>
    %c0_152 = arith.constant 0 : index
    %c0_153 = arith.constant 0 : index
    %c0_154 = arith.constant 0 : index
    %289 = vector.load %arg24[%c0_152, %c0_153, %c0_154] : memref<2x1x64xf32, #tpu.memory_space<vmem>>, vector<1x1x64xf32>
    %290 = vector.shape_cast %289 : vector<1x1x64xf32> to vector<1x64xf32>
    %c0_155 = arith.constant 0 : index
    %c0_156 = arith.constant 0 : index
    %c0_157 = arith.constant 0 : index
    %291 = vector.load %arg25[%c0_155, %c0_156, %c0_157] : memref<2x1x64xf32, #tpu.memory_space<vmem>>, vector<1x1x64xf32>
    %292 = vector.shape_cast %291 : vector<1x1x64xf32> to vector<1x64xf32>
    %cst_158 = arith.constant dense<0.000000e+00> : vector<16xf32>
    %293 = vector.multi_reduction <add>, %288, %cst_158 [1] : vector<16x64xf32> to vector<16xf32>
    %294 = vector.shape_cast %293 : vector<16xf32> to vector<16x1xf32>
    %cst_159 = arith.constant 6.400000e+01 : f32
    %295 = vector.broadcast %cst_159 : f32 to vector<16x1xf32>
    %296 = arith.divf %294, %295 : vector<16x1xf32>
    %297 = vector.broadcast %296 : vector<16x1xf32> to vector<16x64xf32>
    %298 = arith.subf %288, %297 : vector<16x64xf32>
    %299 = arith.mulf %298, %298 : vector<16x64xf32>
    %cst_160 = arith.constant dense<0.000000e+00> : vector<16xf32>
    %300 = vector.multi_reduction <add>, %299, %cst_160 [1] : vector<16x64xf32> to vector<16xf32>
    %301 = vector.shape_cast %300 : vector<16xf32> to vector<16x1xf32>
    %cst_161 = arith.constant 6.400000e+01 : f32
    %302 = vector.broadcast %cst_161 : f32 to vector<16x1xf32>
    %303 = arith.divf %301, %302 : vector<16x1xf32>
    %cst_162 = arith.constant 9.99999974E-6 : f32
    %304 = vector.broadcast %cst_162 : f32 to vector<16x1xf32>
    %305 = arith.addf %303, %304 : vector<16x1xf32>
    %306 = math.rsqrt %305 : vector<16x1xf32>
    %307 = vector.broadcast %306 : vector<16x1xf32> to vector<16x64xf32>
    %308 = arith.mulf %298, %307 : vector<16x64xf32>
    %309 = vector.broadcast %290 : vector<1x64xf32> to vector<16x64xf32>
    %310 = arith.mulf %308, %309 : vector<16x64xf32>
    %311 = vector.broadcast %292 : vector<1x64xf32> to vector<16x64xf32>
    %312 = arith.addf %310, %311 : vector<16x64xf32>
    %c1_163 = arith.constant 1 : index
    %c0_164 = arith.constant 0 : index
    %c0_165 = arith.constant 0 : index
    %313 = vector.load %arg14[%c1_163, %c0_164, %c0_165] : memref<2x64x192xf32, #tpu.memory_space<vmem>>, vector<1x64x192xf32>
    %314 = vector.shape_cast %313 : vector<1x64x192xf32> to vector<64x192xf32>
    %cst_166 = arith.constant dense<0.000000e+00> : vector<16x192xf32>
    %315 = tpu.matmul %312, %314, %cst_166 {dimension_numbers = #tpu.dot_dimension_numbers<[1], [0], [0], [1], [0, 0, 1, 1], [], []>} : vector<16x64xf32>, vector<64x192xf32>, vector<16x192xf32> -> vector<16x192xf32>
    %c1_167 = arith.constant 1 : index
    %c0_168 = arith.constant 0 : index
    %c0_169 = arith.constant 0 : index
    %316 = vector.load %arg15[%c1_167, %c0_168, %c0_169] : memref<2x1x192xf32, #tpu.memory_space<vmem>>, vector<1x1x192xf32>
    %317 = vector.shape_cast %316 : vector<1x1x192xf32> to vector<1x192xf32>
    %318 = vector.broadcast %317 : vector<1x192xf32> to vector<16x192xf32>
    %319 = arith.addf %315, %318 : vector<16x192xf32>
    %c1_170 = arith.constant 1 : index
    %c0_171 = arith.constant 0 : index
    %c0_172 = arith.constant 0 : index
    %320 = vector.load %arg16[%c1_170, %c0_171, %c0_172] : memref<2x64x64xf32, #tpu.memory_space<vmem>>, vector<1x64x64xf32>
    %321 = vector.shape_cast %320 : vector<1x64x64xf32> to vector<64x64xf32>
    %322 = vector.extract_strided_slice %319 {offsets = [0, 0], sizes = [16, 8], strides = [1, 1]} : vector<16x192xf32> to vector<16x8xf32>
    %323 = vector.extract_strided_slice %319 {offsets = [0, 64], sizes = [16, 8], strides = [1, 1]} : vector<16x192xf32> to vector<16x8xf32>
    %324 = vector.extract_strided_slice %319 {offsets = [0, 128], sizes = [16, 8], strides = [1, 1]} : vector<16x192xf32> to vector<16x8xf32>
    %cst_173 = arith.constant dense<0.000000e+00> : vector<16x16xf32>
    %325 = tpu.matmul %322, %323, %cst_173 {dimension_numbers = #tpu.dot_dimension_numbers<[1], [1], [0], [0], [0, 0, 1, 0], [], []>} : vector<16x8xf32>, vector<16x8xf32>, vector<16x16xf32> -> vector<16x16xf32>
    %cst_174 = arith.constant 0.353553385 : f32
    %326 = vector.broadcast %cst_174 : f32 to vector<16x16xf32>
    %327 = arith.mulf %325, %326 : vector<16x16xf32>
    %328 = arith.addf %327, %74 : vector<16x16xf32>
    %cst_175 = arith.constant dense<0xFF800000> : vector<16xf32>
    %329 = vector.multi_reduction <maximumf>, %328, %cst_175 [1] : vector<16x16xf32> to vector<16xf32>
    %330 = vector.shape_cast %329 : vector<16xf32> to vector<16x1xf32>
    %331 = vector.broadcast %330 : vector<16x1xf32> to vector<16x16xf32>
    %332 = arith.subf %328, %331 : vector<16x16xf32>
    %333 = math.exp %332 : vector<16x16xf32>
    %cst_176 = arith.constant dense<0.000000e+00> : vector<16xf32>
    %334 = vector.multi_reduction <add>, %333, %cst_176 [1] : vector<16x16xf32> to vector<16xf32>
    %335 = vector.shape_cast %334 : vector<16xf32> to vector<16x1xf32>
    %336 = vector.broadcast %335 : vector<16x1xf32> to vector<16x16xf32>
    %337 = arith.divf %333, %336 : vector<16x16xf32>
    %cst_177 = arith.constant dense<0.000000e+00> : vector<16x8xf32>
    %338 = tpu.matmul %337, %324, %cst_177 {dimension_numbers = #tpu.dot_dimension_numbers<[1], [0], [0], [1], [0, 0, 1, 1], [], []>} : vector<16x16xf32>, vector<16x8xf32>, vector<16x8xf32> -> vector<16x8xf32>
    %339 = vector.extract_strided_slice %321 {offsets = [0, 0], sizes = [8, 64], strides = [1, 1]} : vector<64x64xf32> to vector<8x64xf32>
    %cst_178 = arith.constant dense<0.000000e+00> : vector<16x64xf32>
    %340 = tpu.matmul %338, %339, %cst_178 {dimension_numbers = #tpu.dot_dimension_numbers<[1], [0], [0], [1], [0, 0, 1, 1], [], []>} : vector<16x8xf32>, vector<8x64xf32>, vector<16x64xf32> -> vector<16x64xf32>
    %341 = vector.extract_strided_slice %319 {offsets = [0, 8], sizes = [16, 8], strides = [1, 1]} : vector<16x192xf32> to vector<16x8xf32>
    %342 = vector.extract_strided_slice %319 {offsets = [0, 72], sizes = [16, 8], strides = [1, 1]} : vector<16x192xf32> to vector<16x8xf32>
    %343 = vector.extract_strided_slice %319 {offsets = [0, 136], sizes = [16, 8], strides = [1, 1]} : vector<16x192xf32> to vector<16x8xf32>
    %cst_179 = arith.constant dense<0.000000e+00> : vector<16x16xf32>
    %344 = tpu.matmul %341, %342, %cst_179 {dimension_numbers = #tpu.dot_dimension_numbers<[1], [1], [0], [0], [0, 0, 1, 0], [], []>} : vector<16x8xf32>, vector<16x8xf32>, vector<16x16xf32> -> vector<16x16xf32>
    %cst_180 = arith.constant 0.353553385 : f32
    %345 = vector.broadcast %cst_180 : f32 to vector<16x16xf32>
    %346 = arith.mulf %344, %345 : vector<16x16xf32>
    %347 = arith.addf %346, %74 : vector<16x16xf32>
    %cst_181 = arith.constant dense<0xFF800000> : vector<16xf32>
    %348 = vector.multi_reduction <maximumf>, %347, %cst_181 [1] : vector<16x16xf32> to vector<16xf32>
    %349 = vector.shape_cast %348 : vector<16xf32> to vector<16x1xf32>
    %350 = vector.broadcast %349 : vector<16x1xf32> to vector<16x16xf32>
    %351 = arith.subf %347, %350 : vector<16x16xf32>
    %352 = math.exp %351 : vector<16x16xf32>
    %cst_182 = arith.constant dense<0.000000e+00> : vector<16xf32>
    %353 = vector.multi_reduction <add>, %352, %cst_182 [1] : vector<16x16xf32> to vector<16xf32>
    %354 = vector.shape_cast %353 : vector<16xf32> to vector<16x1xf32>
    %355 = vector.broadcast %354 : vector<16x1xf32> to vector<16x16xf32>
    %356 = arith.divf %352, %355 : vector<16x16xf32>
    %cst_183 = arith.constant dense<0.000000e+00> : vector<16x8xf32>
    %357 = tpu.matmul %356, %343, %cst_183 {dimension_numbers = #tpu.dot_dimension_numbers<[1], [0], [0], [1], [0, 0, 1, 1], [], []>} : vector<16x16xf32>, vector<16x8xf32>, vector<16x8xf32> -> vector<16x8xf32>
    %358 = vector.extract_strided_slice %321 {offsets = [8, 0], sizes = [8, 64], strides = [1, 1]} : vector<64x64xf32> to vector<8x64xf32>
    %cst_184 = arith.constant dense<0.000000e+00> : vector<16x64xf32>
    %359 = tpu.matmul %357, %358, %cst_184 {dimension_numbers = #tpu.dot_dimension_numbers<[1], [0], [0], [1], [0, 0, 1, 1], [], []>} : vector<16x8xf32>, vector<8x64xf32>, vector<16x64xf32> -> vector<16x64xf32>
    %360 = arith.addf %340, %359 : vector<16x64xf32>
    %361 = vector.extract_strided_slice %319 {offsets = [0, 16], sizes = [16, 8], strides = [1, 1]} : vector<16x192xf32> to vector<16x8xf32>
    %362 = vector.extract_strided_slice %319 {offsets = [0, 80], sizes = [16, 8], strides = [1, 1]} : vector<16x192xf32> to vector<16x8xf32>
    %363 = vector.extract_strided_slice %319 {offsets = [0, 144], sizes = [16, 8], strides = [1, 1]} : vector<16x192xf32> to vector<16x8xf32>
    %cst_185 = arith.constant dense<0.000000e+00> : vector<16x16xf32>
    %364 = tpu.matmul %361, %362, %cst_185 {dimension_numbers = #tpu.dot_dimension_numbers<[1], [1], [0], [0], [0, 0, 1, 0], [], []>} : vector<16x8xf32>, vector<16x8xf32>, vector<16x16xf32> -> vector<16x16xf32>
    %cst_186 = arith.constant 0.353553385 : f32
    %365 = vector.broadcast %cst_186 : f32 to vector<16x16xf32>
    %366 = arith.mulf %364, %365 : vector<16x16xf32>
    %367 = arith.addf %366, %74 : vector<16x16xf32>
    %cst_187 = arith.constant dense<0xFF800000> : vector<16xf32>
    %368 = vector.multi_reduction <maximumf>, %367, %cst_187 [1] : vector<16x16xf32> to vector<16xf32>
    %369 = vector.shape_cast %368 : vector<16xf32> to vector<16x1xf32>
    %370 = vector.broadcast %369 : vector<16x1xf32> to vector<16x16xf32>
    %371 = arith.subf %367, %370 : vector<16x16xf32>
    %372 = math.exp %371 : vector<16x16xf32>
    %cst_188 = arith.constant dense<0.000000e+00> : vector<16xf32>
    %373 = vector.multi_reduction <add>, %372, %cst_188 [1] : vector<16x16xf32> to vector<16xf32>
    %374 = vector.shape_cast %373 : vector<16xf32> to vector<16x1xf32>
    %375 = vector.broadcast %374 : vector<16x1xf32> to vector<16x16xf32>
    %376 = arith.divf %372, %375 : vector<16x16xf32>
    %cst_189 = arith.constant dense<0.000000e+00> : vector<16x8xf32>
    %377 = tpu.matmul %376, %363, %cst_189 {dimension_numbers = #tpu.dot_dimension_numbers<[1], [0], [0], [1], [0, 0, 1, 1], [], []>} : vector<16x16xf32>, vector<16x8xf32>, vector<16x8xf32> -> vector<16x8xf32>
    %378 = vector.extract_strided_slice %321 {offsets = [16, 0], sizes = [8, 64], strides = [1, 1]} : vector<64x64xf32> to vector<8x64xf32>
    %cst_190 = arith.constant dense<0.000000e+00> : vector<16x64xf32>
    %379 = tpu.matmul %377, %378, %cst_190 {dimension_numbers = #tpu.dot_dimension_numbers<[1], [0], [0], [1], [0, 0, 1, 1], [], []>} : vector<16x8xf32>, vector<8x64xf32>, vector<16x64xf32> -> vector<16x64xf32>
    %380 = arith.addf %360, %379 : vector<16x64xf32>
    %381 = vector.extract_strided_slice %319 {offsets = [0, 24], sizes = [16, 8], strides = [1, 1]} : vector<16x192xf32> to vector<16x8xf32>
    %382 = vector.extract_strided_slice %319 {offsets = [0, 88], sizes = [16, 8], strides = [1, 1]} : vector<16x192xf32> to vector<16x8xf32>
    %383 = vector.extract_strided_slice %319 {offsets = [0, 152], sizes = [16, 8], strides = [1, 1]} : vector<16x192xf32> to vector<16x8xf32>
    %cst_191 = arith.constant dense<0.000000e+00> : vector<16x16xf32>
    %384 = tpu.matmul %381, %382, %cst_191 {dimension_numbers = #tpu.dot_dimension_numbers<[1], [1], [0], [0], [0, 0, 1, 0], [], []>} : vector<16x8xf32>, vector<16x8xf32>, vector<16x16xf32> -> vector<16x16xf32>
    %cst_192 = arith.constant 0.353553385 : f32
    %385 = vector.broadcast %cst_192 : f32 to vector<16x16xf32>
    %386 = arith.mulf %384, %385 : vector<16x16xf32>
    %387 = arith.addf %386, %74 : vector<16x16xf32>
    %cst_193 = arith.constant dense<0xFF800000> : vector<16xf32>
    %388 = vector.multi_reduction <maximumf>, %387, %cst_193 [1] : vector<16x16xf32> to vector<16xf32>
    %389 = vector.shape_cast %388 : vector<16xf32> to vector<16x1xf32>
    %390 = vector.broadcast %389 : vector<16x1xf32> to vector<16x16xf32>
    %391 = arith.subf %387, %390 : vector<16x16xf32>
    %392 = math.exp %391 : vector<16x16xf32>
    %cst_194 = arith.constant dense<0.000000e+00> : vector<16xf32>
    %393 = vector.multi_reduction <add>, %392, %cst_194 [1] : vector<16x16xf32> to vector<16xf32>
    %394 = vector.shape_cast %393 : vector<16xf32> to vector<16x1xf32>
    %395 = vector.broadcast %394 : vector<16x1xf32> to vector<16x16xf32>
    %396 = arith.divf %392, %395 : vector<16x16xf32>
    %cst_195 = arith.constant dense<0.000000e+00> : vector<16x8xf32>
    %397 = tpu.matmul %396, %383, %cst_195 {dimension_numbers = #tpu.dot_dimension_numbers<[1], [0], [0], [1], [0, 0, 1, 1], [], []>} : vector<16x16xf32>, vector<16x8xf32>, vector<16x8xf32> -> vector<16x8xf32>
    %398 = vector.extract_strided_slice %321 {offsets = [24, 0], sizes = [8, 64], strides = [1, 1]} : vector<64x64xf32> to vector<8x64xf32>
    %cst_196 = arith.constant dense<0.000000e+00> : vector<16x64xf32>
    %399 = tpu.matmul %397, %398, %cst_196 {dimension_numbers = #tpu.dot_dimension_numbers<[1], [0], [0], [1], [0, 0, 1, 1], [], []>} : vector<16x8xf32>, vector<8x64xf32>, vector<16x64xf32> -> vector<16x64xf32>
    %400 = arith.addf %380, %399 : vector<16x64xf32>
    %401 = vector.extract_strided_slice %319 {offsets = [0, 32], sizes = [16, 8], strides = [1, 1]} : vector<16x192xf32> to vector<16x8xf32>
    %402 = vector.extract_strided_slice %319 {offsets = [0, 96], sizes = [16, 8], strides = [1, 1]} : vector<16x192xf32> to vector<16x8xf32>
    %403 = vector.extract_strided_slice %319 {offsets = [0, 160], sizes = [16, 8], strides = [1, 1]} : vector<16x192xf32> to vector<16x8xf32>
    %cst_197 = arith.constant dense<0.000000e+00> : vector<16x16xf32>
    %404 = tpu.matmul %401, %402, %cst_197 {dimension_numbers = #tpu.dot_dimension_numbers<[1], [1], [0], [0], [0, 0, 1, 0], [], []>} : vector<16x8xf32>, vector<16x8xf32>, vector<16x16xf32> -> vector<16x16xf32>
    %cst_198 = arith.constant 0.353553385 : f32
    %405 = vector.broadcast %cst_198 : f32 to vector<16x16xf32>
    %406 = arith.mulf %404, %405 : vector<16x16xf32>
    %407 = arith.addf %406, %74 : vector<16x16xf32>
    %cst_199 = arith.constant dense<0xFF800000> : vector<16xf32>
    %408 = vector.multi_reduction <maximumf>, %407, %cst_199 [1] : vector<16x16xf32> to vector<16xf32>
    %409 = vector.shape_cast %408 : vector<16xf32> to vector<16x1xf32>
    %410 = vector.broadcast %409 : vector<16x1xf32> to vector<16x16xf32>
    %411 = arith.subf %407, %410 : vector<16x16xf32>
    %412 = math.exp %411 : vector<16x16xf32>
    %cst_200 = arith.constant dense<0.000000e+00> : vector<16xf32>
    %413 = vector.multi_reduction <add>, %412, %cst_200 [1] : vector<16x16xf32> to vector<16xf32>
    %414 = vector.shape_cast %413 : vector<16xf32> to vector<16x1xf32>
    %415 = vector.broadcast %414 : vector<16x1xf32> to vector<16x16xf32>
    %416 = arith.divf %412, %415 : vector<16x16xf32>
    %cst_201 = arith.constant dense<0.000000e+00> : vector<16x8xf32>
    %417 = tpu.matmul %416, %403, %cst_201 {dimension_numbers = #tpu.dot_dimension_numbers<[1], [0], [0], [1], [0, 0, 1, 1], [], []>} : vector<16x16xf32>, vector<16x8xf32>, vector<16x8xf32> -> vector<16x8xf32>
    %418 = vector.extract_strided_slice %321 {offsets = [32, 0], sizes = [8, 64], strides = [1, 1]} : vector<64x64xf32> to vector<8x64xf32>
    %cst_202 = arith.constant dense<0.000000e+00> : vector<16x64xf32>
    %419 = tpu.matmul %417, %418, %cst_202 {dimension_numbers = #tpu.dot_dimension_numbers<[1], [0], [0], [1], [0, 0, 1, 1], [], []>} : vector<16x8xf32>, vector<8x64xf32>, vector<16x64xf32> -> vector<16x64xf32>
    %420 = arith.addf %400, %419 : vector<16x64xf32>
    %421 = vector.extract_strided_slice %319 {offsets = [0, 40], sizes = [16, 8], strides = [1, 1]} : vector<16x192xf32> to vector<16x8xf32>
    %422 = vector.extract_strided_slice %319 {offsets = [0, 104], sizes = [16, 8], strides = [1, 1]} : vector<16x192xf32> to vector<16x8xf32>
    %423 = vector.extract_strided_slice %319 {offsets = [0, 168], sizes = [16, 8], strides = [1, 1]} : vector<16x192xf32> to vector<16x8xf32>
    %cst_203 = arith.constant dense<0.000000e+00> : vector<16x16xf32>
    %424 = tpu.matmul %421, %422, %cst_203 {dimension_numbers = #tpu.dot_dimension_numbers<[1], [1], [0], [0], [0, 0, 1, 0], [], []>} : vector<16x8xf32>, vector<16x8xf32>, vector<16x16xf32> -> vector<16x16xf32>
    %cst_204 = arith.constant 0.353553385 : f32
    %425 = vector.broadcast %cst_204 : f32 to vector<16x16xf32>
    %426 = arith.mulf %424, %425 : vector<16x16xf32>
    %427 = arith.addf %426, %74 : vector<16x16xf32>
    %cst_205 = arith.constant dense<0xFF800000> : vector<16xf32>
    %428 = vector.multi_reduction <maximumf>, %427, %cst_205 [1] : vector<16x16xf32> to vector<16xf32>
    %429 = vector.shape_cast %428 : vector<16xf32> to vector<16x1xf32>
    %430 = vector.broadcast %429 : vector<16x1xf32> to vector<16x16xf32>
    %431 = arith.subf %427, %430 : vector<16x16xf32>
    %432 = math.exp %431 : vector<16x16xf32>
    %cst_206 = arith.constant dense<0.000000e+00> : vector<16xf32>
    %433 = vector.multi_reduction <add>, %432, %cst_206 [1] : vector<16x16xf32> to vector<16xf32>
    %434 = vector.shape_cast %433 : vector<16xf32> to vector<16x1xf32>
    %435 = vector.broadcast %434 : vector<16x1xf32> to vector<16x16xf32>
    %436 = arith.divf %432, %435 : vector<16x16xf32>
    %cst_207 = arith.constant dense<0.000000e+00> : vector<16x8xf32>
    %437 = tpu.matmul %436, %423, %cst_207 {dimension_numbers = #tpu.dot_dimension_numbers<[1], [0], [0], [1], [0, 0, 1, 1], [], []>} : vector<16x16xf32>, vector<16x8xf32>, vector<16x8xf32> -> vector<16x8xf32>
    %438 = vector.extract_strided_slice %321 {offsets = [40, 0], sizes = [8, 64], strides = [1, 1]} : vector<64x64xf32> to vector<8x64xf32>
    %cst_208 = arith.constant dense<0.000000e+00> : vector<16x64xf32>
    %439 = tpu.matmul %437, %438, %cst_208 {dimension_numbers = #tpu.dot_dimension_numbers<[1], [0], [0], [1], [0, 0, 1, 1], [], []>} : vector<16x8xf32>, vector<8x64xf32>, vector<16x64xf32> -> vector<16x64xf32>
    %440 = arith.addf %420, %439 : vector<16x64xf32>
    %441 = vector.extract_strided_slice %319 {offsets = [0, 48], sizes = [16, 8], strides = [1, 1]} : vector<16x192xf32> to vector<16x8xf32>
    %442 = vector.extract_strided_slice %319 {offsets = [0, 112], sizes = [16, 8], strides = [1, 1]} : vector<16x192xf32> to vector<16x8xf32>
    %443 = vector.extract_strided_slice %319 {offsets = [0, 176], sizes = [16, 8], strides = [1, 1]} : vector<16x192xf32> to vector<16x8xf32>
    %cst_209 = arith.constant dense<0.000000e+00> : vector<16x16xf32>
    %444 = tpu.matmul %441, %442, %cst_209 {dimension_numbers = #tpu.dot_dimension_numbers<[1], [1], [0], [0], [0, 0, 1, 0], [], []>} : vector<16x8xf32>, vector<16x8xf32>, vector<16x16xf32> -> vector<16x16xf32>
    %cst_210 = arith.constant 0.353553385 : f32
    %445 = vector.broadcast %cst_210 : f32 to vector<16x16xf32>
    %446 = arith.mulf %444, %445 : vector<16x16xf32>
    %447 = arith.addf %446, %74 : vector<16x16xf32>
    %cst_211 = arith.constant dense<0xFF800000> : vector<16xf32>
    %448 = vector.multi_reduction <maximumf>, %447, %cst_211 [1] : vector<16x16xf32> to vector<16xf32>
    %449 = vector.shape_cast %448 : vector<16xf32> to vector<16x1xf32>
    %450 = vector.broadcast %449 : vector<16x1xf32> to vector<16x16xf32>
    %451 = arith.subf %447, %450 : vector<16x16xf32>
    %452 = math.exp %451 : vector<16x16xf32>
    %cst_212 = arith.constant dense<0.000000e+00> : vector<16xf32>
    %453 = vector.multi_reduction <add>, %452, %cst_212 [1] : vector<16x16xf32> to vector<16xf32>
    %454 = vector.shape_cast %453 : vector<16xf32> to vector<16x1xf32>
    %455 = vector.broadcast %454 : vector<16x1xf32> to vector<16x16xf32>
    %456 = arith.divf %452, %455 : vector<16x16xf32>
    %cst_213 = arith.constant dense<0.000000e+00> : vector<16x8xf32>
    %457 = tpu.matmul %456, %443, %cst_213 {dimension_numbers = #tpu.dot_dimension_numbers<[1], [0], [0], [1], [0, 0, 1, 1], [], []>} : vector<16x16xf32>, vector<16x8xf32>, vector<16x8xf32> -> vector<16x8xf32>
    %458 = vector.extract_strided_slice %321 {offsets = [48, 0], sizes = [8, 64], strides = [1, 1]} : vector<64x64xf32> to vector<8x64xf32>
    %cst_214 = arith.constant dense<0.000000e+00> : vector<16x64xf32>
    %459 = tpu.matmul %457, %458, %cst_214 {dimension_numbers = #tpu.dot_dimension_numbers<[1], [0], [0], [1], [0, 0, 1, 1], [], []>} : vector<16x8xf32>, vector<8x64xf32>, vector<16x64xf32> -> vector<16x64xf32>
    %460 = arith.addf %440, %459 : vector<16x64xf32>
    %461 = vector.extract_strided_slice %319 {offsets = [0, 56], sizes = [16, 8], strides = [1, 1]} : vector<16x192xf32> to vector<16x8xf32>
    %462 = vector.extract_strided_slice %319 {offsets = [0, 120], sizes = [16, 8], strides = [1, 1]} : vector<16x192xf32> to vector<16x8xf32>
    %463 = vector.extract_strided_slice %319 {offsets = [0, 184], sizes = [16, 8], strides = [1, 1]} : vector<16x192xf32> to vector<16x8xf32>
    %cst_215 = arith.constant dense<0.000000e+00> : vector<16x16xf32>
    %464 = tpu.matmul %461, %462, %cst_215 {dimension_numbers = #tpu.dot_dimension_numbers<[1], [1], [0], [0], [0, 0, 1, 0], [], []>} : vector<16x8xf32>, vector<16x8xf32>, vector<16x16xf32> -> vector<16x16xf32>
    %cst_216 = arith.constant 0.353553385 : f32
    %465 = vector.broadcast %cst_216 : f32 to vector<16x16xf32>
    %466 = arith.mulf %464, %465 : vector<16x16xf32>
    %467 = arith.addf %466, %74 : vector<16x16xf32>
    %cst_217 = arith.constant dense<0xFF800000> : vector<16xf32>
    %468 = vector.multi_reduction <maximumf>, %467, %cst_217 [1] : vector<16x16xf32> to vector<16xf32>
    %469 = vector.shape_cast %468 : vector<16xf32> to vector<16x1xf32>
    %470 = vector.broadcast %469 : vector<16x1xf32> to vector<16x16xf32>
    %471 = arith.subf %467, %470 : vector<16x16xf32>
    %472 = math.exp %471 : vector<16x16xf32>
    %cst_218 = arith.constant dense<0.000000e+00> : vector<16xf32>
    %473 = vector.multi_reduction <add>, %472, %cst_218 [1] : vector<16x16xf32> to vector<16xf32>
    %474 = vector.shape_cast %473 : vector<16xf32> to vector<16x1xf32>
    %475 = vector.broadcast %474 : vector<16x1xf32> to vector<16x16xf32>
    %476 = arith.divf %472, %475 : vector<16x16xf32>
    %cst_219 = arith.constant dense<0.000000e+00> : vector<16x8xf32>
    %477 = tpu.matmul %476, %463, %cst_219 {dimension_numbers = #tpu.dot_dimension_numbers<[1], [0], [0], [1], [0, 0, 1, 1], [], []>} : vector<16x16xf32>, vector<16x8xf32>, vector<16x8xf32> -> vector<16x8xf32>
    %478 = vector.extract_strided_slice %321 {offsets = [56, 0], sizes = [8, 64], strides = [1, 1]} : vector<64x64xf32> to vector<8x64xf32>
    %cst_220 = arith.constant dense<0.000000e+00> : vector<16x64xf32>
    %479 = tpu.matmul %477, %478, %cst_220 {dimension_numbers = #tpu.dot_dimension_numbers<[1], [0], [0], [1], [0, 0, 1, 1], [], []>} : vector<16x8xf32>, vector<8x64xf32>, vector<16x64xf32> -> vector<16x64xf32>
    %480 = arith.addf %460, %479 : vector<16x64xf32>
    %c1_221 = arith.constant 1 : index
    %c0_222 = arith.constant 0 : index
    %c0_223 = arith.constant 0 : index
    %481 = vector.load %arg17[%c1_221, %c0_222, %c0_223] : memref<2x1x64xf32, #tpu.memory_space<vmem>>, vector<1x1x64xf32>
    %482 = vector.shape_cast %481 : vector<1x1x64xf32> to vector<1x64xf32>
    %483 = vector.broadcast %482 : vector<1x64xf32> to vector<16x64xf32>
    %484 = arith.addf %480, %483 : vector<16x64xf32>
    %485 = arith.addf %312, %484 : vector<16x64xf32>
    %c1_224 = arith.constant 1 : index
    %c0_225 = arith.constant 0 : index
    %c0_226 = arith.constant 0 : index
    %486 = vector.load %arg18[%c1_224, %c0_225, %c0_226] : memref<2x1x64xf32, #tpu.memory_space<vmem>>, vector<1x1x64xf32>
    %487 = vector.shape_cast %486 : vector<1x1x64xf32> to vector<1x64xf32>
    %c1_227 = arith.constant 1 : index
    %c0_228 = arith.constant 0 : index
    %c0_229 = arith.constant 0 : index
    %488 = vector.load %arg19[%c1_227, %c0_228, %c0_229] : memref<2x1x64xf32, #tpu.memory_space<vmem>>, vector<1x1x64xf32>
    %489 = vector.shape_cast %488 : vector<1x1x64xf32> to vector<1x64xf32>
    %cst_230 = arith.constant dense<0.000000e+00> : vector<16xf32>
    %490 = vector.multi_reduction <add>, %485, %cst_230 [1] : vector<16x64xf32> to vector<16xf32>
    %491 = vector.shape_cast %490 : vector<16xf32> to vector<16x1xf32>
    %cst_231 = arith.constant 6.400000e+01 : f32
    %492 = vector.broadcast %cst_231 : f32 to vector<16x1xf32>
    %493 = arith.divf %491, %492 : vector<16x1xf32>
    %494 = vector.broadcast %493 : vector<16x1xf32> to vector<16x64xf32>
    %495 = arith.subf %485, %494 : vector<16x64xf32>
    %496 = arith.mulf %495, %495 : vector<16x64xf32>
    %cst_232 = arith.constant dense<0.000000e+00> : vector<16xf32>
    %497 = vector.multi_reduction <add>, %496, %cst_232 [1] : vector<16x64xf32> to vector<16xf32>
    %498 = vector.shape_cast %497 : vector<16xf32> to vector<16x1xf32>
    %cst_233 = arith.constant 6.400000e+01 : f32
    %499 = vector.broadcast %cst_233 : f32 to vector<16x1xf32>
    %500 = arith.divf %498, %499 : vector<16x1xf32>
    %cst_234 = arith.constant 9.99999974E-6 : f32
    %501 = vector.broadcast %cst_234 : f32 to vector<16x1xf32>
    %502 = arith.addf %500, %501 : vector<16x1xf32>
    %503 = math.rsqrt %502 : vector<16x1xf32>
    %504 = vector.broadcast %503 : vector<16x1xf32> to vector<16x64xf32>
    %505 = arith.mulf %495, %504 : vector<16x64xf32>
    %506 = vector.broadcast %487 : vector<1x64xf32> to vector<16x64xf32>
    %507 = arith.mulf %505, %506 : vector<16x64xf32>
    %508 = vector.broadcast %489 : vector<1x64xf32> to vector<16x64xf32>
    %509 = arith.addf %507, %508 : vector<16x64xf32>
    %c1_235 = arith.constant 1 : index
    %c0_236 = arith.constant 0 : index
    %c0_237 = arith.constant 0 : index
    %510 = vector.load %arg20[%c1_235, %c0_236, %c0_237] : memref<2x64x256xf32, #tpu.memory_space<vmem>>, vector<1x64x256xf32>
    %511 = vector.shape_cast %510 : vector<1x64x256xf32> to vector<64x256xf32>
    %cst_238 = arith.constant dense<0.000000e+00> : vector<16x256xf32>
    %512 = tpu.matmul %509, %511, %cst_238 {dimension_numbers = #tpu.dot_dimension_numbers<[1], [0], [0], [1], [0, 0, 1, 1], [], []>} : vector<16x64xf32>, vector<64x256xf32>, vector<16x256xf32> -> vector<16x256xf32>
    %c1_239 = arith.constant 1 : index
    %c0_240 = arith.constant 0 : index
    %c0_241 = arith.constant 0 : index
    %513 = vector.load %arg21[%c1_239, %c0_240, %c0_241] : memref<2x1x256xf32, #tpu.memory_space<vmem>>, vector<1x1x256xf32>
    %514 = vector.shape_cast %513 : vector<1x1x256xf32> to vector<1x256xf32>
    %515 = vector.broadcast %514 : vector<1x256xf32> to vector<16x256xf32>
    %516 = arith.addf %512, %515 : vector<16x256xf32>
    %cst_242 = arith.constant 0.000000e+00 : f32
    %517 = vector.broadcast %cst_242 : f32 to vector<16x256xf32>
    %518 = arith.maximumf %516, %517 : vector<16x256xf32>
    %c1_243 = arith.constant 1 : index
    %c0_244 = arith.constant 0 : index
    %c0_245 = arith.constant 0 : index
    %519 = vector.load %arg22[%c1_243, %c0_244, %c0_245] : memref<2x256x64xf32, #tpu.memory_space<vmem>>, vector<1x256x64xf32>
    %520 = vector.shape_cast %519 : vector<1x256x64xf32> to vector<256x64xf32>
    %cst_246 = arith.constant dense<0.000000e+00> : vector<16x64xf32>
    %521 = tpu.matmul %518, %520, %cst_246 {dimension_numbers = #tpu.dot_dimension_numbers<[1], [0], [0], [1], [0, 0, 1, 1], [], []>} : vector<16x256xf32>, vector<256x64xf32>, vector<16x64xf32> -> vector<16x64xf32>
    %c1_247 = arith.constant 1 : index
    %c0_248 = arith.constant 0 : index
    %c0_249 = arith.constant 0 : index
    %522 = vector.load %arg23[%c1_247, %c0_248, %c0_249] : memref<2x1x64xf32, #tpu.memory_space<vmem>>, vector<1x1x64xf32>
    %523 = vector.shape_cast %522 : vector<1x1x64xf32> to vector<1x64xf32>
    %524 = vector.broadcast %523 : vector<1x64xf32> to vector<16x64xf32>
    %525 = arith.addf %521, %524 : vector<16x64xf32>
    %526 = arith.addf %509, %525 : vector<16x64xf32>
    %c1_250 = arith.constant 1 : index
    %c0_251 = arith.constant 0 : index
    %c0_252 = arith.constant 0 : index
    %527 = vector.load %arg24[%c1_250, %c0_251, %c0_252] : memref<2x1x64xf32, #tpu.memory_space<vmem>>, vector<1x1x64xf32>
    %528 = vector.shape_cast %527 : vector<1x1x64xf32> to vector<1x64xf32>
    %c1_253 = arith.constant 1 : index
    %c0_254 = arith.constant 0 : index
    %c0_255 = arith.constant 0 : index
    %529 = vector.load %arg25[%c1_253, %c0_254, %c0_255] : memref<2x1x64xf32, #tpu.memory_space<vmem>>, vector<1x1x64xf32>
    %530 = vector.shape_cast %529 : vector<1x1x64xf32> to vector<1x64xf32>
    %cst_256 = arith.constant dense<0.000000e+00> : vector<16xf32>
    %531 = vector.multi_reduction <add>, %526, %cst_256 [1] : vector<16x64xf32> to vector<16xf32>
    %532 = vector.shape_cast %531 : vector<16xf32> to vector<16x1xf32>
    %cst_257 = arith.constant 6.400000e+01 : f32
    %533 = vector.broadcast %cst_257 : f32 to vector<16x1xf32>
    %534 = arith.divf %532, %533 : vector<16x1xf32>
    %535 = vector.broadcast %534 : vector<16x1xf32> to vector<16x64xf32>
    %536 = arith.subf %526, %535 : vector<16x64xf32>
    %537 = arith.mulf %536, %536 : vector<16x64xf32>
    %cst_258 = arith.constant dense<0.000000e+00> : vector<16xf32>
    %538 = vector.multi_reduction <add>, %537, %cst_258 [1] : vector<16x64xf32> to vector<16xf32>
    %539 = vector.shape_cast %538 : vector<16xf32> to vector<16x1xf32>
    %cst_259 = arith.constant 6.400000e+01 : f32
    %540 = vector.broadcast %cst_259 : f32 to vector<16x1xf32>
    %541 = arith.divf %539, %540 : vector<16x1xf32>
    %cst_260 = arith.constant 9.99999974E-6 : f32
    %542 = vector.broadcast %cst_260 : f32 to vector<16x1xf32>
    %543 = arith.addf %541, %542 : vector<16x1xf32>
    %544 = math.rsqrt %543 : vector<16x1xf32>
    %545 = vector.broadcast %544 : vector<16x1xf32> to vector<16x64xf32>
    %546 = arith.mulf %536, %545 : vector<16x64xf32>
    %547 = vector.broadcast %528 : vector<1x64xf32> to vector<16x64xf32>
    %548 = arith.mulf %546, %547 : vector<16x64xf32>
    %549 = vector.broadcast %530 : vector<1x64xf32> to vector<16x64xf32>
    %550 = arith.addf %548, %549 : vector<16x64xf32>
    %c0_261 = arith.constant 0 : index
    %c0_262 = arith.constant 0 : index
    %551 = vector.load %arg2[%c0_261, %c0_262] : memref<2x16xf32, #tpu.memory_space<vmem>>, vector<2x16xf32>
    %cst_263 = arith.constant dense<0.000000e+00> : vector<2x64xf32>
    %552 = tpu.matmul %551, %550, %cst_263 {dimension_numbers = #tpu.dot_dimension_numbers<[1], [0], [0], [1], [0, 0, 1, 1], [], []>} : vector<2x16xf32>, vector<16x64xf32>, vector<2x64xf32> -> vector<2x64xf32>
    %c0_264 = arith.constant 0 : index
    %c0_265 = arith.constant 0 : index
    %553 = vector.load %arg26[%c0_264, %c0_265] : memref<64x128xf32, #tpu.memory_space<vmem>>, vector<64x128xf32>
    %cst_266 = arith.constant dense<0.000000e+00> : vector<2x128xf32>
    %554 = tpu.matmul %552, %553, %cst_266 {dimension_numbers = #tpu.dot_dimension_numbers<[1], [0], [0], [1], [0, 0, 1, 1], [], []>} : vector<2x64xf32>, vector<64x128xf32>, vector<2x128xf32> -> vector<2x128xf32>
    %c0_267 = arith.constant 0 : index
    %c0_268 = arith.constant 0 : index
    %555 = vector.load %arg27[%c0_267, %c0_268] : memref<1x128xf32, #tpu.memory_space<vmem>>, vector<1x128xf32>
    %556 = vector.broadcast %555 : vector<1x128xf32> to vector<2x128xf32>
    %557 = arith.addf %554, %556 : vector<2x128xf32>
    %c0_269 = arith.constant 0 : index
    %c0_270 = arith.constant 0 : index
    %558 = vector.load %arg28[%c0_269, %c0_270] : memref<2x128xf32, #tpu.memory_space<vmem>>, vector<2x128xf32>
    tpu.vector_store %arg28[%c0_269, %c0_270], %557 {strides = array<i32>} : memref<2x128xf32, #tpu.memory_space<vmem>>, vector<2x128xf32>,
    return
  }
}

</mosaic_0001>

<bundles_post_ra>
// kernel: forward.1
= control target key start
LH: loop header
LB: loop body
LE: loop exit
PB: predicated region body
PF: predicated region fallthrough
CT: control target
= control target key end

     0   :  { %s7973_s0 = inlined_call_operand.vmem [shape: f32[160,84], index: 0, kind: input, shape index: {}]   ;;  %s7974_s1 = inlined_call_operand.vmem [shape: f32[16,16], index: 1, kind: input, shape index: {}]   ;;  %s7975_s2 = inlined_call_operand.vmem [shape: f32[2,16], index: 2, kind: input, shape index: {}]   ;;  %s7976_s3 = inlined_call_operand.vmem [shape: f32[84,64], index: 3, kind: input, shape index: {}]   ;;  %s7977_s4 = inlined_call_operand.vmem [shape: f32[1,64], index: 4, kind: input, shape index: {}]   ;;  %s7978_s5 = inlined_call_operand.vmem [shape: f32[1,64], index: 5, kind: input, shape index: {}]   ;;  %s7979_s6 = inlined_call_operand.vmem [shape: f32[1,64], index: 6, kind: input, shape index: {}]   ;;  %s7980_s7 = inlined_call_operand.vmem [shape: f32[80,160], index: 7, kind: input, shape index: {}]   ;;  %s7981_s8 = inlined_call_operand.vmem [shape: f32[5,80,80], index: 8, kind: input, shape index: {}]   ;;  %s7982_s9 = inlined_call_operand.vmem [shape: f32[5,64,64], index: 9, kind: input, shape index: {}]   ;;  %s7983_s10 = inlined_call_operand.vmem [shape: f32[1,64], index: 10, kind: input, shape index: {}]   ;;  %s7984_s11 = inlined_call_operand.vmem [shape: f32[1,64], index: 11, kind: input, shape index: {}]   ;;  %s7985_s12 = inlined_call_operand.vmem [shape: f32[16,80], index: 12, kind: input, shape index: {}]   ;;  %s7986_s13 = inlined_call_operand.vmem [shape: f32[16,64], index: 13, kind: input, shape index: {}]   ;;  %s7987_s14 = inlined_call_operand.vmem [shape: f32[2,64,192], index: 14, kind: input, shape index: {}]   ;;  %s7988_s15 = inlined_call_operand.vmem [shape: f32[2,1,192], index: 15, kind: input, shape index: {}]   ;;  %s7989_s16 = inlined_call_operand.vmem [shape: f32[2,64,64], index: 16, kind: input, shape index: {}]   ;;  %s7990_s17 = inlined_call_operand.vmem [shape: f32[2,1,64], index: 17, kind: input, shape index: {}]   ;;  %s7991_s18 = inlined_call_operand.vmem [shape: f32[2,1,64], index: 18, kind: input, shape index: {}]   ;;  %s7992_s19 = inlined_call_operand.vmem [shape: f32[2,1,64], index: 19, kind: input, shape index: {}]   ;;  %s7993_s20 = inlined_call_operand.vmem [shape: f32[2,64,256], index: 20, kind: input, shape index: {}]   ;;  %s7994_s21 = inlined_call_operand.vmem [shape: f32[2,1,256], index: 21, kind: input, shape index: {}]   ;;  %s7995_s22 = inlined_call_operand.vmem [shape: f32[2,256,64], index: 22, kind: input, shape index: {}]   ;;  %s7996_s23 = inlined_call_operand.vmem [shape: f32[2,1,64], index: 23, kind: input, shape index: {}]   ;;  %s7997_s24 = inlined_call_operand.vmem [shape: f32[2,1,64], index: 24, kind: input, shape index: {}]   ;;  %s7998_s25 = inlined_call_operand.vmem [shape: f32[2,1,64], index: 25, kind: input, shape index: {}]   ;;  %s7999_s26 = inlined_call_operand.vmem [shape: f32[64,128], index: 26, kind: input, shape index: {}]   ;;  %s8000_s27 = inlined_call_operand.vmem [shape: f32[1,128], index: 27, kind: input, shape index: {}]   ;;  %s8001_s28 = inlined_call_operand.hbm [shape: f32[2,128], index: 28, kind: output, shape index: {}]  }
   0x1   :  { %8029 = sst [smem:[#allocation5_spill]] %s7973_s0 }
   0x2   :  { %8030 = sst [smem:[#allocation6_spill]] %s7974_s1 }
   0x3   :  { %8031 = sst [smem:[#allocation7_spill]] %s7975_s2 }
   0x4   :  { %8032 = sst [smem:[#allocation8_spill]] %s7976_s3 }
   0x5   :  { %8033 = sst [smem:[#allocation9_spill]] %s7977_s4 }
   0x6   :  { %8034 = sst [smem:[#allocation10_spill]] %s7978_s5 }
   0x7   :  { %8035 = sst [smem:[#allocation11_spill]] %s7979_s6 }
   0x8   :  { %8036 = sst [smem:[#allocation12_spill]] %s7980_s7 }
   0x9   :  { %8037 = sst [smem:[#allocation13_spill]] %s7981_s8 }
   0xa   :  { %8038 = sst [smem:[#allocation14_spill]] %s7982_s9 }
   0xb   :  { %8039 = sst [smem:[#allocation15_spill]] %s7983_s10 }
   0xc   :  { %8040 = sst [smem:[#allocation16_spill]] %s7984_s11 }
   0xd   :  { %8041 = sst [smem:[#allocation17_spill]] %s7985_s12 }
   0xe   :  { %s8042_s9 = sld [smem:[#allocation8_spill]]  ;;  %vm186_vm0 = vcmask 1043456  }
  0x14   :  { %v120_v0 = vld [vmem:[%s8042_s9 + $0x50] sm:$0xf]  ;;  %v119_v1 = vld [vmem:[%s8042_s9 + $0x48] sm:$0xff]  ;;  %v118_v2 = vld [vmem:[%s8042_s9 + $0x40] sm:$0xff] }
  0x15   :  { %4920 = vmatpush.msk.msra.mxu0 %vm186_vm0, %v120_v0  ;;  %v117_v3 = vld [vmem:[%s8042_s9 + $0x38] sm:$0xff]  ;;  %v116_v4 = vld [vmem:[%s8042_s9 + $0x30] sm:$0xff]  ;;  %v115_v5 = vld [vmem:[%s8042_s9 + $0x28] sm:$0xff] }
  0x16   :  { %v114_v6 = vld [vmem:[%s8042_s9 + $0x20] sm:$0xff] }
  0x17   :  { %196 = vmatpush.msra.mxu0 %v119_v1 }
  0x19   :  { %197 = vmatpush.msra.mxu0 %v118_v2 }
  0x1b   :  { %198 = vmatpush.msra.mxu0 %v117_v3 }
  0x1d   :  { %199 = vmatpush.msra.mxu0 %v116_v4 }
  0x1f   :  { %200 = vmatpush.msra.mxu0 %v115_v5 }
  0x20   :  { %33 = vsyncpa [#allocation3], 0  ;;  %v113_v7 = vld [vmem:[%s8042_s9 + $0x18] sm:$0xff]  ;;  %v112_v8 = vld [vmem:[%s8042_s9 + $0x10] sm:$0xff]  ;;  %s8043_s7 = sld [smem:[#allocation5_spill]]  ;;  %vm125_vm1 = vcmask 687104  }
  0x21   :  { %201 = vmatpush.msra.mxu0 %v114_v6  ;;  %v111_v9 = vld [vmem:[%s8042_s9 + $0x8] sm:$0xff]  ;;  %v110_v10 = vld [vmem:[%s8042_s9] sm:$0xff]  ;;  %s8044_s29 = sld [smem:[#allocation9_spill]]  ;;  %s5735_s5 = smov 48  }
  0x22   :  { %s8045_s12 = sld [smem:[#allocation10_spill]]  ;;  %s8027_s6 = smov 40  }
  0x23   :  { %202 = vmatpush.msra.mxu0 %v113_v7  ;;  %s8046_s8 = sld [smem:[#allocation11_spill]]  ;;  %s8025_s10 = smov 104  }
  0x24   :  { %s8047_s30 = sld [smem:[#allocation12_spill]]  ;;  %s8011_s1 = smov 88  }
  0x25   :  { %203 = vmatpush.msra.mxu0 %v112_v8  ;;  %s8049_s11 = sld [smem:[#allocation14_spill]]  ;;  %s8023_s4 = smov 32  }
  0x26   :  { %v90_v11 = vld [vmem:[%s8043_s7] sm:$0xff]  ;;  %v91_v12 = vld [vmem:[%s8043_s7 + $0x8] sm:$0xff]  ;;  %v92_v13 = vld [vmem:[%s8043_s7 + $0x10] sm:$0xff]  ;;  %s8050_s0 = sld [smem:[#allocation15_spill]]  ;;  %s8021_s9 = smov 96  }
  0x27   :  { %204 = vmatpush.msra.mxu0 %v111_v9  ;;  %v93_v14 = vld [vmem:[%s8043_s7 + $0x18] sm:$0xff]  ;;  %v94_v15 = vld [vmem:[%s8043_s7 + $0x20] sm:$0xff]  ;;  %v95_v16 = vld [vmem:[%s8043_s7 + $0x28] sm:$0xff]  ;;  %s8051_s2 = sld [smem:[#allocation16_spill]] }
  0x28   :  { %v96_v17 = vld [vmem:[%s8043_s7 + $0x30] sm:$0xff]  ;;  %v97_v18 = vld [vmem:[%s8043_s7 + $0x38] sm:$0xff]  ;;  %v98_v19 = vld [vmem:[%s8043_s7 + $0x40] sm:$0xff]  ;;  %s8052_s3 = sld [smem:[#allocation17_spill]] }
  0x29   :  { %205 = vmatpush.msra.mxu0 %v110_v10  ;;  %v99_v20 = vld [vmem:[%s8043_s7 + $0x48] sm:$0xff]  ;;  %v100_v21 = vld [vmem:[%s8043_s7 + $0x50] sm:$0xff]  ;;  %v101_v22 = vld [vmem:[%s8043_s7 + $0x58] sm:$0xff] }
  0x2a   :  { %4921 = vmatmul.msk.f32.vlgmr.msra.gmra.mxu0 %vm125_vm1, %v90_v11  ;;  %v102_v23 = vld [vmem:[%s8043_s7 + $0x60] sm:$0xff]  ;;  %v103_v24 = vld [vmem:[%s8043_s7 + $0x68] sm:$0xff]  ;;  %v104_v25 = vld [vmem:[%s8043_s7 + $0x70] sm:$0xff] }
  0x2b   :  { %v105_v26 = vld [vmem:[%s8043_s7 + $0x78] sm:$0xff]  ;;  %v106_v28 = vld [vmem:[%s8043_s7 + $0x80] sm:$0xff]  ;;  %v107_v30 = vld [vmem:[%s8043_s7 + $0x88] sm:$0xff] }
  0x2c   :  { %v108_v32 = vld [vmem:[%s8043_s7 + $0x90] sm:$0xff]  ;;  %v109_v34 = vld [vmem:[%s8043_s7 + $0x98] sm:$0xff]  ;;  %v6016_v45 = vld [vmem:[%s8044_s29] ss:$0 sm:$0xff]  ;;  %s5732_s7 = smov 120   ;;  %s8019_s29 = smov 72  }
  0x2d   :  { %v6022_v47 = vld [vmem:[%s8045_s12] ss:$0 sm:$0xff]  ;;  %s8015_s12 = smov 24  }
  0x2e   :  { %v6032_v54 = vld [vmem:[%s8046_s8] ss:$0 sm:$0xff]  ;;  %s8048_s8 = sld [smem:[#allocation13_spill]] }
  0x32   :  { %4922 = vmatmul.msk.f32.gmra.mxu0 %vm125_vm1, %v91_v12 }
  0x3a   :  { %4923 = vmatmul.msk.f32.gmra.mxu0 %vm125_vm1, %v92_v13 }
  0x42   :  { %4924 = vmatmul.msk.f32.gmra.mxu0 %vm125_vm1, %v93_v14 }
  0x4a   :  { %4925 = vmatmul.msk.f32.gmra.mxu0 %vm125_vm1, %v94_v15 }
  0x52   :  { %4926 = vmatmul.msk.f32.gmra.mxu0 %vm125_vm1, %v95_v16 }
  0x5a   :  { %4927 = vmatmul.msk.f32.gmra.mxu0 %vm125_vm1, %v96_v17 }
  0x62   :  { %4928 = vmatmul.msk.f32.gmra.mxu0 %vm125_vm1, %v97_v18 }
  0x6a   :  { %4929 = vmatmul.msk.f32.gmra.mxu0 %vm125_vm1, %v98_v19 }
  0x72   :  { %4930 = vmatmul.msk.f32.gmra.mxu0 %vm125_vm1, %v99_v20 }
  0x7a   :  { %4931 = vmatmul.msk.f32.gmra.mxu0 %vm125_vm1, %v100_v21 }
  0x82   :  { %4932 = vmatmul.msk.f32.gmra.mxu0 %vm125_vm1, %v101_v22 }
  0x8a   :  { %4933 = vmatmul.msk.f32.gmra.mxu0 %vm125_vm1, %v102_v23 }
  0x92   :  { %4934 = vmatmul.msk.f32.gmra.mxu0 %vm125_vm1, %v103_v24 }
  0x9a   :  { %4935 = vmatmul.msk.f32.gmra.mxu0 %vm125_vm1, %v104_v25 }
  0xa2   :  { %4936 = vmatmul.msk.f32.gmra.mxu0 %vm125_vm1, %v105_v26 }
  0xa7   :  { %v5991_v27 = vpop.f32.mrf.mxu0 }
  0xaa   :  { %4937 = vmatmul.msk.f32.gmra.mxu0 %vm125_vm1, %v106_v28 }
  0xaf   :  { %v5997_v29 = vpop.f32.mrf.mxu0 }
  0xb2   :  { %4938 = vmatmul.msk.f32.gmra.mxu0 %vm125_vm1, %v107_v30 }
  0xb7   :  { %v6003_v31 = vpop.f32.mrf.mxu0 }
  0xba   :  { %4939 = vmatmul.msk.f32.gmra.mxu0 %vm125_vm1, %v108_v32 }
  0xbf   :  { %v216_v33 = vpop.f32.mrf.mxu0 }
  0xc0   :  { %v217_v28 = vadd.f32 %v6016_v45, %v216_v33 }
  0xc2   :  { %4940 = vmatmul.msk.f32.gmra.mxu0 %vm125_vm1, %v109_v34 }
  0xc7   :  { %v219_v35 = vpop.f32.mrf.mxu0 }
  0xc8   :  { %v220_v20 = vadd.f32 %v6016_v45, %v219_v35 }
  0xcf   :  { %v222_v36 = vpop.f32.mrf.mxu0 }
  0xd0   :  { %v223_v14 = vadd.f32 %v6016_v45, %v222_v36  ;;  %v208_v36 = vadd.f32 %v6016_v45, %v5991_v27 }
  0xd2   :  { %v276_v30 = vmul.f32 %v6022_v47, %v223_v14 }
  0xd7   :  { %v225_v37 = vpop.f32.mrf.mxu0 }
  0xd8   :  { %v226_v8 = vadd.f32 %v6016_v45, %v225_v37  ;;  %v214_v37 = vadd.f32 %v6016_v45, %v6003_v31  ;;  %v6099_v31 = vadd.f32 %v6032_v54, %v276_v30 }
  0xda   :  { %v277_v21 = vmul.f32 %v6022_v47, %v226_v8  ;;  %vm320_vm12 = vcmp.gt.f32.partialorder %v6099_v31, 0.0 }
  0xdf   :  { %v228_v38 = vpop.f32.mrf.mxu0 }
  0xe0   :  { %v229_v4 = vadd.f32 %v6016_v45, %v228_v38  ;;  %v275_v38 = vmul.f32 %v6022_v47, %v220_v20 }
  0xe2   :  { %v278_v16 = vmul.f32 %v6022_v47, %v229_v4 }
  0xe4   :  { %v6083_v35 = vadd.f32 %v6032_v54, %v278_v16 }
  0xe6   :  { %vm322_vm10 = vcmp.gt.f32.partialorder %v6083_v35, 0.0 }
  0xe7   :  { %v231_v39 = vpop.f32.mrf.mxu0 }
  0xe8   :  { %v232_v61 = vadd.f32 %v6016_v45, %v231_v39 }
  0xea   :  { %v279_v9 = vmul.f32 %v6022_v47, %v232_v61 }
  0xec   :  { %v6076_v23 = vadd.f32 %v6032_v54, %v279_v9 }
  0xee   :  { %v343_v39 = vmin.f32 %v6076_v23, 0.0  ;;  %vm323_vm9 = vcmp.gt.f32.partialorder %v6076_v23, 0.0 }
  0xef   :  { %v234_v40 = vpop.f32.mrf.mxu0 }
  0xf0   :  { %v235_v59 = vadd.f32 %v6016_v45, %v234_v40  ;;  %v6092_v40 = vadd.f32 %v6032_v54, %v277_v21 }
  0xf2   :  { %v280_v5 = vmul.f32 %v6022_v47, %v235_v59  ;;  %vm321_vm11 = vcmp.gt.f32.partialorder %v6092_v40, 0.0 }
  0xf4   :  { %v6069_v19 = vadd.f32 %v6032_v54, %v280_v5 }
  0xf6   :  { %v344_v34 = vmin.f32 %v6069_v19, 0.0  ;;  %vm324_vm8 = vcmp.gt.f32.partialorder %v6069_v19, 0.0 }
  0xf7   :  { %v237_v41 = vpop.f32.mrf.mxu0 }
  0xf8   :  { %v238_v55 = vadd.f32 %v6016_v45, %v237_v41  ;;  %v211_v41 = vadd.f32 %v6016_v45, %v5997_v29  ;;  %v373_v27 = vmul.f32 1.442695, %v344_v34  ;;  %v271_v29 = vmul.f32 %v6022_v47, %v208_v36 }
  0xfa   :  { %v281_v63 = vmul.f32 %v6022_v47, %v238_v55  ;;  %v272_v55 = vmul.f32 %v6022_v47, %v211_v41  ;;  %v6118_v8 = vadd.f32 %v6032_v54, %v271_v29 }
  0xfc   :  { %v6063_v13 = vadd.f32 %v6032_v54, %v281_v63  ;;  %v340_v63 = vmin.f32 %v6099_v31, 0.0  ;;  %vm315_vm1 = vcmp.gt.f32.partialorder %v6118_v8, 0.0 }
  0xfe   :  { %v345_v26 = vmin.f32 %v6063_v13, 0.0  ;;  %vm325_vm7 = vcmp.gt.f32.partialorder %v6063_v13, 0.0 }
  0xff   :  { %v240_v42 = vpop.f32.mrf.mxu0 }
 0x100   :  { %v241_v52 = vadd.f32 %v6016_v45, %v240_v42  ;;  %v375_v33 = vmul.f32 1.442695, %v345_v26  ;;  %v274_v42 = vmul.f32 %v6022_v47, %v217_v28 }
 0x102   :  { %v282_v60 = vmul.f32 %v6022_v47, %v241_v52  ;;  %v371_v52 = vmul.f32 1.442695, %v343_v39  ;;  %v335_v39 = vmin.f32 %v6118_v8, 0.0 }
 0x104   :  { %v6056_v7 = vadd.f32 %v6032_v54, %v282_v60  ;;  %v6109_v60 = vadd.f32 %v6032_v54, %v274_v42  ;;  %v355_v29 = vmul.f32 1.442695, %v335_v39  ;;  %v440_v39 = vld [vmem:[%s8047_s30 + $0x28] sm:$0xff] }
 0x106   :  { %v346_v18 = vmin.f32 %v6056_v7, 0.0  ;;  %v338_v16 = vmin.f32 %v6109_v60, 0.0  ;;  %vm326_vm6 = vcmp.gt.f32.partialorder %v6056_v7, 0.0  ;;  %vm318_vm14 = vcmp.gt.f32.partialorder %v6109_v60, 0.0 }
 0x107   :  { %v243_v43 = vpop.f32.mrf.mxu0 }
 0x108   :  { %v244_v49 = vadd.f32 %v6016_v45, %v243_v43  ;;  %v377_v32 = vmul.f32 1.442695, %v346_v18 }
 0x10a   :  { %v283_v56 = vmul.f32 %v6022_v47, %v244_v49 }
 0x10c   :  { %v6049_v2 = vadd.f32 %v6032_v54, %v283_v56 }
 0x10e   :  { %v347_v12 = vmin.f32 %v6049_v2, 0.0  ;;  %vm327_vm5 = vcmp.gt.f32.partialorder %v6049_v2, 0.0 }
 0x10f   :  { %v246_v44 = vpop.f32.mrf.mxu0 }
 0x110   :  { %v247_v46 = vadd.f32 %v6016_v45, %v246_v44  ;;  %v379_v25 = vmul.f32 1.442695, %v347_v12  ;;  %v342_v44 = vmin.f32 %v6083_v35, 0.0  ;;  %v6123_v12 = vadd.f32 %v6032_v54, %v272_v55 }
 0x112   :  { %v284_v51 = vmul.f32 %v6022_v47, %v247_v46  ;;  %vm316_vm0 = vcmp.gt.f32.partialorder %v6123_v12, 0.0 }
 0x114   :  { %v6040_v58 = vadd.f32 %v6032_v54, %v284_v51 }
 0x116   :  { %v348_v3 = vmin.f32 %v6040_v58, 0.0  ;;  %vm328_vm4 = vcmp.gt.f32.partialorder %v6040_v58, 0.0 }
 0x117   :  { %v249_v48 = vpop.f32.mrf.mxu0 }
 0x118   :  { %v250_v50 = vadd.f32 %v6016_v45, %v249_v48  ;;  %v381_v15 = vmul.f32 1.442695, %v348_v3  ;;  %v273_v48 = vmul.f32 %v6022_v47, %v214_v37 }
 0x11a   :  { %v285_v53 = vmul.f32 %v6022_v47, %v250_v50  ;;  %v6103_v50 = vadd.f32 %v6032_v54, %v275_v38  ;;  %v6114_v4 = vadd.f32 %v6032_v54, %v273_v48 }
 0x11c   :  { %v6037_v57 = vadd.f32 %v6032_v54, %v285_v53  ;;  %v341_v53 = vmin.f32 %v6092_v40, 0.0  ;;  %v339_v3 = vmin.f32 %v6103_v50, 0.0  ;;  %vm319_vm13 = vcmp.gt.f32.partialorder %v6103_v50, 0.0 }
 0x11d   :  { %vm317_vm15 = vcmp.gt.f32.partialorder %v6114_v4, 0.0 }
 0x11e   :  { %v349_v1 = vmin.f32 %v6037_v57, 0.0  ;;  %vm329_vm3 = vcmp.gt.f32.partialorder %v6037_v57, 0.0  ;;  %v363_v21 = vmul.f32 1.442695, %v339_v3 }
 0x11f   :  { %v252_v62 = vpop.f32.mrf.mxu0 }
 0x120   :  { %v253_v0 = vadd.f32 %v6016_v45, %v252_v62  ;;  %v383_v11 = vmul.f32 1.442695, %v349_v1  ;;  %v369_v62 = vmul.f32 1.442695, %v342_v44 }
 0x122   :  { %v286_v6 = vmul.f32 %v6022_v47, %v253_v0  ;;  %5496 = vpow2.f32 %v383_v11 }
 0x123   :  { %5498 = vpow2.f32 %v381_v15  ;;  %v365_v15 = vmul.f32 1.442695, %v340_v63 }
 0x124   :  { %v310_v10 = vadd.f32 %v6032_v54, %v286_v6  ;;  %v367_v6 = vmul.f32 1.442695, %v341_v53 }
 0x126   :  { %v350_v17 = vmin.f32 %v310_v10, 0.0  ;;  %vm330_vm2 = vcmp.gt.f32.partialorder %v310_v10, 0.0 }
 0x127   :  { %v6073_v22 = vpop.f32.mrf.mxu0 }
 0x128   :  { %v385_v24 = vmul.f32 1.442695, %v350_v17  ;;  %v5497_v43 = vpop.eup %5496 }
 0x129   :  { %v5499_v46 = vpop.eup %5498  ;;  %v4955_v59 = vadd.f32 -1.0, %v5497_v43 }
 0x12a   :  { %5500 = vpow2.f32 %v385_v24  ;;  %v4954_v1 = vadd.f32 -1.0, %v5499_v46  ;;  %v337_v24 = vmin.f32 %v6114_v4, 0.0 }
 0x12b   :  { %5502 = vpow2.f32 %v379_v25  ;;  %v429_v11 = vsel %vm329_vm3, %v6037_v57, %v4955_v59  ;;  %v256_v25 = vadd.f32 %v6016_v45, %v6073_v22  ;;  %v361_v22 = vmul.f32 1.442695, %v338_v16 }
 0x12c   :  { %5504 = vpow2.f32 %v377_v32  ;;  %v428_v18 = vsel %vm328_vm4, %v6040_v58, %v4954_v1  ;;  %v336_v58 = vmin.f32 %v6123_v12, 0.0 }
 0x12d   :  { %5506 = vpow2.f32 %v375_v33  ;;  %v359_v33 = vmul.f32 1.442695, %v337_v24 }
 0x12e   :  { %5508 = vpow2.f32 %v373_v27  ;;  %v357_v46 = vmul.f32 1.442695, %v336_v58 }
 0x12f   :  { %v258_v49 = vpop.f32.mrf.mxu0  ;;  %5510 = vpow2.f32 %v371_v52 }
 0x130   :  { %v5501_v51 = vpop.eup %5500  ;;  %v259_v9 = vadd.f32 %v6016_v45, %v258_v49  ;;  %5512 = vpow2.f32 %v369_v62 }
 0x131   :  { %v4956_v56 = vadd.f32 -1.0, %v5501_v51  ;;  %v5503_v61 = vpop.eup %5502  ;;  %5514 = vpow2.f32 %v367_v6 }
 0x132   :  { %v5505_v5 = vpop.eup %5504  ;;  %v288_v28 = vmul.f32 %v6022_v47, %v259_v9  ;;  %5516 = vpow2.f32 %v365_v15 }
 0x133   :  { %v430_v0 = vsel %vm330_vm2, %v310_v10, %v4956_v56  ;;  %v4953_v10 = vadd.f32 -1.0, %v5503_v61  ;;  %v5507_v14 = vpop.eup %5506  ;;  %v4952_v20 = vadd.f32 -1.0, %v5505_v5  ;;  %5518 = vpow2.f32 %v363_v21 }
 0x134   :  { %486 = vmatpush.msra.mxu1 %v430_v0  ;;  %v5509_v57 = vpop.eup %5508  ;;  %v4951_v32 = vadd.f32 -1.0, %v5507_v14  ;;  %v6147_v44 = vadd.f32 %v6032_v54, %v288_v28  ;;  %5520 = vpow2.f32 %v361_v22  ;;  %v437_v22 = vld [vmem:[%s8047_s30 + $0x10] sm:$0xff] }
 0x135   :  { %v427_v30 = vsel %vm327_vm5, %v6049_v2, %v4953_v10  ;;  %v5511_v34 = vpop.eup %5510  ;;  %v426_v37 = vsel %vm326_vm6, %v6056_v7, %v4952_v20  ;;  %v4950_v38 = vadd.f32 -1.0, %v5509_v57  ;;  %v287_v2 = vmul.f32 %v6022_v47, %v256_v25 }
 0x136   :  { %487 = vmatpush.msra.mxu1 %v429_v11  ;;  %v5513_v41 = vpop.eup %5512  ;;  %v425_v43 = vsel %vm325_vm7, %v6063_v13, %v4951_v32  ;;  %v4949_v27 = vadd.f32 -1.0, %v5511_v34  ;;  %5522 = vpow2.f32 %v359_v33  ;;  %v352_v61 = vmin.f32 %v6147_v44, 0.0  ;;  %v439_v33 = vld [vmem:[%s8047_s30 + $0x20] sm:$0xff] }
 0x137   :  { %v261_v17 = vpop.f32.mrf.mxu0  ;;  %v5515_v7 = vpop.eup %5514  ;;  %v424_v49 = vsel %vm324_vm8, %v6069_v19, %v4950_v38  ;;  %v4948_v51 = vadd.f32 -1.0, %v5513_v41  ;;  %v6155_v55 = vadd.f32 %v6032_v54, %v287_v2  ;;  %5524 = vpow2.f32 %v357_v46  ;;  %v438_v38 = vld [vmem:[%s8047_s30 + $0x18] sm:$0xff]  ;;  %v441_v41 = vld [vmem:[%s8047_s30 + $0x30] sm:$0xff]  ;;  %v448_v46 = vld [vmem:[%s8047_s30 + $0x68] sm:$0xff] }
 0x138   :  { %v262_v26 = vadd.f32 %v6016_v45, %v261_v17  ;;  %488 = vmatpush.msra.mxu1 %v428_v18  ;;  %v5517_v52 = vpop.eup %5516  ;;  %v423_v56 = vsel %vm323_vm9, %v6076_v23, %v4949_v27  ;;  %v4947_v59 = vadd.f32 -1.0, %v5515_v7  ;;  %5526 = vpow2.f32 %v355_v29  ;;  %v442_v2 = vld [vmem:[%s8047_s30 + $0x38] sm:$0xff]  ;;  %v445_v27 = vld [vmem:[%s8047_s30 + $0x50] sm:$0xff]  ;;  %v447_v7 = vld [vmem:[%s8047_s30 + $0x60] sm:$0xff] }
 0x139   :  { %v5519_v19 = vpop.eup %5518  ;;  %v4946_v63 = vadd.f32 -1.0, %v5517_v52  ;;  %v351_v3 = vmin.f32 %v6155_v55, 0.0  ;;  %v389_v9 = vmul.f32 1.442695, %v352_v61  ;;  %vm332_vm4 = vcmp.gt.f32.partialorder %v6147_v44, 0.0  ;;  %v452_v29 = vld [vmem:[%s8047_s30 + $0x88] sm:$0xff] }
 0x13a   :  { %v289_v36 = vmul.f32 %v6022_v47, %v262_v26  ;;  %489 = vmatpush.msra.mxu1 %v427_v30  ;;  %v5521_v0 = vpop.eup %5520  ;;  %v4945_v6 = vadd.f32 -1.0, %v5519_v19  ;;  %vm331_vm5 = vcmp.gt.f32.partialorder %v6155_v55, 0.0  ;;  %vm455_vm6 = vcmask 261120   ;;  %v453_v52 = vld [vmem:[%s8047_s30 + $0x90] sm:$0xff] }
 0x13b   :  { %v420_v11 = vsel %vm320_vm12, %v6099_v31, %v4946_v63  ;;  %v4944_v10 = vadd.f32 -1.0, %v5521_v0  ;;  %v387_v15 = vmul.f32 1.442695, %v351_v3  ;;  %vm590_vm7 = vcmask 654336  }
 0x13c   :  { %490 = vmatpush.msra.mxu1 %v426_v37  ;;  %v6143_v42 = vadd.f32 %v6032_v54, %v289_v36  ;;  %v5523_v5 = vpop.eup %5522  ;;  %v419_v17 = vsel %vm319_vm13, %v6103_v50, %v4945_v6  ;;  %vm773_vm8 = vcmask 523264  }
 0x13d   :  { %v5525_v14 = vpop.eup %5524  ;;  %v418_v18 = vsel %vm318_vm14, %v6109_v60, %v4944_v10  ;;  %v435_v60 = vld [vmem:[%s8047_s30] sm:$0xff] }
 0x13e   :  { %491 = vmatpush.msra.mxu1 %v425_v43  ;;  %v353_v13 = vmin.f32 %v6143_v42, 0.0  ;;  %v5527_v16 = vpop.eup %5526  ;;  %v4942_v31 = vadd.f32 -1.0, %v5525_v14  ;;  %vm333_vm3 = vcmp.gt.f32.partialorder %v6143_v42, 0.0  ;;  %v444_v43 = vld [vmem:[%s8047_s30 + $0x48] sm:$0xff] }
 0x13f   :  { %v264_v48 = vpop.f32.mrf.mxu0  ;;  %v4941_v21 = vadd.f32 -1.0, %v5527_v16 }
 0x140   :  { %v265_v53 = vadd.f32 %v6016_v45, %v264_v48  ;;  %492 = vmatpush.msra.mxu1 %v424_v49  ;;  %v422_v45 = vsel %vm322_vm10, %v6083_v35, %v4948_v51  ;;  %v391_v1 = vmul.f32 1.442695, %v353_v13  ;;  %v416_v57 = vsel %vm316_vm0, %v6123_v12, %v4942_v31  ;;  %v449_v48 = vld [vmem:[%s8047_s30 + $0x70] sm:$0xff]  ;;  %v450_v49 = vld [vmem:[%s8047_s30 + $0x78] sm:$0xff]  ;;  %v451_v51 = vld [vmem:[%s8047_s30 + $0x80] sm:$0xff] }
 0x141   :  { %v415_v26 = vsel %vm315_vm1, %v6118_v8, %v4941_v21  ;;  %v436_v8 = vld [vmem:[%s8047_s30 + $0x8] sm:$0xff] }
 0x142   :  { %v290_v62 = vmul.f32 %v6022_v47, %v265_v53  ;;  %493 = vmatpush.msra.mxu1 %v423_v56  ;;  %v421_v47 = vsel %vm321_vm11, %v6092_v40, %v4947_v59  ;;  %5528 = vpow2.f32 %v391_v1  ;;  %v4943_v40 = vadd.f32 -1.0, %v5523_v5  ;;  %v454_v53 = vld [vmem:[%s8047_s30 + $0x98] sm:$0xff] }
 0x143   :  { %5530 = vpow2.f32 %v389_v9 }
 0x144   :  { %494 = vmatpush.msra.mxu1 %v422_v45  ;;  %v314_v23 = vadd.f32 %v6032_v54, %v290_v62  ;;  %v417_v20 = vsel %vm317_vm15, %v6114_v4, %v4943_v40 }
 0x146   :  { %495 = vmatpush.msra.mxu1 %v421_v47  ;;  %v354_v35 = vmin.f32 %v314_v23, 0.0  ;;  %vm334_vm2 = vcmp.gt.f32.partialorder %v314_v23, 0.0 }
 0x148   :  { %496 = vmatpush.msra.mxu1 %v420_v11  ;;  %v393_v54 = vmul.f32 1.442695, %v354_v35  ;;  %v5529_v24 = vpop.eup %5528 }
 0x149   :  { %v5531_v50 = vpop.eup %5530  ;;  %v4959_v4 = vadd.f32 -1.0, %v5529_v24  ;;  %v4981_v24 = vld [vmem:[%s8048_s8 + $0x50] sm:$0xff] }
 0x14a   :  { %497 = vmatpush.msra.mxu1 %v419_v17  ;;  %5532 = vpow2.f32 %v393_v54  ;;  %v4958_v58 = vadd.f32 -1.0, %v5531_v50  ;;  %v580_v50 = vld [vmem:[%s8048_s8] sm:$0xff] }
 0x14b   :  { %5534 = vpow2.f32 %v387_v15  ;;  %v433_v12 = vsel %vm333_vm3, %v6143_v42, %v4959_v4  ;;  %v443_v42 = vld [vmem:[%s8047_s30 + $0x40] sm:$0xff]  ;;  %v583_v4 = vld [vmem:[%s8048_s8 + $0x18] sm:$0xff]  ;;  %vm1691_vm3 = vcmask 64512  }
 0x14c   :  { %498 = vmatpush.msra.mxu1 %v418_v18  ;;  %v432_v36 = vsel %vm332_vm4, %v6147_v44, %v4958_v58  ;;  %v446_v44 = vld [vmem:[%s8047_s30 + $0x58] sm:$0xff]  ;;  %s8053_s30 = sld [smem:[#allocation6_spill]]  ;;  %vm1727_vm4 = vcmask 130048  }
 0x14d   :  { %v4986_v58 = vld [vmem:[%s8048_s8 + $0x78] sm:$0xff] }
 0x14e   :  { %499 = vmatpush.msra.mxu1 %v417_v20 }
 0x150   :  { %v5533_v25 = vpop.eup %5532  ;;  %500 = vmatpush.msra.mxu1 %v416_v57  ;;  %v4982_v57 = vld [vmem:[%s8048_s8 + $0x58] sm:$0xff] }
 0x151   :  { %v4960_v28 = vadd.f32 -1.0, %v5533_v25  ;;  %v5535_v30 = vpop.eup %5534  ;;  %v581_v25 = vld [vmem:[%s8048_s8 + $0x8] sm:$0xff] }
 0x152   :  { %501 = vmatpush.msra.mxu1 %v415_v26  ;;  %v4957_v34 = vadd.f32 -1.0, %v5535_v30  ;;  %v582_v26 = vld [vmem:[%s8048_s8 + $0x10] sm:$0xff] }
 0x153   :  { %v434_v32 = vsel %vm334_vm2, %v314_v23, %v4960_v28  ;;  %502 = vmatmul.f32.vlgmr.msra.gmra.mxu1 %v435_v60  ;;  %v4983_v60 = vld [vmem:[%s8048_s8 + $0x60] sm:$0xff]  ;;  %v4984_v28 = vld [vmem:[%s8048_s8 + $0x68] sm:$0xff]  ;;  %v4985_v30 = vld [vmem:[%s8048_s8 + $0x70] sm:$0xff] }
 0x154   :  { %545 = vmatpush.msra.mxu2 %v434_v32  ;;  %v431_v37 = vsel %vm331_vm5, %v6155_v55, %v4957_v34  ;;  %v584_v32 = vld [vmem:[%s8048_s8 + $0x20] sm:$0xff] }
 0x155   :  { %v4987_v34 = vld [vmem:[%s8048_s8 + $0x80] sm:$0xff] }
 0x156   :  { %546 = vmatpush.msra.mxu2 %v433_v12  ;;  %v585_v12 = vld [vmem:[%s8048_s8 + $0x28] sm:$0xff] }
 0x158   :  { %547 = vmatpush.msra.mxu2 %v432_v36  ;;  %v586_v36 = vld [vmem:[%s8048_s8 + $0x30] sm:$0xff] }
 0x15a   :  { %548 = vmatpush.msra.mxu2 %v431_v37  ;;  %v5067_v37 = vld [vmem:[%s8048_s8 + $0xf0] sm:$0xff] }
 0x15b   :  { %4961 = vmatmul.msk.f32.vlgmr.msra.gmra.mxu2 %vm455_vm6, %v436_v8  ;;  %505 = vmatmul.f32.gmra.mxu1 %v437_v22  ;;  %v4988_v8 = vld [vmem:[%s8048_s8 + $0x88] sm:$0xff]  ;;  %v587_v22 = vld [vmem:[%s8048_s8 + $0x38] sm:$0xff] }
 0x163   :  { %4962 = vmatmul.msk.f32.gmra.mxu2 %vm455_vm6, %v438_v38  ;;  %508 = vmatmul.f32.gmra.mxu1 %v439_v33  ;;  %v4989_v38 = vld [vmem:[%s8048_s8 + $0x90] sm:$0xff]  ;;  %v588_v33 = vld [vmem:[%s8048_s8 + $0x40] sm:$0xff] }
 0x16b   :  { %4963 = vmatmul.msk.f32.gmra.mxu2 %vm455_vm6, %v440_v39  ;;  %511 = vmatmul.f32.gmra.mxu1 %v441_v41  ;;  %v5068_v39 = vld [vmem:[%s8048_s8 + $0xf8] sm:$0xff] }
 0x16c   :  { %v4990_v41 = vld [vmem:[%s8048_s8 + $0x98] sm:$0xff] }
 0x173   :  { %4964 = vmatmul.msk.f32.gmra.mxu2 %vm455_vm6, %v442_v2  ;;  %514 = vmatmul.f32.gmra.mxu1 %v443_v42  ;;  %v589_v2 = vld [vmem:[%s8048_s8 + $0x48] sm:$0xff]  ;;  %v5069_v42 = vld [vmem:[%s8048_s8 + $0x100] sm:$0xff] }
 0x17b   :  { %4965 = vmatmul.msk.f32.gmra.mxu2 %vm455_vm6, %v444_v43  ;;  %517 = vmatmul.f32.gmra.mxu1 %v445_v27  ;;  %v5029_v43 = vld [vmem:[%s8048_s8 + $0xa0] sm:$0xff]  ;;  %v5008_v27 = vld [vmem:[%s8049_s11 + $0x78] sm:$0xff] }
 0x183   :  { %4966 = vmatmul.msk.f32.gmra.mxu2 %vm455_vm6, %v446_v44  ;;  %520 = vmatmul.f32.gmra.mxu1 %v447_v7  ;;  %v5070_v44 = vld [vmem:[%s8048_s8 + $0x108] sm:$0xff]  ;;  %v5007_v7 = vld [vmem:[%s8049_s11 + $0x70] sm:$0xff] }
 0x18b   :  { %4967 = vmatmul.msk.f32.gmra.mxu2 %vm455_vm6, %v448_v46  ;;  %523 = vmatmul.f32.gmra.mxu1 %v449_v48  ;;  %v5030_v46 = vld [vmem:[%s8048_s8 + $0xa8] sm:$0xff] }
 0x18c   :  { %v5006_v48 = vld [vmem:[%s8049_s11 + $0x68] sm:$0xff] }
 0x193   :  { %4968 = vmatmul.msk.f32.gmra.mxu2 %vm455_vm6, %v450_v49  ;;  %526 = vmatmul.f32.gmra.mxu1 %v451_v51  ;;  %v5005_v49 = vld [vmem:[%s8049_s11 + $0x60] sm:$0xff]  ;;  %v675_v51 = vld [vmem:[%s8049_s11 + $0x38] sm:$0xff] }
 0x194   :  { %889 = vmatpush.msrb.mxu1 %v675_v51 }
 0x19b   :  { %4969 = vmatmul.msk.f32.gmra.mxu2 %vm455_vm6, %v452_v29  ;;  %529 = vmatmul.f32.gmra.mxu1 %v453_v52  ;;  %v674_v29 = vld [vmem:[%s8049_s11 + $0x30] sm:$0xff] }
 0x19c   :  { %v5071_v52 = vld [vmem:[%s8048_s8 + $0x110] sm:$0xff]  ;;  %890 = vmatpush.msrb.mxu1 %v674_v29 }
 0x1a3   :  { %4970 = vmatmul.msk.f32.gmra.mxu2 %vm455_vm6, %v454_v53  ;;  %v5004_v53 = vld [vmem:[%s8049_s11 + $0x58] sm:$0xff] }
 0x1d0   :  { %v503_v13 = vpop.f32.mrf.mxu1 }
 0x1d8   :  { %v506_v55 = vpop.f32.mrf.mxu1 }
 0x1de   :  { %v550_v56 = vpop.f32.mrf.mxu2 }
 0x1df   :  { %v551_v21 = vadd.f32 %v550_v56, %v503_v13  ;;  %v673_v13 = vld [vmem:[%s8049_s11 + $0x28] sm:$0xff]  ;;  %v5031_v56 = vld [vmem:[%s8048_s8 + $0xb0] sm:$0xff] }
 0x1e0   :  { %v509_v59 = vpop.f32.mrf.mxu1  ;;  %891 = vmatpush.msrb.mxu1 %v673_v13 }
 0x1e6   :  { %v553_v61 = vpop.f32.mrf.mxu2 }
 0x1e7   :  { %v554_v20 = vadd.f32 %v553_v61, %v506_v55  ;;  %v5003_v55 = vld [vmem:[%s8049_s11 + $0x50] sm:$0xff]  ;;  %v672_v61 = vld [vmem:[%s8049_s11 + $0x20] sm:$0xff] }
 0x1e8   :  { %v512_v19 = vpop.f32.mrf.mxu1  ;;  %892 = vmatpush.msrb.mxu1 %v672_v61 }
 0x1ee   :  { %v556_v62 = vpop.f32.mrf.mxu2 }
 0x1ef   :  { %v557_v31 = vadd.f32 %v556_v62, %v509_v59  ;;  %v5002_v59 = vld [vmem:[%s8049_s11 + $0x48] sm:$0xff]  ;;  %v671_v62 = vld [vmem:[%s8049_s11 + $0x18] sm:$0xff] }
 0x1f0   :  { %v515_v45 = vpop.f32.mrf.mxu1  ;;  %893 = vmatpush.msrb.mxu1 %v671_v62 }
 0x1f6   :  { %v559_v63 = vpop.f32.mrf.mxu2 }
 0x1f7   :  { %v560_v18 = vadd.f32 %v559_v63, %v512_v19  ;;  %v5001_v19 = vld [vmem:[%s8049_s11 + $0x40] sm:$0xff]  ;;  %v5072_v63 = vld [vmem:[%s8048_s8 + $0x118] sm:$0xff] }
 0x1f8   :  { %v518_v0 = vpop.f32.mrf.mxu1 }
 0x1fe   :  { %v562_v23 = vpop.f32.mrf.mxu2 }
 0x1ff   :  { %v563_v40 = vadd.f32 %v562_v23, %v515_v45  ;;  %v670_v45 = vld [vmem:[%s8049_s11 + $0x10] sm:$0xff]  ;;  %v5032_v23 = vld [vmem:[%s8048_s8 + $0xb8] sm:$0xff] }
 0x200   :  { %v521_v3 = vpop.f32.mrf.mxu1  ;;  %894 = vmatpush.msrb.mxu1 %v670_v45  ;;  %v5113_v45 = vld [vmem:[%s8048_s8 + $0x180] sm:$0xff] }
 0x206   :  { %v565_v1 = vpop.f32.mrf.mxu2 }
 0x207   :  { %v566_v17 = vadd.f32 %v565_v1, %v518_v0  ;;  %v669_v0 = vld [vmem:[%s8049_s11 + $0x8] sm:$0xff]  ;;  %v668_v1 = vld [vmem:[%s8049_s11] sm:$0xff] }
 0x208   :  { %v524_v47 = vpop.f32.mrf.mxu1  ;;  %895 = vmatpush.msrb.mxu1 %v669_v0 }
 0x20a   :  { %896 = vmatpush.msrb.mxu1 %v668_v1 }
 0x20e   :  { %v568_v5 = vpop.f32.mrf.mxu2 }
 0x20f   :  { %v569_v16 = vadd.f32 %v568_v5, %v521_v3  ;;  %v5073_v3 = vld [vmem:[%s8048_s8 + $0x120] sm:$0xff] }
 0x210   :  { %v527_v9 = vpop.f32.mrf.mxu1  ;;  %v5033_v5 = vld [vmem:[%s8048_s8 + $0xc0] sm:$0xff] }
 0x216   :  { %v571_v6 = vpop.f32.mrf.mxu2 }
 0x217   :  { %v572_v15 = vadd.f32 %v571_v6, %v524_v47  ;;  %v5074_v47 = vld [vmem:[%s8048_s8 + $0x128] sm:$0xff] }
 0x218   :  { %v530_v11 = vpop.f32.mrf.mxu1  ;;  %v5034_v6 = vld [vmem:[%s8048_s8 + $0xc8] sm:$0xff] }
 0x21e   :  { %v574_v35 = vpop.f32.mrf.mxu2 }
 0x21f   :  { %v575_v54 = vadd.f32 %v574_v35, %v527_v9  ;;  %v5075_v9 = vld [vmem:[%s8048_s8 + $0x130] sm:$0xff] }
 0x220   :  { %v5035_v35 = vld [vmem:[%s8048_s8 + $0xd0] sm:$0xff] }
 0x226   :  { %v577_v10 = vpop.f32.mrf.mxu2 }
 0x227   :  { %v578_v14 = vadd.f32 %v577_v10, %v530_v11 }
 0x229   :  { %627 = vmatpush.msra.mxu3 %v578_v14  ;;  %723 = vmatpush.msrb.mxu2 %v578_v14 }
 0x22a   :  { %1159 = vmatpush.msrb.mxu0 %v578_v14 }
 0x22b   :  { %628 = vmatpush.msra.mxu3 %v575_v54  ;;  %724 = vmatpush.msrb.mxu2 %v575_v54 }
 0x22c   :  { %1160 = vmatpush.msrb.mxu0 %v575_v54 }
 0x22d   :  { %629 = vmatpush.msra.mxu3 %v572_v15  ;;  %725 = vmatpush.msrb.mxu2 %v572_v15 }
 0x22e   :  { %1161 = vmatpush.msrb.mxu0 %v572_v15 }
 0x22f   :  { %630 = vmatpush.msra.mxu3 %v569_v16  ;;  %726 = vmatpush.msrb.mxu2 %v569_v16 }
 0x230   :  { %1162 = vmatpush.msrb.mxu0 %v569_v16 }
 0x231   :  { %631 = vmatpush.msra.mxu3 %v566_v17  ;;  %727 = vmatpush.msrb.mxu2 %v566_v17 }
 0x232   :  { %1163 = vmatpush.msrb.mxu0 %v566_v17 }
 0x233   :  { %632 = vmatpush.msra.mxu3 %v563_v40  ;;  %728 = vmatpush.msrb.mxu2 %v563_v40 }
 0x234   :  { %1164 = vmatpush.msrb.mxu0 %v563_v40 }
 0x235   :  { %633 = vmatpush.msra.mxu3 %v560_v18  ;;  %729 = vmatpush.msrb.mxu2 %v560_v18 }
 0x236   :  { %1165 = vmatpush.msrb.mxu0 %v560_v18 }
 0x237   :  { %634 = vmatpush.msra.mxu3 %v557_v31  ;;  %730 = vmatpush.msrb.mxu2 %v557_v31 }
 0x238   :  { %1166 = vmatpush.msrb.mxu0 %v557_v31 }
 0x239   :  { %635 = vmatpush.msra.mxu3 %v554_v20  ;;  %731 = vmatpush.msrb.mxu2 %v554_v20 }
 0x23a   :  { %1167 = vmatpush.msrb.mxu0 %v554_v20 }
 0x23b   :  { %636 = vmatpush.msra.mxu3 %v551_v21  ;;  %732 = vmatpush.msrb.mxu2 %v551_v21 }
 0x23c   :  { %1168 = vmatpush.msrb.mxu0 %v551_v21  ;;  %4991 = vmatmul.msk.f32.vlgmr.msrb.gmra.mxu2 %vm590_vm7, %v4981_v24  ;;  %v5105_v24 = vld [vmem:[%s8048_s8 + $0x140] sm:$0xff] }
 0x23d   :  { %975 = vmatpush.msra.mxu2 %v578_v14  ;;  %4971 = vmatmul.msk.f32.vlgmr.msra.gmra.mxu3 %vm590_vm7, %v580_v50  ;;  %v5056_v50 = vld [vmem:[%s8049_s11 + $0xb8] sm:$0xff] }
 0x23e   :  { %5077 = vmatmul.msk.f32.vlgmr.msrb.gmra.mxu0 %vm590_vm7, %v5067_v37  ;;  %812 = vmatpush.msrb.mxu3 %v5008_v27  ;;  %v5092_v37 = vld [vmem:[%s8049_s11 + $0xe8] sm:$0xff] }
 0x23f   :  { %976 = vmatpush.msra.mxu2 %v575_v54  ;;  %v5088_v27 = vld [vmem:[%s8049_s11 + $0xc8] sm:$0xff] }
 0x240   :  { %813 = vmatpush.msrb.mxu3 %v5007_v7 }
 0x241   :  { %977 = vmatpush.msra.mxu2 %v572_v15 }
 0x242   :  { %814 = vmatpush.msrb.mxu3 %v5006_v48  ;;  %v5109_v48 = vld [vmem:[%s8048_s8 + $0x160] sm:$0xff] }
 0x243   :  { %978 = vmatpush.msra.mxu2 %v569_v16 }
 0x244   :  { %4992 = vmatmul.msk.f32.gmra.mxu2 %vm590_vm7, %v4982_v57  ;;  %815 = vmatpush.msrb.mxu3 %v5005_v49 }
 0x245   :  { %979 = vmatpush.msra.mxu2 %v566_v17  ;;  %4972 = vmatmul.msk.f32.gmra.mxu3 %vm590_vm7, %v581_v25 }
 0x246   :  { %5078 = vmatmul.msk.f32.gmra.mxu0 %vm590_vm7, %v5068_v39  ;;  %816 = vmatpush.msrb.mxu3 %v5004_v53 }
 0x247   :  { %980 = vmatpush.msra.mxu2 %v563_v40 }
 0x248   :  { %817 = vmatpush.msrb.mxu3 %v5003_v55 }
 0x249   :  { %981 = vmatpush.msra.mxu2 %v560_v18 }
 0x24a   :  { %818 = vmatpush.msrb.mxu3 %v5002_v59 }
 0x24b   :  { %982 = vmatpush.msra.mxu2 %v557_v31 }
 0x24c   :  { %4993 = vmatmul.msk.f32.gmra.mxu2 %vm590_vm7, %v4983_v60  ;;  %819 = vmatpush.msrb.mxu3 %v5001_v19  ;;  %v5055_v60 = vld [vmem:[%s8049_s11 + $0xb0] sm:$0xff]  ;;  %v5112_v19 = vld [vmem:[%s8048_s8 + $0x178] sm:$0xff] }
 0x24d   :  { %983 = vmatpush.msra.mxu2 %v554_v20  ;;  %4973 = vmatmul.msk.f32.gmra.mxu3 %vm590_vm7, %v582_v26  ;;  %v5106_v26 = vld [vmem:[%s8048_s8 + $0x148] sm:$0xff] }
 0x24e   :  { %5079 = vmatmul.msk.f32.gmra.mxu0 %vm590_vm7, %v5069_v42  ;;  %1063 = vmatpush.msra.mxu3 %v5056_v50  ;;  %v5089_v42 = vld [vmem:[%s8049_s11 + $0xd0] sm:$0xff] }
 0x24f   :  { %984 = vmatpush.msra.mxu2 %v551_v21 }
 0x250   :  { %1064 = vmatpush.msra.mxu3 %v5055_v60 }
 0x251   :  { %1343 = vmatpush.msrb.mxu2 %v578_v14  ;;  %v5076_v14 = vld [vmem:[%s8048_s8 + $0x138] sm:$0xff] }
 0x253   :  { %1344 = vmatpush.msrb.mxu2 %v575_v54  ;;  %v5036_v54 = vld [vmem:[%s8048_s8 + $0xd8] sm:$0xff] }
 0x254   :  { %4994 = vmatmul.msk.f32.gmra.mxu2 %vm590_vm7, %v4984_v28  ;;  %v5054_v28 = vld [vmem:[%s8049_s11 + $0xa8] sm:$0xff] }
 0x255   :  { %1345 = vmatpush.msrb.mxu2 %v572_v15  ;;  %4974 = vmatmul.msk.f32.gmra.mxu3 %vm590_vm7, %v583_v4  ;;  %v5053_v4 = vld [vmem:[%s8049_s11 + $0xa0] sm:$0xff] }
 0x256   :  { %5080 = vmatmul.msk.f32.gmra.mxu0 %vm590_vm7, %v5070_v44  ;;  %1065 = vmatpush.msra.mxu3 %v5054_v28  ;;  %v5087_v44 = vld [vmem:[%s8049_s11 + $0xc0] sm:$0xff] }
 0x257   :  { %1346 = vmatpush.msrb.mxu2 %v569_v16 }
 0x258   :  { %1066 = vmatpush.msra.mxu3 %v5053_v4 }
 0x259   :  { %1347 = vmatpush.msrb.mxu2 %v566_v17  ;;  %v5037_v17 = vld [vmem:[%s8048_s8 + $0xe0] sm:$0xff] }
 0x25b   :  { %1348 = vmatpush.msrb.mxu2 %v563_v40 }
 0x25c   :  { %4995 = vmatmul.msk.f32.gmra.mxu2 %vm590_vm7, %v4985_v30 }
 0x25d   :  { %1349 = vmatpush.msrb.mxu2 %v560_v18  ;;  %4975 = vmatmul.msk.f32.gmra.mxu3 %vm590_vm7, %v584_v32 }
 0x25e   :  { %5081 = vmatmul.msk.f32.gmra.mxu0 %vm590_vm7, %v5071_v52  ;;  %v5110_v52 = vld [vmem:[%s8048_s8 + $0x168] sm:$0xff] }
 0x25f   :  { %1350 = vmatpush.msrb.mxu2 %v557_v31  ;;  %v5038_v31 = vld [vmem:[%s8048_s8 + $0xe8] sm:$0xff] }
 0x261   :  { %1351 = vmatpush.msrb.mxu2 %v554_v20 }
 0x263   :  { %1352 = vmatpush.msrb.mxu2 %v551_v21 }
 0x264   :  { %4996 = vmatmul.msk.f32.gmra.mxu2 %vm590_vm7, %v4986_v58  ;;  %v5052_v58 = vld [vmem:[%s8049_s11 + $0x98] sm:$0xff] }
 0x265   :  { %4976 = vmatmul.msk.f32.gmra.mxu3 %vm590_vm7, %v585_v12  ;;  %v5094_v12 = vld [vmem:[%s8049_s11 + $0xf8] sm:$0xff] }
 0x266   :  { %5082 = vmatmul.msk.f32.gmra.mxu0 %vm590_vm7, %v5072_v63  ;;  %1067 = vmatpush.msra.mxu3 %v5052_v58 }
 0x267   :  { %1247 = vmatpush.msra.mxu1 %v5094_v12 }
 0x26c   :  { %4997 = vmatmul.msk.f32.gmra.mxu2 %vm590_vm7, %v4987_v34  ;;  %v5051_v34 = vld [vmem:[%s8049_s11 + $0x90] sm:$0xff] }
 0x26d   :  { %4977 = vmatmul.msk.f32.gmra.mxu3 %vm590_vm7, %v586_v36  ;;  %v5107_v36 = vld [vmem:[%s8048_s8 + $0x150] sm:$0xff] }
 0x26e   :  { %5083 = vmatmul.msk.f32.gmra.mxu0 %vm590_vm7, %v5073_v3  ;;  %1068 = vmatpush.msra.mxu3 %v5051_v34 }
 0x274   :  { %4998 = vmatmul.msk.f32.gmra.mxu2 %vm590_vm7, %v4988_v8  ;;  %v5093_v8 = vld [vmem:[%s8049_s11 + $0xf0] sm:$0xff] }
 0x275   :  { %4978 = vmatmul.msk.f32.gmra.mxu3 %vm590_vm7, %v587_v22  ;;  %1248 = vmatpush.msra.mxu1 %v5093_v8  ;;  %v5050_v22 = vld [vmem:[%s8049_s11 + $0x88] sm:$0xff] }
 0x276   :  { %5084 = vmatmul.msk.f32.gmra.mxu0 %vm590_vm7, %v5074_v47  ;;  %1069 = vmatpush.msra.mxu3 %v5050_v22 }
 0x277   :  { %1249 = vmatpush.msra.mxu1 %v5092_v37 }
 0x27c   :  { %4999 = vmatmul.msk.f32.gmra.mxu2 %vm590_vm7, %v4989_v38  ;;  %v5049_v38 = vld [vmem:[%s8049_s11 + $0x80] sm:$0xff] }
 0x27d   :  { %4979 = vmatmul.msk.f32.gmra.mxu3 %vm590_vm7, %v588_v33  ;;  %v5091_v33 = vld [vmem:[%s8049_s11 + $0xe0] sm:$0xff] }
 0x27e   :  { %5085 = vmatmul.msk.f32.gmra.mxu0 %vm590_vm7, %v5075_v9  ;;  %1070 = vmatpush.msra.mxu3 %v5049_v38  ;;  %v5131_v9 = vld [vmem:[%s8049_s11 + $0x130] sm:$0xff] }
 0x27f   :  { %1250 = vmatpush.msra.mxu1 %v5091_v33 }
 0x284   :  { %5000 = vmatmul.msk.f32.gmra.mxu2 %vm590_vm7, %v4990_v41 }
 0x285   :  { %4980 = vmatmul.msk.f32.gmra.mxu3 %vm590_vm7, %v589_v2  ;;  %v5090_v2 = vld [vmem:[%s8049_s11 + $0xd8] sm:$0xff] }
 0x286   :  { %5086 = vmatmul.msk.f32.gmra.mxu0 %vm590_vm7, %v5076_v14  ;;  %1251 = vmatpush.msra.mxu1 %v5090_v2 }
 0x288   :  { %1252 = vmatpush.msra.mxu1 %v5089_v42 }
 0x28a   :  { %1253 = vmatpush.msra.mxu1 %v5088_v27 }
 0x28c   :  { %5039 = vmatmul.msk.f32.vlgmr.msra.gmra.mxu2 %vm590_vm7, %v5029_v43  ;;  %v5108_v43 = vld [vmem:[%s8048_s8 + $0x158] sm:$0xff]  ;;  %1254 = vmatpush.msra.mxu1 %v5087_v44 }
 0x294   :  { %5040 = vmatmul.msk.f32.gmra.mxu2 %vm590_vm7, %v5030_v46 }
 0x29c   :  { %5041 = vmatmul.msk.f32.gmra.mxu2 %vm590_vm7, %v5031_v56  ;;  %v5111_v56 = vld [vmem:[%s8048_s8 + $0x170] sm:$0xff] }
 0x2a4   :  { %5042 = vmatmul.msk.f32.gmra.mxu2 %vm590_vm7, %v5032_v23  ;;  %v5114_v23 = vld [vmem:[%s8048_s8 + $0x188] sm:$0xff]  ;;  %s8017_s8 = smov 80  }
 0x2ac   :  { %5043 = vmatmul.msk.f32.gmra.mxu2 %vm590_vm7, %v5033_v5  ;;  %v5132_v5 = vld [vmem:[%s8049_s11 + $0x138] sm:$0xff] }
 0x2b4   :  { %5044 = vmatmul.msk.f32.gmra.mxu2 %vm590_vm7, %v5034_v6 }
 0x2bb   :  { %v1170_v49 = vpop.f32.mrf.mxu0 }
 0x2bc   :  { %5045 = vmatmul.msk.f32.gmra.mxu2 %vm590_vm7, %v5035_v35  ;;  %v5130_v35 = vld [vmem:[%s8049_s11 + $0x128] sm:$0xff] }
 0x2bf   :  { %v734_v11 = vpop.f32.mrf.mxu2 }
 0x2c0   :  { %5009 = vmatmul.msk.f32.vlgmr.msrb.gmra.mxu3 %vm773_vm8, %v734_v11  ;;  %v638_v10 = vpop.f32.mrf.mxu3  ;;  %v5129_v11 = vld [vmem:[%s8049_s11 + $0x120] sm:$0xff] }
 0x2c1   :  { %5019 = vmatmul.msk.f32.vlgmr.msrb.gmra.mxu1 %vm773_vm8, %v638_v10  ;;  %1431 = vmatpush.msrb.mxu3 %v5132_v5 }
 0x2c3   :  { %v1173_v53 = vpop.f32.mrf.mxu0  ;;  %1432 = vmatpush.msrb.mxu3 %v5131_v9 }
 0x2c4   :  { %5046 = vmatmul.msk.f32.gmra.mxu2 %vm590_vm7, %v5036_v54  ;;  %v5128_v54 = vld [vmem:[%s8049_s11 + $0x118] sm:$0xff] }
 0x2c5   :  { %1433 = vmatpush.msrb.mxu3 %v5130_v35 }
 0x2c7   :  { %v737_v15 = vpop.f32.mrf.mxu2  ;;  %1434 = vmatpush.msrb.mxu3 %v5129_v11 }
 0x2c8   :  { %5010 = vmatmul.msk.f32.gmra.mxu3 %vm773_vm8, %v737_v15  ;;  %v641_v16 = vpop.f32.mrf.mxu3  ;;  %v5127_v15 = vld [vmem:[%s8049_s11 + $0x110] sm:$0xff] }
 0x2c9   :  { %5020 = vmatmul.msk.f32.gmra.mxu1 %vm773_vm8, %v641_v16  ;;  %1435 = vmatpush.msrb.mxu3 %v5128_v54  ;;  %v5126_v16 = vld [vmem:[%s8049_s11 + $0x108] sm:$0xff] }
 0x2cb   :  { %v1176_v61 = vpop.f32.mrf.mxu0  ;;  %1436 = vmatpush.msrb.mxu3 %v5127_v15 }
 0x2cc   :  { %5047 = vmatmul.msk.f32.gmra.mxu2 %vm590_vm7, %v5037_v17  ;;  %v5125_v17 = vld [vmem:[%s8049_s11 + $0x100] sm:$0xff]  ;;  %s8009_s11 = smov 16  }
 0x2cd   :  { %1437 = vmatpush.msrb.mxu3 %v5126_v16 }
 0x2cf   :  { %v740_v40 = vpop.f32.mrf.mxu2  ;;  %1438 = vmatpush.msrb.mxu3 %v5125_v17 }
 0x2d0   :  { %5011 = vmatmul.msk.f32.gmra.mxu3 %vm773_vm8, %v740_v40  ;;  %v644_v18 = vpop.f32.mrf.mxu3 }
 0x2d1   :  { %5021 = vmatmul.msk.f32.gmra.mxu1 %vm773_vm8, %v644_v18 }
 0x2d3   :  { %v1179_v63 = vpop.f32.mrf.mxu0 }
 0x2d4   :  { %5048 = vmatmul.msk.f32.gmra.mxu2 %vm590_vm7, %v5038_v31 }
 0x2d7   :  { %v743_v20 = vpop.f32.mrf.mxu2 }
 0x2d8   :  { %v647_v21 = vpop.f32.mrf.mxu3  ;;  %5012 = vmatmul.msk.f32.gmra.mxu3 %vm773_vm8, %v743_v20 }
 0x2d9   :  { %5022 = vmatmul.msk.f32.gmra.mxu1 %vm773_vm8, %v647_v21 }
 0x2db   :  { %v1182_v1 = vpop.f32.mrf.mxu0 }
 0x2dc   :  { %5115 = vmatmul.msk.f32.vlgmr.msrb.gmra.mxu2 %vm590_vm7, %v5105_v24 }
 0x2df   :  { %v746_v57 = vpop.f32.mrf.mxu2 }
 0x2e0   :  { %v650_v25 = vpop.f32.mrf.mxu3  ;;  %5013 = vmatmul.msk.f32.gmra.mxu3 %vm773_vm8, %v746_v57 }
 0x2e1   :  { %5023 = vmatmul.msk.f32.gmra.mxu1 %vm773_vm8, %v650_v25 }
 0x2e3   :  { %v1185_v47 = vpop.f32.mrf.mxu0 }
 0x2e4   :  { %5116 = vmatmul.msk.f32.gmra.mxu2 %vm590_vm7, %v5106_v26 }
 0x2e7   :  { %v749_v30 = vpop.f32.mrf.mxu2 }
 0x2e8   :  { %v653_v32 = vpop.f32.mrf.mxu3  ;;  %5014 = vmatmul.msk.f32.gmra.mxu3 %vm773_vm8, %v749_v30 }
 0x2e9   :  { %5024 = vmatmul.msk.f32.gmra.mxu1 %vm773_vm8, %v653_v32 }
 0x2eb   :  { %v1188_v14 = vpop.f32.mrf.mxu0 }
 0x2ec   :  { %5117 = vmatmul.msk.f32.gmra.mxu2 %vm590_vm7, %v5107_v36 }
 0x2ef   :  { %v752_v39 = vpop.f32.mrf.mxu2 }
 0x2f0   :  { %v656_v41 = vpop.f32.mrf.mxu3  ;;  %5015 = vmatmul.msk.f32.gmra.mxu3 %vm773_vm8, %v752_v39 }
 0x2f1   :  { %5025 = vmatmul.msk.f32.gmra.mxu1 %vm773_vm8, %v656_v41 }
 0x2f3   :  { %v1191_v18 = vpop.f32.mrf.mxu0 }
 0x2f4   :  { %5118 = vmatmul.msk.f32.gmra.mxu2 %vm590_vm7, %v5108_v43 }
 0x2f7   :  { %v755_v7 = vpop.f32.mrf.mxu2 }
 0x2f8   :  { %v659_v46 = vpop.f32.mrf.mxu3  ;;  %5016 = vmatmul.msk.f32.gmra.mxu3 %vm773_vm8, %v755_v7 }
 0x2f9   :  { %5026 = vmatmul.msk.f32.gmra.mxu1 %vm773_vm8, %v659_v46 }
 0x2fb   :  { %v1194_v24 = vpop.f32.mrf.mxu0 }
 0x2fc   :  { %5119 = vmatmul.msk.f32.gmra.mxu2 %vm590_vm7, %v5109_v48 }
 0x2ff   :  { %v758_v51 = vpop.f32.mrf.mxu2 }
 0x300   :  { %v662_v29 = vpop.f32.mrf.mxu3  ;;  %5017 = vmatmul.msk.f32.gmra.mxu3 %vm773_vm8, %v758_v51 }
 0x301   :  { %5027 = vmatmul.msk.f32.gmra.mxu1 %vm773_vm8, %v662_v29 }
 0x303   :  { %v1197_v25 = vpop.f32.mrf.mxu0 }
 0x304   :  { %5120 = vmatmul.msk.f32.gmra.mxu2 %vm590_vm7, %v5110_v52 }
 0x307   :  { %v761_v13 = vpop.f32.mrf.mxu2 }
 0x308   :  { %v665_v55 = vpop.f32.mrf.mxu3  ;;  %5018 = vmatmul.msk.f32.gmra.mxu3 %vm773_vm8, %v761_v13 }
 0x309   :  { %5028 = vmatmul.msk.f32.gmra.mxu1 %vm773_vm8, %v665_v55 }
 0x30c   :  { %5121 = vmatmul.msk.f32.gmra.mxu2 %vm590_vm7, %v5111_v56 }
 0x30f   :  { %v986_v59 = vpop.f32.mrf.mxu2 }
 0x310   :  { %5057 = vmatmul.msk.f32.vlgmr.msra.gmra.mxu3 %vm773_vm8, %v986_v59 }
 0x311   :  { %5095 = vmatmul.msk.f32.vlgmr.msra.gmra.mxu1 %vm773_vm8, %v1170_v49 }
 0x314   :  { %5122 = vmatmul.msk.f32.gmra.mxu2 %vm590_vm7, %v5112_v19 }
 0x317   :  { %v989_v62 = vpop.f32.mrf.mxu2 }
 0x318   :  { %5058 = vmatmul.msk.f32.gmra.mxu3 %vm773_vm8, %v989_v62 }
 0x319   :  { %5096 = vmatmul.msk.f32.gmra.mxu1 %vm773_vm8, %v1173_v53 }
 0x31c   :  { %5123 = vmatmul.msk.f32.gmra.mxu2 %vm590_vm7, %v5113_v45 }
 0x31f   :  { %v992_v0 = vpop.f32.mrf.mxu2 }
 0x320   :  { %5059 = vmatmul.msk.f32.gmra.mxu3 %vm773_vm8, %v992_v0 }
 0x321   :  { %5097 = vmatmul.msk.f32.gmra.mxu1 %vm773_vm8, %v1176_v61 }
 0x324   :  { %5124 = vmatmul.msk.f32.gmra.mxu2 %vm590_vm7, %v5114_v23 }
 0x327   :  { %v995_v3 = vpop.f32.mrf.mxu2 }
 0x328   :  { %5060 = vmatmul.msk.f32.gmra.mxu3 %vm773_vm8, %v995_v3 }
 0x329   :  { %5098 = vmatmul.msk.f32.gmra.mxu1 %vm773_vm8, %v1179_v63 }
 0x32f   :  { %v998_v6 = vpop.f32.mrf.mxu2 }
 0x330   :  { %5061 = vmatmul.msk.f32.gmra.mxu3 %vm773_vm8, %v998_v6 }
 0x331   :  { %5099 = vmatmul.msk.f32.gmra.mxu1 %vm773_vm8, %v1182_v1 }
 0x337   :  { %v1001_v10 = vpop.f32.mrf.mxu2 }
 0x338   :  { %5062 = vmatmul.msk.f32.gmra.mxu3 %vm773_vm8, %v1001_v10 }
 0x339   :  { %5100 = vmatmul.msk.f32.gmra.mxu1 %vm773_vm8, %v1185_v47 }
 0x33e   :  { %v6626_v32 = vpop.f32.mrf.mxu1 }
 0x33f   :  { %v1004_v40 = vpop.f32.mrf.mxu2 }
 0x340   :  { %5063 = vmatmul.msk.f32.gmra.mxu3 %vm773_vm8, %v1004_v40 }
 0x341   :  { %5101 = vmatmul.msk.f32.gmra.mxu1 %vm773_vm8, %v1188_v14 }
 0x343   :  { %v6608_v31 = vpop.f32.mrf.mxu3 }
 0x346   :  { %v6629_v36 = vpop.f32.mrf.mxu1 }
 0x347   :  { %v1007_v20 = vpop.f32.mrf.mxu2 }
 0x348   :  { %5064 = vmatmul.msk.f32.gmra.mxu3 %vm773_vm8, %v1007_v20 }
 0x349   :  { %5102 = vmatmul.msk.f32.gmra.mxu1 %vm773_vm8, %v1191_v18 }
 0x34b   :  { %v6612_v21 = vpop.f32.mrf.mxu3 }
 0x34e   :  { %v6632_v37 = vpop.f32.mrf.mxu1 }
 0x34f   :  { %v1010_v50 = vpop.f32.mrf.mxu2 }
 0x350   :  { %5065 = vmatmul.msk.f32.gmra.mxu3 %vm773_vm8, %v1010_v50 }
 0x351   :  { %5103 = vmatmul.msk.f32.gmra.mxu1 %vm773_vm8, %v1194_v24 }
 0x353   :  { %v6616_v57 = vpop.f32.mrf.mxu3 }
 0x356   :  { %v907_v41 = vpop.f32.mrf.mxu1 }
 0x357   :  { %v1013_v60 = vpop.f32.mrf.mxu2 }
 0x358   :  { %5066 = vmatmul.msk.f32.gmra.mxu3 %vm773_vm8, %v1013_v60 }
 0x359   :  { %5104 = vmatmul.msk.f32.gmra.mxu1 %vm773_vm8, %v1197_v25 }
 0x35b   :  { %v6620_v26 = vpop.f32.mrf.mxu3 }
 0x35e   :  { %v910_v43 = vpop.f32.mrf.mxu1 }
 0x35f   :  { %v1354_v28 = vpop.f32.mrf.mxu2 }
 0x360   :  { %5133 = vmatmul.msk.f32.vlgmr.msrb.gmra.mxu3 %vm773_vm8, %v1354_v28 }
 0x363   :  { %v6623_v4 = vpop.f32.mrf.mxu3 }
 0x366   :  { %v913_v46 = vpop.f32.mrf.mxu1 }
 0x367   :  { %v1357_v30 = vpop.f32.mrf.mxu2 }
 0x368   :  { %5134 = vmatmul.msk.f32.gmra.mxu3 %vm773_vm8, %v1357_v30  ;;  %v911_v30 = vadd.f32 %v910_v43, %v6623_v4  ;;  %v902_v43 = vadd.f32 %v6629_v36, %v6612_v21 }
 0x36b   :  { %v836_v58 = vpop.f32.mrf.mxu3 }
 0x36c   :  { %v914_v50 = vadd.f32 %v913_v46, %v836_v58  ;;  %v5481_v58 = vld [vmem:[%s8050_s0] ss:$0 sm:$0xff]  ;;  %s8013_s0 = smov 8  }
 0x36e   :  { %v916_v51 = vpop.f32.mrf.mxu1 }
 0x36f   :  { %v1360_v12 = vpop.f32.mrf.mxu2 }
 0x370   :  { %5135 = vmatmul.msk.f32.gmra.mxu3 %vm773_vm8, %v1360_v12 }
 0x373   :  { %v839_v34 = vpop.f32.mrf.mxu3 }
 0x374   :  { %v917_v18 = vadd.f32 %v916_v51, %v839_v34 }
 0x376   :  { %v919_v53 = vpop.f32.mrf.mxu1 }
 0x377   :  { %v1363_v8 = vpop.f32.mrf.mxu2 }
 0x378   :  { %5136 = vmatmul.msk.f32.gmra.mxu3 %vm773_vm8, %v1363_v8 }
 0x37b   :  { %v842_v22 = vpop.f32.mrf.mxu3 }
 0x37c   :  { %v920_v16 = vadd.f32 %v919_v53, %v842_v22  ;;  %v905_v22 = vadd.f32 %v6632_v37, %v6616_v57  ;;  %v5482_v57 = vld [vmem:[%s8051_s2] ss:$0 sm:$0xff]  ;;  %s5734_s2 = smov 56  }
 0x37e   :  { %v922_v55 = vpop.f32.mrf.mxu1 }
 0x37f   :  { %v1366_v38 = vpop.f32.mrf.mxu2 }
 0x380   :  { %5137 = vmatmul.msk.f32.gmra.mxu3 %vm773_vm8, %v1366_v38  ;;  %v908_v38 = vadd.f32 %v907_v41, %v6620_v26 }
 0x383   :  { %v845_v33 = vpop.f32.mrf.mxu3 }
 0x384   :  { %v923_v20 = vadd.f32 %v922_v55, %v845_v33 }
 0x386   :  { %v925_v61 = vpop.f32.mrf.mxu1 }
 0x387   :  { %v1369_v39 = vpop.f32.mrf.mxu2 }
 0x388   :  { %5138 = vmatmul.msk.f32.gmra.mxu3 %vm773_vm8, %v1369_v39 }
 0x38b   :  { %v848_v2 = vpop.f32.mrf.mxu3 }
 0x38e   :  { %v6644_v62 = vpop.f32.mrf.mxu1 }
 0x38f   :  { %v1372_v42 = vpop.f32.mrf.mxu2 }
 0x390   :  { %5139 = vmatmul.msk.f32.gmra.mxu3 %vm773_vm8, %v1372_v42 }
 0x393   :  { %v6637_v27 = vpop.f32.mrf.mxu3 }
 0x396   :  { %v1259_v63 = vpop.f32.mrf.mxu1 }
 0x397   :  { %v1375_v44 = vpop.f32.mrf.mxu2 }
 0x398   :  { %5140 = vmatmul.msk.f32.gmra.mxu3 %vm773_vm8, %v1375_v44 }
 0x39b   :  { %v6640_v7 = vpop.f32.mrf.mxu3 }
 0x39e   :  { %v1262_v23 = vpop.f32.mrf.mxu1 }
 0x39f   :  { %v1378_v48 = vpop.f32.mrf.mxu2 }
 0x3a0   :  { %5141 = vmatmul.msk.f32.gmra.mxu3 %vm773_vm8, %v1378_v48  ;;  %v926_v48 = vadd.f32 %v925_v61, %v848_v2 }
 0x3a3   :  { %v1078_v49 = vpop.f32.mrf.mxu3 }
 0x3a4   :  { %v1104_v26 = vadd.f32 %v1078_v49, %v905_v22 }
 0x3a6   :  { %v1265_v3 = vpop.f32.mrf.mxu1  ;;  %v1288_v49 = vadd.f32 %v1262_v23, %v1104_v26 }
 0x3a7   :  { %v1381_v29 = vpop.f32.mrf.mxu2 }
 0x3a8   :  { %5142 = vmatmul.msk.f32.gmra.mxu3 %vm773_vm8, %v1381_v29 }
 0x3ab   :  { %v1081_v52 = vpop.f32.mrf.mxu3 }
 0x3ac   :  { %v1105_v33 = vadd.f32 %v1081_v52, %v908_v38  ;;  %v1103_v52 = vadd.f32 %v6640_v7, %v902_v43 }
 0x3ae   :  { %v1268_v6 = vpop.f32.mrf.mxu1 }
 0x3b3   :  { %v1084_v13 = vpop.f32.mrf.mxu3 }
 0x3b4   :  { %v1106_v39 = vadd.f32 %v1084_v13, %v911_v30  ;;  %v899_v13 = vadd.f32 %v6626_v32, %v6608_v31 }
 0x3b6   :  { %v1271_v35 = vpop.f32.mrf.mxu1  ;;  %v1290_v29 = vadd.f32 %v1268_v6, %v1106_v39  ;;  %v1102_v36 = vadd.f32 %v6637_v27, %v899_v13 }
 0x3bb   :  { %v1087_v56 = vpop.f32.mrf.mxu3 }
 0x3bc   :  { %v1107_v12 = vadd.f32 %v1087_v56, %v914_v50  ;;  %v1289_v56 = vadd.f32 %v1265_v3, %v1105_v33  ;;  %v1617_v33 = vld [vmem:[%s7987_s14 + $0x70] sm:$0xff] }
 0x3bd   :  { %5381 = vmatpush.msra.mxu3 %v1617_v33  ;;  %1639 = vmatpush.msrb.mxu1 %v1617_v33 }
 0x3be   :  { %v1274_v10 = vpop.f32.mrf.mxu1  ;;  %v1291_v46 = vadd.f32 %v1271_v35, %v1107_v12  ;;  %v1287_v35 = vadd.f32 %v1259_v63, %v1103_v52 }
 0x3c3   :  { %v1090_v59 = vpop.f32.mrf.mxu3 }
 0x3c4   :  { %v1108_v25 = vadd.f32 %v1090_v59, %v917_v18 }
 0x3c6   :  { %v1277_v54 = vpop.f32.mrf.mxu1  ;;  %v1292_v42 = vadd.f32 %v1274_v10, %v1108_v25 }
 0x3cb   :  { %v1093_v19 = vpop.f32.mrf.mxu3 }
 0x3cc   :  { %v1109_v17 = vadd.f32 %v1093_v19, %v920_v16 }
 0x3ce   :  { %v1280_v24 = vpop.f32.mrf.mxu1  ;;  %v1293_v28 = vadd.f32 %v1277_v54, %v1109_v17 }
 0x3d3   :  { %v1096_v45 = vpop.f32.mrf.mxu3 }
 0x3d4   :  { %v1110_v60 = vadd.f32 %v1096_v45, %v923_v20 }
 0x3d6   :  { %v1294_v44 = vadd.f32 %v1280_v24, %v1110_v60  ;;  %v1283_v55 = vpop.f32.mrf.mxu1 }
 0x3db   :  { %v1099_v0 = vpop.f32.mrf.mxu3 }
 0x3dc   :  { %v1111_v53 = vadd.f32 %v1099_v0, %v926_v48 }
 0x3de   :  { %v1295_v45 = vadd.f32 %v1283_v55, %v1111_v53 }
 0x3e3   :  { %v6646_v1 = vpop.f32.mrf.mxu3 }
 0x3eb   :  { %v6648_v5 = vpop.f32.mrf.mxu3 }
 0x3ec   :  { %v1471_v27 = vadd.f32 %v6648_v5, %v1287_v35 }
 0x3ee   :  { %v1485_v24 = vmul.f32 %v5481_v58, %v1471_v27 }
 0x3f0   :  { %v6688_v12 = vadd.f32 %v5482_v57, %v1485_v24  ;;  %v1608_v24 = vld [vmem:[%s7987_s14 + $0x28] sm:$0xff] }
 0x3f2   :  { %vm1509_vm1 = vcmp.gt.f32.partialorder %v6688_v12, 0.0 }
 0x3f3   :  { %v1446_v47 = vpop.f32.mrf.mxu3 }
 0x3f4   :  { %v1472_v10 = vadd.f32 %v1446_v47, %v1288_v49 }
 0x3f6   :  { %v1486_v47 = vmul.f32 %v5481_v58, %v1472_v10 }
 0x3f8   :  { %v6685_v60 = vadd.f32 %v5482_v57, %v1486_v47  ;;  %v1614_v47 = vld [vmem:[%s7987_s14 + $0x58] sm:$0xff] }
 0x3fa   :  { %vm1510_vm0 = vcmp.gt.f32.partialorder %v6685_v60, 0.0 }
 0x3fb   :  { %v1449_v9 = vpop.f32.mrf.mxu3 }
 0x3fc   :  { %v1473_v0 = vadd.f32 %v1449_v9, %v1289_v56 }
 0x3fe   :  { %v1487_v23 = vmul.f32 %v5481_v58, %v1473_v0 }
 0x403   :  { %v1452_v11 = vpop.f32.mrf.mxu3 }
 0x404   :  { %v1474_v59 = vadd.f32 %v1452_v11, %v1290_v29  ;;  %v1286_v11 = vadd.f32 %v6644_v62, %v1102_v36  ;;  %v6682_v62 = vadd.f32 %v5482_v57, %v1487_v23  ;;  %v1569_v23 = vld [vmem:[%s8052_s3 + $0x8] sm:$0xff] }
 0x406   :  { %v1488_v31 = vmul.f32 %v5481_v58, %v1474_v59  ;;  %v1470_v63 = vadd.f32 %v6646_v1, %v1286_v11  ;;  %v1521_v38 = vmin.f32 %v6682_v62, 0.0  ;;  %vm1511_vm15 = vcmp.gt.f32.partialorder %v6682_v62, 0.0 }
 0x408   :  { %v6679_v16 = vadd.f32 %v5482_v57, %v1488_v31  ;;  %v1484_v25 = vmul.f32 %v5481_v58, %v1470_v63  ;;  %v1534_v48 = vmul.f32 1.442695, %v1521_v38  ;;  %v1613_v63 = vld [vmem:[%s7987_s14 + $0x50] sm:$0xff]  ;;  %v1619_v38 = vld [vmem:[%s7988_s15] sm:$0x3] }
 0x40a   :  { %v1522_v30 = vmin.f32 %v6679_v16, 0.0  ;;  %v6691_v39 = vadd.f32 %v5482_v57, %v1484_v25  ;;  %vm1512_vm14 = vcmp.gt.f32.partialorder %v6679_v16, 0.0  ;;  %v1604_v25 = vld [vmem:[%s7987_s14 + $0x8] sm:$0xff] }
 0x40b   :  { %v1455_v14 = vpop.f32.mrf.mxu3 }
 0x40c   :  { %v1475_v37 = vadd.f32 %v1455_v14, %v1291_v46  ;;  %v1615_v46 = vld [vmem:[%s7987_s14 + $0x60] sm:$0xff]  ;;  %v1518_v43 = vmin.f32 %v6691_v39, 0.0  ;;  %vm1508_vm2 = vcmp.gt.f32.partialorder %v6691_v39, 0.0 }
 0x40d   :  { %5382 = vmatpush.msra.mxu3 %v1615_v46  ;;  %1640 = vmatpush.msrb.mxu1 %v1615_v46 }
 0x40e   :  { %v1489_v6 = vmul.f32 %v5481_v58, %v1475_v37  ;;  %v1528_v13 = vmul.f32 1.442695, %v1518_v43 }
 0x40f   :  { %5383 = vmatpush.msra.mxu3 %v1613_v63  ;;  %1641 = vmatpush.msrb.mxu1 %v1613_v63 }
 0x413   :  { %v1458_v15 = vpop.f32.mrf.mxu3 }
 0x414   :  { %v1476_v51 = vadd.f32 %v1458_v15, %v1292_v42  ;;  %v6676_v15 = vadd.f32 %v5482_v57, %v1489_v6  ;;  %v1536_v42 = vmul.f32 1.442695, %v1522_v30  ;;  %v1571_v30 = vld [vmem:[%s7986_s13 + $0x8] sm:$0xff] }
 0x416   :  { %v1490_v61 = vmul.f32 %v5481_v58, %v1476_v51  ;;  %v1523_v5 = vmin.f32 %v6676_v15, 0.0  ;;  %vm1513_vm13 = vcmp.gt.f32.partialorder %v6676_v15, 0.0 }
 0x418   :  { %v6670_v32 = vadd.f32 %v5482_v57, %v1490_v61 }
 0x41a   :  { %v1524_v18 = vmin.f32 %v6670_v32, 0.0  ;;  %vm1514_vm12 = vcmp.gt.f32.partialorder %v6670_v32, 0.0 }
 0x41b   :  { %v1461_v40 = vpop.f32.mrf.mxu3 }
 0x41c   :  { %v1477_v8 = vadd.f32 %v1461_v40, %v1293_v28  ;;  %v1540_v1 = vmul.f32 1.442695, %v1524_v18  ;;  %v1610_v18 = vld [vmem:[%s7987_s14 + $0x38] sm:$0xff] }
 0x41e   :  { %v1491_v41 = vmul.f32 %v5481_v58, %v1477_v8  ;;  %v1538_v8 = vmul.f32 1.442695, %v1523_v5  ;;  %v1603_v5 = vld [vmem:[%s7987_s14] sm:$0xff] }
 0x420   :  { %v6668_v19 = vadd.f32 %v5482_v57, %v1491_v41 }
 0x422   :  { %v1525_v54 = vmin.f32 %v6668_v19, 0.0  ;;  %vm1515_vm11 = vcmp.gt.f32.partialorder %v6668_v19, 0.0 }
 0x423   :  { %v1464_v34 = vpop.f32.mrf.mxu3 }
 0x424   :  { %v1478_v4 = vadd.f32 %v1464_v34, %v1294_v44  ;;  %v1542_v20 = vmul.f32 1.442695, %v1525_v54  ;;  %v1520_v44 = vmin.f32 %v6685_v60, 0.0  ;;  %v1568_v54 = vld [vmem:[%s8052_s3] sm:$0xff]  ;;  %s5736_s3 = smov 112  }
 0x426   :  { %v1492_v2 = vmul.f32 %v5481_v58, %v1478_v4  ;;  %v1532_v4 = vmul.f32 1.442695, %v1520_v44 }
 0x428   :  { %v6665_v21 = vadd.f32 %v5482_v57, %v1492_v2 }
 0x42a   :  { %v1526_v3 = vmin.f32 %v6665_v21, 0.0  ;;  %vm1516_vm10 = vcmp.gt.f32.partialorder %v6665_v21, 0.0 }
 0x42b   :  { %v1467_v14 = vpop.f32.mrf.mxu3 }
 0x42c   :  { %v1479_v7 = vadd.f32 %v1467_v14, %v1295_v45  ;;  %v1544_v40 = vmul.f32 1.442695, %v1526_v3 }
 0x42e   :  { %v1493_v9 = vmul.f32 %v5481_v58, %v1479_v7  ;;  %5536 = vpow2.f32 %v1544_v40  ;;  %v1519_v58 = vmin.f32 %v6688_v12, 0.0  ;;  %v1609_v40 = vld [vmem:[%s7987_s14 + $0x30] sm:$0xff] }
 0x42f   :  { %5538 = vpow2.f32 %v1542_v20  ;;  %v1607_v20 = vld [vmem:[%s7987_s14 + $0x20] sm:$0xff] }
 0x430   :  { %v1507_v17 = vadd.f32 %v5482_v57, %v1493_v9  ;;  %v1530_v53 = vmul.f32 1.442695, %v1519_v58  ;;  %v1616_v9 = vld [vmem:[%s7987_s14 + $0x68] sm:$0xff] }
 0x432   :  { %v1527_v50 = vmin.f32 %v1507_v17, 0.0  ;;  %vm1517_vm9 = vcmp.gt.f32.partialorder %v1507_v17, 0.0 }
 0x434   :  { %v1546_v28 = vmul.f32 1.442695, %v1527_v50  ;;  %v5537_v22 = vpop.eup %5536  ;;  %v1606_v50 = vld [vmem:[%s7987_s14 + $0x18] sm:$0xff] }
 0x435   :  { %v5539_v34 = vpop.eup %5538  ;;  %v5151_v41 = vadd.f32 -1.0, %v5537_v22 }
 0x436   :  { %5540 = vpow2.f32 %v1546_v28  ;;  %v5150_v37 = vadd.f32 -1.0, %v5539_v34 }
 0x437   :  { %5542 = vpow2.f32 %v1540_v1  ;;  %v1566_v52 = vsel %vm1516_vm10, %v6665_v21, %v5151_v41 }
 0x438   :  { %5544 = vpow2.f32 %v1538_v8  ;;  %v1565_v59 = vsel %vm1515_vm11, %v6668_v19, %v5150_v37 }
 0x439   :  { %5546 = vpow2.f32 %v1536_v42 }
 0x43a   :  { %5548 = vpow2.f32 %v1534_v48 }
 0x43b   :  { %5550 = vpow2.f32 %v1532_v4 }
 0x43c   :  { %v5541_v51 = vpop.eup %5540  ;;  %5552 = vpow2.f32 %v1530_v53 }
 0x43d   :  { %v5152_v26 = vadd.f32 -1.0, %v5541_v51  ;;  %v5543_v29 = vpop.eup %5542  ;;  %5554 = vpow2.f32 %v1528_v13  ;;  %v1622_v51 = vperm.slane %v1619_v38, 1  ;;  %v6827_v13 = vld [vmem:[%s8053_s30] sm:$0xff] }
 0x43e   :  { %v5545_v2 = vpop.eup %5544  ;;  %v5149_v55 = vadd.f32 -1.0, %v5543_v29 }
 0x43f   :  { %v1567_v57 = vsel %vm1517_vm9, %v1507_v17, %v5152_v26  ;;  %v5547_v56 = vpop.eup %5546  ;;  %v5148_v61 = vadd.f32 -1.0, %v5545_v2  ;;  %v1612_v17 = vld [vmem:[%s7987_s14 + $0x48] sm:$0xff] }
 0x440   :  { %1584 = vmatpush.msra.mxu0 %v1567_v57  ;;  %v5549_v36 = vpop.eup %5548  ;;  %v1564_v49 = vsel %vm1514_vm12, %v6670_v32, %v5149_v55  ;;  %v5147_v45 = vadd.f32 -1.0, %v5547_v56  ;;  %v6822_v2 = vld [vmem:[%s8053_s30 + $0x8] sm:$0xff] }
 0x441   :  { %v5551_v0 = vpop.eup %5550  ;;  %v1563_v21 = vsel %vm1513_vm13, %v6676_v15, %v5148_v61  ;;  %v5146_v6 = vadd.f32 -1.0, %v5549_v36  ;;  %v1618_v15 = vld [vmem:[%s7987_s14 + $0x78] sm:$0xff] }
 0x442   :  { %1585 = vmatpush.msra.mxu0 %v1566_v52  ;;  %v5553_v35 = vpop.eup %5552  ;;  %v1562_v19 = vsel %vm1512_vm14, %v6679_v16, %v5147_v45  ;;  %v5145_v10 = vadd.f32 -1.0, %v5551_v0  ;;  %v1611_v16 = vld [vmem:[%s7987_s14 + $0x40] sm:$0xff] }
 0x443   :  { %v5555_v14 = vpop.eup %5554  ;;  %v1561_v31 = vsel %vm1511_vm15, %v6682_v62, %v5146_v6  ;;  %v5144_v32 = vadd.f32 -1.0, %v5553_v35  ;;  %5384 = vmatpush.msra.mxu3 %v1611_v16  ;;  %1642 = vmatpush.msrb.mxu1 %v1611_v16  ;;  %v1605_v62 = vld [vmem:[%s7987_s14 + $0x10] sm:$0xff] }
 0x444   :  { %1586 = vmatpush.msra.mxu0 %v1565_v59  ;;  %v1560_v7 = vsel %vm1510_vm0, %v6685_v60, %v5145_v10  ;;  %v5143_v3 = vadd.f32 -1.0, %v5555_v14  ;;  %v1570_v60 = vld [vmem:[%s7986_s13] sm:$0xff]  ;;  %s5733_s13 = smov 64  }
 0x445   :  { %v1559_v11 = vsel %vm1509_vm1, %v6688_v12, %v5144_v32  ;;  %5385 = vmatpush.msra.mxu3 %v1609_v40  ;;  %1643 = vmatpush.msrb.mxu1 %v1609_v40 }
 0x446   :  { %1587 = vmatpush.msra.mxu0 %v1564_v49  ;;  %v1558_v27 = vsel %vm1508_vm2, %v6691_v39, %v5143_v3  ;;  %v1621_v39 = vperm.slane %v1619_v38, 0 }
 0x447   :  { %5386 = vmatpush.msra.mxu3 %v1607_v20  ;;  %1644 = vmatpush.msrb.mxu1 %v1607_v20 }
 0x448   :  { %1588 = vmatpush.msra.mxu0 %v1563_v21 }
 0x449   :  { %5387 = vmatpush.msra.mxu3 %v1605_v62  ;;  %1645 = vmatpush.msrb.mxu1 %v1605_v62 }
 0x44a   :  { %1589 = vmatpush.msra.mxu0 %v1562_v19 }
 0x44b   :  { %5388 = vmatpush.msra.mxu3 %v1603_v5  ;;  %1646 = vmatpush.msrb.mxu1 %v1603_v5 }
 0x44c   :  { %1590 = vmatpush.msra.mxu0 %v1561_v31 }
 0x44e   :  { %1591 = vmatpush.msra.mxu0 %v1560_v7 }
 0x450   :  { %1592 = vmatpush.msra.mxu0 %v1559_v11 }
 0x452   :  { %1593 = vmatpush.msra.mxu0 %v1558_v27 }
 0x453   :  { %5153 = vmatmul.msk.f32.vlgmr.msra.gmra.mxu0 %vm590_vm7, %v1568_v54 }
 0x454   :  { %1662 = vmatpush.msrb.mxu0 %v1618_v15 }
 0x456   :  { %1663 = vmatpush.msrb.mxu0 %v1616_v9 }
 0x458   :  { %1664 = vmatpush.msrb.mxu0 %v1614_v47 }
 0x45a   :  { %1665 = vmatpush.msrb.mxu0 %v1612_v17 }
 0x45b   :  { %5154 = vmatmul.msk.f32.gmra.mxu0 %vm590_vm7, %v1569_v23 }
 0x45c   :  { %1666 = vmatpush.msrb.mxu0 %v1610_v18 }
 0x45e   :  { %1667 = vmatpush.msrb.mxu0 %v1608_v24 }
 0x460   :  { %1668 = vmatpush.msrb.mxu0 %v1606_v50 }
 0x462   :  { %1669 = vmatpush.msrb.mxu0 %v1604_v25 }
 0x4d0   :  { %v1595_v28 = vpop.f32.mrf.mxu0 }
 0x4d1   :  { %v6773_v1 = vadd.f32 %v1595_v28, %v1570_v60 }
 0x4d3   :  { %5155 = vmatmul.msk.f32.vlgmr.msrb.gmra.mxu1 %vm773_vm8, %v6773_v1  ;;  %5157 = vmatmul.msk.f32.vlgmr.msrb.gmra.mxu0 %vm773_vm8, %v6773_v1 }
 0x4d8   :  { %v1598_v12 = vpop.f32.mrf.mxu0 }
 0x4d9   :  { %v6782_v8 = vadd.f32 %v1598_v12, %v1571_v30 }
 0x4db   :  { %5156 = vmatmul.msk.f32.vlgmr.msra.gmra.mxu3 %vm773_vm8, %v6782_v8  ;;  %5158 = vmatmul.msk.f32.gmra.mxu0 %vm773_vm8, %v6782_v8 }
 0x550   :  { %v1648_v42 = vpop.f32.mrf.mxu1  ;;  %v1671_v58 = vpop.f32.mrf.mxu0 }
 0x551   :  { %v6791_v44 = vadd.f32 %v1648_v42, %v1621_v39  ;;  %v1672_v26 = vadd.f32 %v1671_v58, %v1622_v51 }
 0x553   :  { %1805 = vrot.lane.b32.xlu2 %v6791_v44, %s5732_s7 }
 0x558   :  { %v1674_v46 = vpop.f32.mrf.mxu0 }
 0x559   :  { %v1675_v4 = vadd.f32 %v1674_v46, %v1622_v51 }
 0x55b   :  { %v6839_v14 = vpack.i.bf16 %v1672_v26, %v1675_v4 }
 0x55e   :  { %v1651_v22 = vpop.f32.mrf.mxu3 }
 0x55f   :  { %v6795_v48 = vadd.f32 %v1651_v22, %v1621_v39 }
 0x561   :  { %1689 = vrot.lane.b32.xlu0 %v6795_v48, %s5733_s13  ;;  %1811 = vrot.lane.b32.xlu1 %v6795_v48, %s5734_s2 }
 0x562   :  { %1807 = vrot.lane.b32.xlu2 %v6795_v48, %s5732_s7 }
 0x569   :  { %1687 = vrot.lane.b32.xlu0 %v6791_v44, %s5733_s13  ;;  %1809 = vrot.lane.b32.xlu1 %v6791_v44, %s5734_s2 }
 0x5ad   :  { %v1806_v29 = vpop.permute.xlu2 %1805 }
 0x5bc   :  { %v1808_v53 = vpop.permute.xlu2 %1807 }
 0x5d3   :  { %v1690_v34 = vpop.permute.xlu0 %1689  ;;  %v1812_v33 = vpop.permute.xlu1 %1811 }
 0x5d4   :  { %5159 = vmatpush.xpose.msk.msra.mxu0 %vm1691_vm3, %v1690_v34  ;;  %5389 = vmatpush.xpose.msk.msra.mxu1 %vm1691_vm3, %v1690_v34 }
 0x5db   :  { %v1688_v43 = vpop.permute.xlu0 %1687  ;;  %v1810_v41 = vpop.permute.xlu1 %1809 }
 0x5dc   :  { %5160 = vmatpush.xpose.msk.msra.mxu0 %vm1691_vm3, %v1688_v43  ;;  %5390 = vmatpush.xpose.msk.msra.mxu1 %vm1691_vm3, %v1688_v43 }
 0x5df   :  { %5161 = vmatmul.msk.f32.vlgmr.msra.gmra.mxu0 %vm1691_vm3, %v6791_v44  ;;  %5162 = vmatmul.msk.f32.vlgmr.msra.gmra.mxu1 %vm1691_vm3, %v6795_v48 }
 0x5e0   :  { %1796 = vmatpush.msrb.mxu0 %v1675_v4  ;;  %5165 = vmatpush.xpose.msk.msrb.mxu1 %vm1691_vm3, %v1812_v33 }
 0x5e2   :  { %1797 = vmatpush.msrb.mxu0 %v1672_v26 }
 0x5e4   :  { %5166 = vmatpush.xpose.msk.msrb.mxu1 %vm1691_vm3, %v1810_v41 }
 0x5e7   :  { %5167 = vmatmul.msk.f32.vlgmr.msrb.gmra.mxu1 %vm1691_vm3, %v1806_v29 }
 0x5ef   :  { %5168 = vmatmul.msk.f32.gmra.mxu1 %vm1691_vm3, %v1808_v53 }
 0x65c   :  { %v1717_v57 = vpop.f32.mrf.mxu0  ;;  %v1720_v37 = vpop.f32.mrf.mxu1 }
 0x65d   :  { %v1723_v52 = vmul.f32 0.35355338, %v1717_v57  ;;  %v1724_v55 = vmul.f32 0.35355338, %v1720_v37  ;;  %v1677_v37 = vld [vmem:[%s7989_s16] sm:$0xff] }
 0x65f   :  { %v1726_v56 = vadd.f32 %v1724_v55, %v6822_v2  ;;  %v1725_v59 = vadd.f32 %v1723_v52, %v6827_v13 }
 0x661   :  { %v1731_v61 = vsel %vm1727_vm4, %v1726_v56, -inf  ;;  %v1728_v36 = vsel %vm1727_vm4, %v1725_v59, -inf }
 0x662   :  { %1732 = vmax.xlane.f32.xlu1 %v1731_v61  ;;  %1729 = vmax.xlane.f32.xlu0 %v1728_v36 }
 0x664   :  { %v1838_v49 = vpop.f32.mrf.mxu1 }
 0x665   :  { %v1844_v45 = vmul.f32 0.35355338, %v1838_v49 }
 0x667   :  { %v1846_v0 = vadd.f32 %v1844_v45, %v6827_v13 }
 0x669   :  { %v1848_v21 = vsel %vm1727_vm4, %v1846_v0, -inf }
 0x66a   :  { %1849 = vmax.xlane.f32.xlu0 %v1848_v21 }
 0x66c   :  { %v1841_v6 = vpop.f32.mrf.mxu1 }
 0x66d   :  { %v1845_v35 = vmul.f32 0.35355338, %v1841_v6 }
 0x66f   :  { %v1847_v19 = vadd.f32 %v1845_v35, %v6822_v2 }
 0x671   :  { %v1851_v10 = vsel %vm1727_vm4, %v1847_v19, -inf }
 0x672   :  { %1852 = vmax.xlane.f32.xlu1 %v1851_v10 }
 0x67e   :  { %1995 = vrot.lane.b32.xlu0 %v6791_v44, %s5735_s5 }
 0x68b   :  { %5409 = vrot.lane.b32.xlu1 %v6839_v14, %s5732_s7 }
 0x693   :  { %1991 = vrot.lane.b32.xlu1 %v6791_v44, %s5736_s3 }
 0x69b   :  { %1993 = vrot.lane.b32.xlu1 %v6795_v48, %s5736_s3 }
 0x6d5   :  { %v1730_v31 = vpop.xlane.xlu0 %1729  ;;  %v1733_v32 = vpop.xlane.xlu1 %1732 }
 0x6d6   :  { %v1734_v7 = vsub.f32 %v1725_v59, %v1730_v31  ;;  %v1735_v11 = vsub.f32 %v1726_v56, %v1733_v32 }
 0x6d8   :  { %v1736_v3 = vmul.f32 1.442695, %v1734_v7  ;;  %v1738_v54 = vmul.f32 1.442695, %v1735_v11 }
 0x6da   :  { %5556 = vpow2.f32 %v1736_v3 }
 0x6db   :  { %5558 = vpow2.f32 %v1738_v54 }
 0x6dd   :  { %v1850_v27 = vpop.xlane.xlu0 %1849 }
 0x6de   :  { %v1854_v15 = vsub.f32 %v1846_v0, %v1850_v27 }
 0x6e0   :  { %v5557_v23 = vpop.eup %5556  ;;  %v1856_v63 = vmul.f32 1.442695, %v1854_v15 }
 0x6e1   :  { %v1740_v9 = vsel %vm1727_vm4, %v5557_v23, 0.0  ;;  %v6848_v17 = vpop.eup %5558 }
 0x6e2   :  { %1741 = vadd.xlane.f32.xlu2 %v1740_v9  ;;  %5560 = vpow2.f32 %v1856_v63  ;;  %v1743_v18 = vsel %vm1727_vm4, %v6848_v17, 0.0 }
 0x6e5   :  { %v1853_v47 = vpop.xlane.xlu1 %1852 }
 0x6e6   :  { %v1855_v16 = vsub.f32 %v1847_v19, %v1853_v47 }
 0x6e8   :  { %v1858_v40 = vmul.f32 1.442695, %v1855_v16  ;;  %v6852_v20 = vpop.eup %5560 }
 0x6e9   :  { %v1860_v50 = vsel %vm1727_vm4, %v6852_v20, 0.0 }
 0x6ea   :  { %5562 = vpow2.f32 %v1858_v40  ;;  %1744 = vadd.xlane.f32.xlu2 %v1743_v18 }
 0x6f0   :  { %v6854_v24 = vpop.eup %5562  ;;  %v1996_v12 = vpop.permute.xlu0 %1995 }
 0x6f1   :  { %v1863_v62 = vsel %vm1727_vm4, %v6854_v24, 0.0 }
 0x6f2   :  { %1864 = vadd.xlane.f32.xlu0 %v1863_v62  ;;  %1861 = vadd.xlane.f32.xlu2 %v1860_v50 }
 0x6fd   :  { %v5410_v5 = vpop.permute.xlu1 %5409 }
 0x6fe   :  { %v5411_v25 = vunpack.i.l.bf16 %v5410_v5  ;;  %v5412_v60 = vunpack.i.h.bf16 %v5410_v5 }
 0x700   :  { %1924 = vmatpush.msra.mxu0 %v5411_v25 }
 0x702   :  { %1925 = vmatpush.msra.mxu0 %v5412_v60  ;;  %v1678_v60 = vld [vmem:[%s7989_s16 + $0x8] sm:$0xff] }
 0x703   :  { %1954 = vmatpush.msra.mxu1 %v1678_v60 }
 0x705   :  { %v1992_v54 = vpop.permute.xlu1 %1991 }
 0x706   :  { %2154 = vrot.lane.b32.xlu0 %v6795_v48, %s8027_s6 }
 0x70a   :  { %1997 = vrot.lane.b32.xlu2 %v6795_v48, %s5735_s5 }
 0x70d   :  { %v1994_v50 = vpop.permute.xlu1 %1993 }
 0x70e   :  { %2148 = vrot.lane.b32.xlu0 %v6791_v44, %s8025_s10 }
 0x712   :  { %2152 = vrot.lane.b32.xlu2 %v6791_v44, %s8027_s6 }
 0x71a   :  { %2150 = vrot.lane.b32.xlu2 %v6795_v48, %s8025_s10 }
 0x755   :  { %v1742_v28 = vpop.xlane.xlu2 %1741 }
 0x756   :  { %5564 = vrcp.f32 %v1742_v28  ;;  %v1757_v22 = vand.u32 2147483648, %v1742_v28  ;;  %v1755_v34 = vand.u32 2147483647, %v1742_v28  ;;  %vm1751_vm6 = vweird.f32 %v1742_v28 }
 0x758   :  { %v1758_v51 = vor.u32 1.1754944e-38, %v1757_v22  ;;  %vm1756_vm9 = vcmp.eq.f32.partialorder %v1755_v34, 8.507059e+37 }
 0x75c   :  { %v5565_v30 = vpop.eup %5564 }
 0x75d   :  { %v1747_v38 = vmul.f32 %v5565_v30, %v1742_v28  ;;  %v1745_v39 = vpop.xlane.xlu2 %1744  ;;  %vm1752_vm5 = vweird.f32 %v5565_v30 }
 0x75e   :  { %5566 = vrcp.f32 %v1745_v39  ;;  %vm1753_vm7 = vmor %vm1751_vm6, %vm1752_vm5  ;;  %v1772_v52 = vand.u32 2147483648, %v1745_v39  ;;  %v1770_v56 = vand.u32 2147483647, %v1745_v39  ;;  %vm1766_vm11 = vweird.f32 %v1745_v39 }
 0x75f   :  { %v1748_v42 = vsub.f32 1.0, %v1747_v38 }
 0x760   :  { %v1773_v49 = vor.u32 1.1754944e-38, %v1772_v52  ;;  %vm1771_vm13 = vcmp.eq.f32.partialorder %v1770_v56, 8.507059e+37 }
 0x761   :  { %v1749_v58 = vmul.f32 %v5565_v30, %v1748_v42 }
 0x763   :  { %v1750_v33 = vadd.f32 %v5565_v30, %v1749_v58 }
 0x764   :  { %v5567_v46 = vpop.eup %5566 }
 0x765   :  { %v1865_v4 = vpop.xlane.xlu0 %1864  ;;  %v1754_v43 = vsel %vm1753_vm7, %v5565_v30, %v1750_v33  ;;  %v1762_v26 = vmul.f32 %v5567_v46, %v1745_v39  ;;  %v1862_v41 = vpop.xlane.xlu2 %1861  ;;  %vm1767_vm10 = vweird.f32 %v5567_v46 }
 0x766   :  { %5568 = vrcp.f32 %v1865_v4  ;;  %v1759_v29 = vsel %vm1756_vm9, %v1758_v51, %v1754_v43  ;;  %vm1768_vm12 = vmor %vm1766_vm11, %vm1767_vm10  ;;  %v1877_v32 = vand.u32 2147483648, %v1862_v41  ;;  %v1875_v3 = vand.u32 2147483647, %v1862_v41 }
 0x767   :  { %5570 = vrcp.f32 %v1862_v41  ;;  %v1760_v53 = vmul.f32 %v5557_v23, %v1759_v29  ;;  %v1763_v57 = vsub.f32 1.0, %v1762_v26  ;;  %vm1871_vm15 = vweird.f32 %v1862_v41 }
 0x768   :  { %v1878_v23 = vor.u32 1.1754944e-38, %v1877_v32  ;;  %vm1876_vm1 = vcmp.eq.f32.partialorder %v1875_v3, 8.507059e+37  ;;  %v1892_v47 = vand.u32 2147483648, %v1865_v4  ;;  %vm1886_vm5 = vweird.f32 %v1865_v4 }
 0x769   :  { %v1764_v55 = vmul.f32 %v5567_v46, %v1763_v57  ;;  %5163 = vmatmul.msk.f32.vlgmr.msrb.gmra.mxu0 %vm1727_vm4, %v1760_v53 }
 0x76a   :  { %1983 = vmatpush.msrb.mxu0 %v1677_v37  ;;  %v1893_v62 = vor.u32 1.1754944e-38, %v1892_v47 }
 0x76b   :  { %v1765_v61 = vadd.f32 %v5567_v46, %v1764_v55 }
 0x76c   :  { %v5569_v59 = vpop.eup %5568 }
 0x76d   :  { %v5571_v36 = vpop.eup %5570  ;;  %v1882_v45 = vmul.f32 %v5569_v59, %v1865_v4  ;;  %v1998_v21 = vpop.permute.xlu2 %1997  ;;  %v1769_v6 = vsel %vm1768_vm12, %v5567_v46, %v1765_v61  ;;  %vm1887_vm2 = vweird.f32 %v5569_v59 }
 0x76e   :  { %v1867_v0 = vmul.f32 %v5571_v36, %v1862_v41  ;;  %5175 = vmatpush.xpose.msk.msra.mxu2 %vm1691_vm3, %v1998_v21  ;;  %v1774_v19 = vsel %vm1771_vm13, %v1773_v49, %v1769_v6  ;;  %vm1872_vm14 = vweird.f32 %v5571_v36  ;;  %vm1888_vm6 = vmor %vm1886_vm5, %vm1887_vm2 }
 0x76f   :  { %v1883_v35 = vsub.f32 1.0, %v1882_v45  ;;  %v1775_v31 = vmul.f32 %v6848_v17, %v1774_v19  ;;  %vm1873_vm0 = vmor %vm1871_vm15, %vm1872_vm14  ;;  %v1890_v17 = vand.u32 2147483647, %v1865_v4 }
 0x770   :  { %v1868_v10 = vsub.f32 1.0, %v1867_v0 }
 0x771   :  { %v1884_v11 = vmul.f32 %v5569_v59, %v1883_v35  ;;  %5164 = vmatmul.msk.f32.gmra.mxu0 %vm1727_vm4, %v1775_v31  ;;  %vm1891_vm7 = vcmp.eq.f32.partialorder %v1890_v17, 8.507059e+37 }
 0x772   :  { %v1869_v7 = vmul.f32 %v5571_v36, %v1868_v10  ;;  %5176 = vmatpush.xpose.msk.msra.mxu2 %vm1691_vm3, %v1996_v12 }
 0x773   :  { %v1885_v9 = vadd.f32 %v5569_v59, %v1884_v11 }
 0x774   :  { %v1870_v27 = vadd.f32 %v5571_v36, %v1869_v7 }
 0x775   :  { %5177 = vmatmul.msk.f32.vlgmr.msra.gmra.mxu2 %vm1691_vm3, %v1992_v54  ;;  %v1889_v18 = vsel %vm1888_vm6, %v5569_v59, %v1885_v9  ;;  %v2153_v25 = vpop.permute.xlu2 %2152 }
 0x776   :  { %v1874_v15 = vsel %vm1873_vm0, %v5571_v36, %v1870_v27  ;;  %v1894_v5 = vsel %vm1891_vm7, %v1893_v62, %v1889_v18  ;;  %v1679_v62 = vld [vmem:[%s7989_s16 + $0x10] sm:$0xff] }
 0x777   :  { %v1879_v63 = vsel %vm1876_vm1, %v1878_v23, %v1874_v15  ;;  %2138 = vmatpush.msrb.mxu3 %v1679_v62 }
 0x778   :  { %v1880_v16 = vmul.f32 %v6852_v20, %v1879_v63  ;;  %v2155_v40 = vpop.permute.xlu0 %2154  ;;  %v1895_v20 = vmul.f32 %v6854_v24, %v1894_v5 }
 0x77a   :  { %5169 = vmatmul.msk.f32.vlgmr.msra.gmra.mxu0 %vm1727_vm4, %v1880_v16 }
 0x77b   :  { %5183 = vmatpush.xpose.msk.msra.mxu0 %vm1691_vm3, %v2155_v40 }
 0x77d   :  { %5178 = vmatmul.msk.f32.gmra.mxu2 %vm1691_vm3, %v1994_v50  ;;  %v2151_v58 = vpop.permute.xlu2 %2150 }
 0x77f   :  { %5184 = vmatpush.xpose.msk.msra.mxu0 %vm1691_vm3, %v2153_v25 }
 0x780   :  { %v2149_v12 = vpop.permute.xlu0 %2148 }
 0x782   :  { %5170 = vmatmul.msk.f32.gmra.mxu0 %vm1727_vm4, %v1895_v20 }
 0x7e6   :  { %v1799_v28 = vpop.f32.mrf.mxu0 }
 0x7e7   :  { %5173 = vmatmul.msk.f32.vlgmr.msrb.gmra.mxu0 %vm1691_vm3, %v1799_v28 }
 0x7ee   :  { %v1802_v30 = vpop.f32.mrf.mxu0 }
 0x7ef   :  { %5174 = vmatmul.msk.f32.gmra.mxu0 %vm1691_vm3, %v1802_v30 }
 0x7f7   :  { %v1927_v38 = vpop.f32.mrf.mxu0  ;;  %5185 = vmatmul.msk.f32.vlgmr.msra.gmra.mxu0 %vm1691_vm3, %v2149_v12 }
 0x7f8   :  { %5171 = vmatmul.msk.f32.vlgmr.msra.gmra.mxu1 %vm1691_vm3, %v1927_v38  ;;  %v2024_v24 = vpop.f32.mrf.mxu2 }
 0x7f9   :  { %v2030_v39 = vmul.f32 0.35355338, %v2024_v24 }
 0x7fb   :  { %v2032_v42 = vadd.f32 %v2030_v39, %v6827_v13 }
 0x7fd   :  { %v2034_v22 = vsel %vm1727_vm4, %v2032_v42, -inf }
 0x7fe   :  { %2035 = vmax.xlane.f32.xlu1 %v2034_v22 }
 0x7ff   :  { %v1930_v34 = vpop.f32.mrf.mxu0  ;;  %5186 = vmatmul.msk.f32.gmra.mxu0 %vm1691_vm3, %v2151_v58 }
 0x800   :  { %5172 = vmatmul.msk.f32.gmra.mxu1 %vm1691_vm3, %v1930_v34  ;;  %v2027_v33 = vpop.f32.mrf.mxu2 }
 0x801   :  { %v2031_v46 = vmul.f32 0.35355338, %v2027_v33 }
 0x803   :  { %v2033_v51 = vadd.f32 %v2031_v46, %v6822_v2 }
 0x805   :  { %v2037_v4 = vsel %vm1727_vm4, %v2033_v51, -inf }
 0x806   :  { %2038 = vmax.xlane.f32.xlu2 %v2037_v4 }
 0x864   :  { %v6899_v43 = vpop.f32.mrf.mxu0 }
 0x86c   :  { %v6901_v26 = vpop.f32.mrf.mxu0 }
 0x871   :  { %v2036_v41 = vpop.xlane.xlu1 %2035 }
 0x872   :  { %v2040_v29 = vsub.f32 %v2032_v42, %v2036_v41 }
 0x874   :  { %v2042_v53 = vmul.f32 1.442695, %v2040_v29  ;;  %v2181_v57 = vpop.f32.mrf.mxu0 }
 0x875   :  { %v2187_v37 = vmul.f32 0.35355338, %v2181_v57 }
 0x876   :  { %5572 = vpow2.f32 %v2042_v53 }
 0x877   :  { %v2189_v52 = vadd.f32 %v2187_v37, %v6827_v13 }
 0x879   :  { %v2039_v55 = vpop.xlane.xlu2 %2038  ;;  %v2191_v56 = vsel %vm1727_vm4, %v2189_v52, -inf }
 0x87a   :  { %v2041_v59 = vsub.f32 %v2033_v51, %v2039_v55  ;;  %2192 = vmax.xlane.f32.xlu0 %v2191_v56 }
 0x87c   :  { %v2044_v61 = vmul.f32 1.442695, %v2041_v59  ;;  %v2184_v36 = vpop.f32.mrf.mxu0  ;;  %v6905_v45 = vpop.eup %5572  ;;  %v1680_v59 = vld [vmem:[%s7989_s16 + $0x18] sm:$0xff] }
 0x87d   :  { %v2188_v49 = vmul.f32 0.35355338, %v2184_v36  ;;  %v2046_v21 = vsel %vm1727_vm4, %v6905_v45, 0.0 }
 0x87e   :  { %5574 = vpow2.f32 %v2044_v61 }
 0x87f   :  { %v2190_v0 = vadd.f32 %v2188_v49, %v6822_v2 }
 0x881   :  { %v2194_v6 = vsel %vm1727_vm4, %v2190_v0, -inf }
 0x882   :  { %2047 = vadd.xlane.f32.xlu0 %v2046_v21  ;;  %2195 = vmax.xlane.f32.xlu1 %v2194_v6 }
 0x884   :  { %v6911_v35 = vpop.eup %5574 }
 0x885   :  { %v2049_v19 = vsel %vm1727_vm4, %v6911_v35, 0.0 }
 0x88a   :  { %2050 = vadd.xlane.f32.xlu1 %v2049_v19 }
 0x8a3   :  { %5419 = vrot.lane.b32.xlu1 %v6839_v14, %s8025_s10 }
 0x8ab   :  { %2468 = vrot.lane.b32.xlu1 %v6795_v48, %s8015_s12 }
 0x8b3   :  { %2462 = vrot.lane.b32.xlu1 %v6791_v44, %s8011_s1 }
 0x8ed   :  { %v2193_v10 = vpop.xlane.xlu0 %2192 }
 0x8ee   :  { %v2197_v31 = vsub.f32 %v2189_v52, %v2193_v10 }
 0x8f0   :  { %v2199_v32 = vmul.f32 1.442695, %v2197_v31 }
 0x8f2   :  { %5576 = vpow2.f32 %v2199_v32 }
 0x8f5   :  { %v2196_v7 = vpop.xlane.xlu1 %2195  ;;  %v2048_v17 = vpop.xlane.xlu0 %2047 }
 0x8f6   :  { %v2198_v3 = vsub.f32 %v2190_v0, %v2196_v7  ;;  %v2063_v12 = vand.u32 2147483648, %v2048_v17  ;;  %vm2057_vm10 = vweird.f32 %v2048_v17  ;;  %v2061_v38 = vand.u32 2147483647, %v2048_v17 }
 0x8f8   :  { %v6921_v11 = vpop.eup %5576  ;;  %v2201_v54 = vmul.f32 1.442695, %v2198_v3  ;;  %v2064_v22 = vor.u32 1.1754944e-38, %v2063_v12  ;;  %vm2062_vm12 = vcmp.eq.f32.partialorder %v2061_v38, 8.507059e+37 }
 0x8f9   :  { %v2203_v27 = vsel %vm1727_vm4, %v6921_v11, 0.0 }
 0x8fa   :  { %2204 = vadd.xlane.f32.xlu2 %v2203_v27  ;;  %5578 = vpow2.f32 %v2201_v54 }
 0x8fb   :  { %5580 = vrcp.f32 %v2048_v17 }
 0x8fd   :  { %v6929_v9 = vpop.xlane.xlu1 %2050 }
 0x8fe   :  { %5582 = vrcp.f32 %v6929_v9  ;;  %vm2072_vm13 = vweird.f32 %v6929_v9  ;;  %v2076_v29 = vand.u32 2147483647, %v6929_v9  ;;  %v2078_v53 = vand.u32 2147483648, %v6929_v9 }
 0x900   :  { %v6925_v23 = vpop.eup %5578  ;;  %vm2077_vm5 = vcmp.eq.f32.partialorder %v2076_v29, 8.507059e+37 }
 0x901   :  { %v2206_v15 = vsel %vm1727_vm4, %v6925_v23, 0.0  ;;  %v5581_v40 = vpop.eup %5580 }
 0x902   :  { %2207 = vadd.xlane.f32.xlu0 %v2206_v15  ;;  %v2053_v18 = vmul.f32 %v5581_v40, %v2048_v17  ;;  %vm2058_vm9 = vweird.f32 %v5581_v40 }
 0x903   :  { %vm2059_vm11 = vmor %vm2057_vm10, %vm2058_vm9 }
 0x904   :  { %v2054_v50 = vsub.f32 1.0, %v2053_v18  ;;  %v5583_v5 = vpop.eup %5582 }
 0x905   :  { %v2068_v20 = vmul.f32 %v5583_v5, %v6929_v9  ;;  %vm2073_vm14 = vweird.f32 %v5583_v5 }
 0x906   :  { %v2055_v25 = vmul.f32 %v5581_v40, %v2054_v50  ;;  %vm6959_vm0 = vmor %vm2072_vm13, %vm2073_vm14 }
 0x907   :  { %v2069_v30 = vsub.f32 1.0, %v2068_v20 }
 0x908   :  { %v2056_v28 = vadd.f32 %v5581_v40, %v2055_v25 }
 0x909   :  { %v2070_v39 = vmul.f32 %v5583_v5, %v2069_v30 }
 0x90a   :  { %v2060_v24 = vsel %vm2059_vm11, %v5581_v40, %v2056_v28 }
 0x90b   :  { %v2065_v33 = vsel %vm2062_vm12, %v2064_v22, %v2060_v24  ;;  %v2071_v4 = vadd.f32 %v5583_v5, %v2070_v39 }
 0x90c   :  { %v2066_v52 = vmul.f32 %v6905_v45, %v2065_v33  ;;  %v2079_v45 = vor.u32 1.1754944e-38, %v2078_v53 }
 0x90d   :  { %v2075_v49 = vsel %vm6959_vm0, %v5583_v5, %v2071_v4 }
 0x90e   :  { %v2080_v7 = vsel %vm2077_vm5, %v2079_v45, %v2075_v49 }
 0x90f   :  { %v2081_v15 = vmul.f32 %v6911_v35, %v2080_v7  ;;  %v6976_v35 = vpop.f32.mrf.mxu1 }
 0x912   :  { %5414 = vrot.lane.b32.xlu2 %v6839_v14, %s5736_s3 }
 0x915   :  { %v5420_v63 = vpop.permute.xlu1 %5419 }
 0x916   :  { %v5421_v47 = vunpack.i.l.bf16 %v5420_v63  ;;  %2311 = vrot.lane.b32.xlu0 %v6795_v48, %s8023_s4  ;;  %v5422_v16 = vunpack.i.h.bf16 %v5420_v63 }
 0x917   :  { %v6978_v50 = vpop.f32.mrf.mxu1 }
 0x918   :  { %2265 = vmatpush.msrb.mxu2 %v5421_v47 }
 0x91a   :  { %2309 = vrot.lane.b32.xlu2 %v6791_v44, %s8023_s4  ;;  %2266 = vmatpush.msrb.mxu2 %v5422_v16 }
 0x91d   :  { %v2469_v0 = vpop.permute.xlu1 %2468 }
 0x91e   :  { %2305 = vrot.lane.b32.xlu0 %v6791_v44, %s8021_s9 }
 0x922   :  { %2466 = vrot.lane.b32.xlu2 %v6791_v44, %s8015_s12  ;;  %s8067_s12 = smov 80  }
 0x925   :  { %v2463_v30 = vpop.permute.xlu1 %2462 }
 0x926   :  { %2307 = vrot.lane.b32.xlu0 %v6795_v48, %s8021_s9 }
 0x92a   :  { %2464 = vrot.lane.b32.xlu2 %v6795_v48, %s8011_s1 }
 0x96d   :  { %v2205_v60 = vpop.xlane.xlu2 %2204 }
 0x96e   :  { %5584 = vrcp.f32 %v2205_v60  ;;  %v2220_v57 = vand.u32 2147483648, %v2205_v60  ;;  %v2218_v56 = vand.u32 2147483647, %v2205_v60  ;;  %vm2214_vm1 = vweird.f32 %v2205_v60 }
 0x970   :  { %v2221_v21 = vor.u32 1.1754944e-38, %v2220_v57  ;;  %vm2219_vm6 = vcmp.eq.f32.partialorder %v2218_v56, 8.507059e+37 }
 0x974   :  { %v5585_v42 = vpop.eup %5584 }
 0x975   :  { %v2210_v58 = vmul.f32 %v5585_v42, %v2205_v60  ;;  %v5415_v34 = vpop.permute.xlu2 %5414  ;;  %v2208_v51 = vpop.xlane.xlu0 %2207  ;;  %vm2215_vm15 = vweird.f32 %v5585_v42 }
 0x976   :  { %v5416_v46 = vunpack.i.l.bf16 %v5415_v34  ;;  %5586 = vrcp.f32 %v2208_v51  ;;  %v5417_v37 = vunpack.i.h.bf16 %v5415_v34  ;;  %vm2216_vm2 = vmor %vm2214_vm1, %vm2215_vm15  ;;  %v2235_v27 = vand.u32 2147483648, %v2208_v51 }
 0x977   :  { %v2211_v41 = vsub.f32 1.0, %v2210_v58  ;;  %v2233_v63 = vand.u32 2147483647, %v2208_v51  ;;  %vm2229_vm9 = vweird.f32 %v2208_v51 }
 0x978   :  { %2108 = vmatpush.msrb.mxu1 %v5416_v46  ;;  %v2236_v16 = vor.u32 1.1754944e-38, %v2235_v27 }
 0x979   :  { %v2212_v55 = vmul.f32 %v5585_v42, %v2211_v41  ;;  %vm2234_vm11 = vcmp.eq.f32.partialorder %v2233_v63, 8.507059e+37 }
 0x97a   :  { %2109 = vmatpush.msrb.mxu1 %v5417_v37 }
 0x97b   :  { %v2213_v36 = vadd.f32 %v5585_v42, %v2212_v55  ;;  %5179 = vmatmul.msk.f32.vlgmr.msrb.gmra.mxu1 %vm1727_vm4, %v2066_v52 }
 0x97c   :  { %2295 = vmatpush.msra.mxu1 %v1680_v59  ;;  %v5587_v6 = vpop.eup %5586 }
 0x97d   :  { %v2217_v19 = vsel %vm2216_vm2, %v5585_v42, %v2213_v36  ;;  %v2310_v10 = vpop.permute.xlu2 %2309  ;;  %v2225_v32 = vmul.f32 %v5587_v6, %v2208_v51  ;;  %vm2230_vm7 = vweird.f32 %v5587_v6 }
 0x97e   :  { %5199 = vmatpush.xpose.msk.msrb.mxu1 %vm1691_vm3, %v2469_v0  ;;  %v2222_v31 = vsel %vm2219_vm6, %v2221_v21, %v2217_v19  ;;  %vm2231_vm10 = vmor %vm2229_vm9, %vm2230_vm7 }
 0x97f   :  { %v2223_v3 = vmul.f32 %v6921_v11, %v2222_v31  ;;  %v2226_v54 = vsub.f32 1.0, %v2225_v32 }
 0x981   :  { %5187 = vmatmul.msk.f32.vlgmr.msrb.gmra.mxu2 %vm1727_vm4, %v2223_v3  ;;  %v2227_v9 = vmul.f32 %v5587_v6, %v2226_v54 }
 0x983   :  { %5180 = vmatmul.msk.f32.gmra.mxu1 %vm1727_vm4, %v2081_v15  ;;  %v2228_v47 = vadd.f32 %v5587_v6, %v2227_v9 }
 0x985   :  { %v2467_v17 = vpop.permute.xlu2 %2466  ;;  %v2232_v11 = vsel %vm2231_vm10, %v5587_v6, %v2228_v47 }
 0x986   :  { %5200 = vmatpush.xpose.msk.msrb.mxu1 %vm1691_vm3, %v2467_v17  ;;  %v2237_v40 = vsel %vm2234_vm11, %v2236_v16, %v2232_v11  ;;  %v1681_v16 = vld [vmem:[%s7989_s16 + $0x20] sm:$0xff] }
 0x987   :  { %v2238_v18 = vmul.f32 %v6925_v23, %v2237_v40  ;;  %2452 = vmatpush.msra.mxu2 %v1681_v16 }
 0x988   :  { %v2312_v62 = vpop.permute.xlu0 %2311 }
 0x989   :  { %5188 = vmatmul.msk.f32.gmra.mxu2 %vm1727_vm4, %v2238_v18  ;;  %5191 = vmatpush.xpose.msk.msra.mxu3 %vm1691_vm3, %v2312_v62 }
 0x98d   :  { %5192 = vmatpush.xpose.msk.msra.mxu3 %vm1691_vm3, %v2310_v10  ;;  %v2465_v12 = vpop.permute.xlu2 %2464 }
 0x990   :  { %v2306_v23 = vpop.permute.xlu0 %2305 }
 0x998   :  { %v2308_v28 = vpop.permute.xlu0 %2307 }
 0x9f8   :  { %v2111_v5 = vpop.f32.mrf.mxu1 }
 0x9f9   :  { %5181 = vmatmul.msk.f32.vlgmr.msrb.gmra.mxu3 %vm1691_vm3, %v2111_v5 }
 0xa00   :  { %v2114_v25 = vpop.f32.mrf.mxu1 }
 0xa01   :  { %5182 = vmatmul.msk.f32.gmra.mxu3 %vm1691_vm3, %v2114_v25 }
 0xa04   :  { %v2268_v20 = vpop.f32.mrf.mxu2 }
 0xa05   :  { %5189 = vmatmul.msk.f32.vlgmr.msra.gmra.mxu1 %vm1691_vm3, %v2268_v20 }
 0xa09   :  { %5193 = vmatmul.msk.f32.vlgmr.msra.gmra.mxu3 %vm1691_vm3, %v2306_v23 }
 0xa0c   :  { %v2271_v60 = vpop.f32.mrf.mxu2 }
 0xa0d   :  { %5190 = vmatmul.msk.f32.gmra.mxu1 %vm1691_vm3, %v2271_v60 }
 0xa11   :  { %5194 = vmatmul.msk.f32.gmra.mxu3 %vm1691_vm3, %v2308_v28 }
 0xa15   :  { %5201 = vmatmul.msk.f32.vlgmr.msrb.gmra.mxu1 %vm1691_vm3, %v2463_v30 }
 0xa1d   :  { %5202 = vmatmul.msk.f32.gmra.mxu1 %vm1691_vm3, %v2465_v12 }
 0xa7c   :  { %v6988_v38 = vpop.f32.mrf.mxu3 }
 0xa82   :  { %v6990_v24 = vpop.f32.mrf.mxu1 }
 0xa84   :  { %v6992_v39 = vpop.f32.mrf.mxu3 }
 0xa8a   :  { %v6994_v42 = vpop.f32.mrf.mxu1 }
 0xa8c   :  { %v2338_v22 = vpop.f32.mrf.mxu3 }
 0xa8d   :  { %v2344_v58 = vmul.f32 0.35355338, %v2338_v22 }
 0xa8f   :  { %v2346_v34 = vadd.f32 %v2344_v58, %v6827_v13 }
 0xa91   :  { %v2348_v33 = vsel %vm1727_vm4, %v2346_v34, -inf }
 0xa92   :  { %2349 = vmax.xlane.f32.xlu0 %v2348_v33  ;;  %v2495_v46 = vpop.f32.mrf.mxu1 }
 0xa93   :  { %v2501_v51 = vmul.f32 0.35355338, %v2495_v46 }
 0xa94   :  { %v2341_v4 = vpop.f32.mrf.mxu3 }
 0xa95   :  { %v2345_v41 = vmul.f32 0.35355338, %v2341_v4  ;;  %v2503_v29 = vadd.f32 %v2501_v51, %v6827_v13 }
 0xa97   :  { %v2347_v53 = vadd.f32 %v2345_v41, %v6822_v2  ;;  %v2505_v57 = vsel %vm1727_vm4, %v2503_v29, -inf }
 0xa98   :  { %2506 = vmax.xlane.f32.xlu1 %v2505_v57 }
 0xa99   :  { %v2351_v37 = vsel %vm1727_vm4, %v2347_v53, -inf }
 0xa9a   :  { %2352 = vmax.xlane.f32.xlu2 %v2351_v37  ;;  %v2498_v52 = vpop.f32.mrf.mxu1 }
 0xa9b   :  { %v2502_v55 = vmul.f32 0.35355338, %v2498_v52  ;;  %v1682_v52 = vld [vmem:[%s7989_s16 + $0x28] sm:$0xff] }
 0xa9d   :  { %v2504_v56 = vadd.f32 %v2502_v55, %v6822_v2 }
 0xa9f   :  { %v2508_v59 = vsel %vm1727_vm4, %v2504_v56, -inf }
 0xaa0   :  { %2509 = vmax.xlane.f32.xlu0 %v2508_v59 }
 0xb05   :  { %v2350_v61 = vpop.xlane.xlu0 %2349 }
 0xb06   :  { %v2354_v36 = vsub.f32 %v2346_v34, %v2350_v61 }
 0xb08   :  { %v2356_v49 = vmul.f32 1.442695, %v2354_v36 }
 0xb0a   :  { %5588 = vpow2.f32 %v2356_v49 }
 0xb0b   :  { %v2507_v13 = vpop.xlane.xlu1 %2506 }
 0xb0c   :  { %v2511_v45 = vsub.f32 %v2503_v29, %v2507_v13 }
 0xb0d   :  { %v2353_v0 = vpop.xlane.xlu2 %2352 }
 0xb0e   :  { %v2355_v21 = vsub.f32 %v2347_v53, %v2353_v0  ;;  %v2513_v6 = vmul.f32 1.442695, %v2511_v45 }
 0xb10   :  { %v7004_v19 = vpop.eup %5588  ;;  %v2358_v10 = vmul.f32 1.442695, %v2355_v21  ;;  %5590 = vpow2.f32 %v2513_v6 }
 0xb11   :  { %v2360_v31 = vsel %vm1727_vm4, %v7004_v19, 0.0 }
 0xb12   :  { %5592 = vpow2.f32 %v2358_v10  ;;  %2361 = vadd.xlane.f32.xlu1 %v2360_v31 }
 0xb13   :  { %v2510_v2 = vpop.xlane.xlu0 %2509 }
 0xb14   :  { %v2512_v32 = vsub.f32 %v2504_v56, %v2510_v2 }
 0xb16   :  { %v7008_v7 = vpop.eup %5590  ;;  %v2515_v3 = vmul.f32 1.442695, %v2512_v32 }
 0xb17   :  { %v2517_v27 = vsel %vm1727_vm4, %v7008_v7, 0.0 }
 0xb18   :  { %v7010_v54 = vpop.eup %5592  ;;  %5594 = vpow2.f32 %v2515_v3  ;;  %2518 = vadd.xlane.f32.xlu2 %v2517_v27 }
 0xb19   :  { %v2363_v15 = vsel %vm1727_vm4, %v7010_v54, 0.0 }
 0xb1a   :  { %2364 = vadd.xlane.f32.xlu0 %v2363_v15 }
 0xb1e   :  { %v7016_v9 = vpop.eup %5594 }
 0xb1f   :  { %v2520_v63 = vsel %vm1727_vm4, %v7016_v9, 0.0 }
 0xb20   :  { %2521 = vadd.xlane.f32.xlu1 %v2520_v63 }
 0xb2e   :  { %5429 = vrot.lane.b32.xlu0 %v6839_v14, %s8011_s1 }
 0xb30   :  { %5424 = vrot.lane.b32.xlu2 %v6839_v14, %s8021_s9 }
 0xb36   :  { %2623 = vrot.lane.b32.xlu0 %v6791_v44, %s8009_s11 }
 0xb38   :  { %2619 = vrot.lane.b32.xlu2 %v6791_v44, %s8017_s8 }
 0xb39   :  { %2625 = vrot.lane.b32.xlu1 %v6795_v48, %s8009_s11  ;;  %s8059_s11 = smov 104  }
 0xb3e   :  { %2780 = vrot.lane.b32.xlu0 %v6791_v44, %s8013_s0 }
 0xb40   :  { %2621 = vrot.lane.b32.xlu2 %v6795_v48, %s8017_s8 }
 0xb41   :  { %2782 = vrot.lane.b32.xlu1 %v6795_v48, %s8013_s0 }
 0xb46   :  { %2778 = vrot.lane.b32.xlu0 %v6795_v48, %s8019_s29 }
 0xb49   :  { %2776 = vrot.lane.b32.xlu1 %v6791_v44, %s8019_s29 }
 0xb85   :  { %v2362_v47 = vpop.xlane.xlu1 %2361 }
 0xb86   :  { %5596 = vrcp.f32 %v2362_v47  ;;  %v2377_v5 = vand.u32 2147483648, %v2362_v47  ;;  %v2375_v48 = vand.u32 2147483647, %v2362_v47  ;;  %vm2371_vm13 = vweird.f32 %v2362_v47 }
 0xb88   :  { %v2378_v60 = vor.u32 1.1754944e-38, %v2377_v5  ;;  %vm2376_vm15 = vcmp.eq.f32.partialorder %v2375_v48, 8.507059e+37 }
 0xb8b   :  { %v2519_v11 = vpop.xlane.xlu2 %2518 }
 0xb8c   :  { %v5597_v17 = vpop.eup %5596  ;;  %5598 = vrcp.f32 %v2519_v11  ;;  %v2534_v56 = vand.u32 2147483648, %v2519_v11  ;;  %vm2528_vm5 = vweird.f32 %v2519_v11  ;;  %v2532_v36 = vand.u32 2147483647, %v2519_v11 }
 0xb8d   :  { %v2367_v40 = vmul.f32 %v5597_v17, %v2362_v47  ;;  %v2365_v18 = vpop.xlane.xlu0 %2364  ;;  %vm2372_vm12 = vweird.f32 %v5597_v17 }
 0xb8e   :  { %5600 = vrcp.f32 %v2365_v18  ;;  %vm2373_vm14 = vmor %vm2371_vm13, %vm2372_vm12  ;;  %v2392_v29 = vand.u32 2147483648, %v2365_v18  ;;  %v2390_v37 = vand.u32 2147483647, %v2365_v18  ;;  %vm2386_vm2 = vweird.f32 %v2365_v18 }
 0xb8f   :  { %v2368_v62 = vsub.f32 1.0, %v2367_v40  ;;  %v2535_v6 = vor.u32 1.1754944e-38, %v2534_v56  ;;  %vm2533_vm10 = vcmp.eq.f32.partialorder %v2532_v36, 8.507059e+37 }
 0xb90   :  { %v2393_v49 = vor.u32 1.1754944e-38, %v2392_v29  ;;  %vm2391_vm9 = vcmp.eq.f32.partialorder %v2390_v37, 8.507059e+37 }
 0xb91   :  { %v2369_v25 = vmul.f32 %v5597_v17, %v2368_v62 }
 0xb92   :  { %v5599_v20 = vpop.eup %5598 }
 0xb93   :  { %v2370_v44 = vadd.f32 %v5597_v17, %v2369_v25  ;;  %v2524_v28 = vmul.f32 %v5599_v20, %v2519_v11  ;;  %v5425_v30 = vpop.permute.xlu2 %5424  ;;  %v2522_v12 = vpop.xlane.xlu1 %2521  ;;  %vm2529_vm1 = vweird.f32 %v5599_v20 }
 0xb94   :  { %v5601_v23 = vpop.eup %5600  ;;  %v5426_v46 = vunpack.i.l.bf16 %v5425_v30  ;;  %5602 = vrcp.f32 %v2522_v12  ;;  %v5427_v53 = vunpack.i.h.bf16 %v5425_v30  ;;  %vm2530_vm7 = vmor %vm2528_vm5, %vm2529_vm1  ;;  %v2549_v15 = vand.u32 2147483648, %v2522_v12 }
 0xb95   :  { %v2374_v22 = vsel %vm2373_vm14, %v5597_v17, %v2370_v44  ;;  %v2382_v58 = vmul.f32 %v5601_v23, %v2365_v18  ;;  %v2525_v33 = vsub.f32 1.0, %v2524_v28  ;;  %vm2387_vm0 = vweird.f32 %v5601_v23 }
 0xb96   :  { %v2379_v34 = vsel %vm2376_vm15, %v2378_v60, %v2374_v22  ;;  %2422 = vmatpush.msrb.mxu0 %v5426_v46  ;;  %vm2388_vm6 = vmor %vm2386_vm2, %vm2387_vm0  ;;  %vm2543_vm12 = vweird.f32 %v2522_v12  ;;  %v2547_v16 = vand.u32 2147483647, %v2522_v12  ;;  %v2550_v17 = vor.u32 1.1754944e-38, %v2549_v15 }
 0xb97   :  { %v2380_v51 = vmul.f32 %v7004_v19, %v2379_v34  ;;  %v2383_v4 = vsub.f32 1.0, %v2382_v58  ;;  %v2526_v41 = vmul.f32 %v5599_v20, %v2525_v33  ;;  %v1986_v30 = vadd.f32 %v6899_v43, %v6976_v35 }
 0xb98   :  { %2423 = vmatpush.msrb.mxu0 %v5427_v53  ;;  %vm2548_vm14 = vcmp.eq.f32.partialorder %v2547_v16, 8.507059e+37  ;;  %v1989_v33 = vadd.f32 %v6901_v26, %v6978_v50 }
 0xb99   :  { %v2384_v57 = vmul.f32 %v5601_v23, %v2383_v4  ;;  %v2527_v55 = vadd.f32 %v5599_v20, %v2526_v41  ;;  %5195 = vmatmul.msk.f32.vlgmr.msrb.gmra.mxu0 %vm1727_vm4, %v2380_v51 }
 0xb9a   :  { %v5603_v61 = vpop.eup %5602  ;;  %2609 = vmatpush.msra.mxu0 %v1682_v52  ;;  %v2147_v46 = vadd.f32 %v6992_v39, %v1989_v33  ;;  %v7088_v52 = vld [vmem:[%s8053_s30 + $0x8] sm:$0xff] }
 0xb9b   :  { %v2385_v59 = vadd.f32 %v5601_v23, %v2384_v57  ;;  %v2539_v13 = vmul.f32 %v5603_v61, %v2522_v12  ;;  %v2531_v0 = vsel %vm2530_vm7, %v5599_v20, %v2527_v55  ;;  %vm2544_vm11 = vweird.f32 %v5603_v61 }
 0xb9c   :  { %v2536_v2 = vsel %vm2533_vm10, %v2535_v6, %v2531_v0  ;;  %vm2545_vm13 = vmor %vm2543_vm12, %vm2544_vm11  ;;  %v2146_v12 = vadd.f32 %v6988_v38, %v1986_v30  ;;  %v2304_v51 = vadd.f32 %v6994_v42, %v2147_v46  ;;  %v7079_v38 = vld [vmem:[%s8053_s30] sm:$0xff] }
 0xb9d   :  { %v2389_v45 = vsel %vm2388_vm6, %v5601_v23, %v2385_v59  ;;  %v2540_v19 = vsub.f32 1.0, %v2539_v13  ;;  %v2537_v47 = vmul.f32 %v7008_v7, %v2536_v2 }
 0xb9e   :  { %v2394_v21 = vsel %vm2391_vm9, %v2393_v49, %v2389_v45  ;;  %v2303_v22 = vadd.f32 %v6990_v24, %v2146_v12 }
 0xb9f   :  { %v2395_v10 = vmul.f32 %v7010_v54, %v2394_v21  ;;  %v2541_v32 = vmul.f32 %v5603_v61, %v2540_v19 }
 0xba0   :  { %v5430_v31 = vpop.permute.xlu0 %5429 }
 0xba1   :  { %v5431_v3 = vunpack.i.l.bf16 %v5430_v31  ;;  %v2542_v27 = vadd.f32 %v5603_v61, %v2541_v32  ;;  %v5432_v63 = vunpack.i.h.bf16 %v5430_v31  ;;  %5196 = vmatmul.msk.f32.gmra.mxu0 %vm1727_vm4, %v2395_v10 }
 0xba3   :  { %2579 = vmatpush.msrb.mxu3 %v5431_v3  ;;  %v2546_v54 = vsel %vm2545_vm13, %v5603_v61, %v2542_v27 }
 0xba4   :  { %v2551_v11 = vsel %vm2548_vm14, %v2550_v17, %v2546_v54 }
 0xba5   :  { %2580 = vmatpush.msrb.mxu3 %v5432_v63  ;;  %v2552_v18 = vmul.f32 %v7016_v9, %v2551_v11  ;;  %v2620_v9 = vpop.permute.xlu2 %2619 }
 0xba6   :  { %5203 = vmatmul.msk.f32.vlgmr.msrb.gmra.mxu3 %vm1727_vm4, %v2537_v47 }
 0xba8   :  { %v2624_v62 = vpop.permute.xlu0 %2623 }
 0xbab   :  { %v2626_v40 = vpop.permute.xlu1 %2625 }
 0xbac   :  { %5207 = vmatpush.xpose.msk.msrb.mxu2 %vm1691_vm3, %v2626_v40 }
 0xbad   :  { %v2622_v44 = vpop.permute.xlu2 %2621 }
 0xbae   :  { %5204 = vmatmul.msk.f32.gmra.mxu3 %vm1727_vm4, %v2552_v18 }
 0xbb0   :  { %5208 = vmatpush.xpose.msk.msrb.mxu2 %vm1691_vm3, %v2624_v62  ;;  %v2781_v5 = vpop.permute.xlu0 %2780 }
 0xbb3   :  { %v2783_v7 = vpop.permute.xlu1 %2782 }
 0xbb4   :  { %5215 = vmatpush.xpose.msk.msrb.mxu0 %vm1691_vm3, %v2783_v7 }
 0xbb8   :  { %5216 = vmatpush.xpose.msk.msrb.mxu0 %vm1691_vm3, %v2781_v5  ;;  %v2779_v28 = vpop.permute.xlu0 %2778 }
 0xbbb   :  { %v2777_v60 = vpop.permute.xlu1 %2776 }
 0xc16   :  { %v2425_v25 = vpop.f32.mrf.mxu0 }
 0xc17   :  { %5197 = vmatmul.msk.f32.vlgmr.msra.gmra.mxu2 %vm1691_vm3, %v2425_v25 }
 0xc1e   :  { %v2428_v48 = vpop.f32.mrf.mxu0 }
 0xc1f   :  { %5198 = vmatmul.msk.f32.gmra.mxu2 %vm1691_vm3, %v2428_v48 }
 0xc27   :  { %5209 = vmatmul.msk.f32.vlgmr.msrb.gmra.mxu2 %vm1691_vm3, %v2620_v9 }
 0xc29   :  { %v2582_v20 = vpop.f32.mrf.mxu3 }
 0xc2a   :  { %5205 = vmatmul.msk.f32.vlgmr.msra.gmra.mxu0 %vm1691_vm3, %v2582_v20 }
 0xc2f   :  { %5210 = vmatmul.msk.f32.gmra.mxu2 %vm1691_vm3, %v2622_v44 }
 0xc31   :  { %v2585_v23 = vpop.f32.mrf.mxu3 }
 0xc32   :  { %5206 = vmatmul.msk.f32.gmra.mxu0 %vm1691_vm3, %v2585_v23 }
 0xc3a   :  { %5217 = vmatmul.msk.f32.vlgmr.msrb.gmra.mxu0 %vm1691_vm3, %v2777_v60 }
 0xc42   :  { %5218 = vmatmul.msk.f32.gmra.mxu0 %vm1691_vm3, %v2779_v28 }
 0xc9a   :  { %v2454_v58 = vpop.f32.mrf.mxu2 }
 0xc9b   :  { %v2460_v34 = vadd.f32 %v2454_v58, %v2303_v22 }
 0xca2   :  { %v2457_v4 = vpop.f32.mrf.mxu2 }
 0xca3   :  { %v2461_v41 = vadd.f32 %v2457_v4, %v2304_v51 }
 0xca7   :  { %v2611_v29 = vpop.f32.mrf.mxu0 }
 0xca8   :  { %v7074_v53 = vadd.f32 %v2611_v29, %v2460_v34 }
 0xcaa   :  { %v2652_v57 = vpop.f32.mrf.mxu2 }
 0xcab   :  { %v2658_v43 = vmul.f32 0.35355338, %v2652_v57 }
 0xcad   :  { %v2660_v24 = vadd.f32 %v7079_v38, %v2658_v43 }
 0xcaf   :  { %v2614_v35 = vpop.f32.mrf.mxu0  ;;  %v2662_v50 = vsel %vm1727_vm4, %v2660_v24, -inf }
 0xcb0   :  { %v7082_v26 = vadd.f32 %v2614_v35, %v2461_v41  ;;  %2663 = vmax.xlane.f32.xlu2 %v2662_v50 }
 0xcb2   :  { %v2655_v39 = vpop.f32.mrf.mxu2 }
 0xcb3   :  { %v2659_v42 = vmul.f32 0.35355338, %v2655_v39 }
 0xcb5   :  { %v2661_v55 = vadd.f32 %v7088_v52, %v2659_v42 }
 0xcb7   :  { %v2809_v37 = vpop.f32.mrf.mxu0  ;;  %v2665_v59 = vsel %vm1727_vm4, %v2661_v55, -inf }
 0xcb8   :  { %v2815_v56 = vmul.f32 0.35355338, %v2809_v37  ;;  %2666 = vmax.xlane.f32.xlu0 %v2665_v59 }
 0xcba   :  { %v2817_v61 = vadd.f32 %v7079_v38, %v2815_v56 }
 0xcbc   :  { %v2819_v36 = vsel %vm1727_vm4, %v2817_v61, -inf }
 0xcbd   :  { %2820 = vmax.xlane.f32.xlu1 %v2819_v36 }
 0xcbf   :  { %v2812_v49 = vpop.f32.mrf.mxu0 }
 0xcc0   :  { %v2816_v13 = vmul.f32 0.35355338, %v2812_v49 }
 0xcc2   :  { %v2818_v45 = vadd.f32 %v7088_v52, %v2816_v13 }
 0xcc4   :  { %v2822_v0 = vsel %vm1727_vm4, %v2818_v45, -inf }
 0xcc5   :  { %2823 = vmax.xlane.f32.xlu2 %v2822_v0 }
 0xd23   :  { %v2664_v21 = vpop.xlane.xlu2 %2663 }
 0xd24   :  { %v2668_v6 = vsub.f32 %v2660_v24, %v2664_v21 }
 0xd26   :  { %v2670_v19 = vmul.f32 1.442695, %v2668_v6 }
 0xd28   :  { %5604 = vpow2.f32 %v2670_v19 }
 0xd2b   :  { %v2667_v10 = vpop.xlane.xlu0 %2666 }
 0xd2c   :  { %v2669_v31 = vsub.f32 %v2661_v55, %v2667_v10 }
 0xd2e   :  { %v7096_v2 = vpop.eup %5604  ;;  %v2672_v32 = vmul.f32 1.442695, %v2669_v31 }
 0xd2f   :  { %v2674_v27 = vsel %vm1727_vm4, %v7096_v2, 0.0 }
 0xd30   :  { %v2821_v3 = vpop.xlane.xlu1 %2820  ;;  %5606 = vpow2.f32 %v2672_v32  ;;  %2675 = vadd.xlane.f32.xlu1 %v2674_v27 }
 0xd31   :  { %v2825_v15 = vsub.f32 %v2817_v61, %v2821_v3 }
 0xd33   :  { %v2827_v63 = vmul.f32 1.442695, %v2825_v15 }
 0xd35   :  { %5608 = vpow2.f32 %v2827_v63 }
 0xd36   :  { %v7100_v47 = vpop.eup %5606 }
 0xd37   :  { %v2677_v54 = vsel %vm1727_vm4, %v7100_v47, 0.0 }
 0xd38   :  { %v2824_v16 = vpop.xlane.xlu2 %2823  ;;  %2678 = vadd.xlane.f32.xlu2 %v2677_v54 }
 0xd39   :  { %v2826_v17 = vsub.f32 %v2818_v45, %v2824_v16 }
 0xd3b   :  { %v5609_v11 = vpop.eup %5608  ;;  %v2829_v40 = vmul.f32 1.442695, %v2826_v17 }
 0xd3c   :  { %v2831_v18 = vsel %vm1727_vm4, %v5609_v11, 0.0 }
 0xd3d   :  { %5610 = vpow2.f32 %v2829_v40  ;;  %2832 = vadd.xlane.f32.xlu0 %v2831_v18 }
 0xd43   :  { %v7105_v62 = vpop.eup %5610 }
 0xd44   :  { %v2834_v7 = vsel %vm1727_vm4, %v7105_v62, 0.0 }
 0xd45   :  { %2835 = vadd.xlane.f32.xlu1 %v2834_v7  ;;  %v1683_v7 = vld [vmem:[%s7989_s16 + $0x30] sm:$0xff] }
 0xd46   :  { %2766 = vmatpush.msra.mxu3 %v1683_v7 }
 0xd50   :  { %5439 = vrot.lane.b32.xlu2 %v6839_v14, %s8019_s29  ;;  %s8061_s29 = smov 96  }
 0xd51   :  { %5434 = vrot.lane.b32.xlu0 %v6839_v14, %s8017_s8  ;;  %s8070_s8 = sld [smem:[#allocation7_spill]] }
 0xda3   :  { %v2676_v5 = vpop.xlane.xlu1 %2675 }
 0xda4   :  { %5612 = vrcp.f32 %v2676_v5  ;;  %vm2685_vm1 = vweird.f32 %v2676_v5  ;;  %v2691_v29 = vand.u32 2147483648, %v2676_v5  ;;  %v2689_v35 = vand.u32 2147483647, %v2676_v5 }
 0xda6   :  { %v2692_v56 = vor.u32 1.1754944e-38, %v2691_v29  ;;  %vm2690_vm9 = vcmp.eq.f32.partialorder %v2689_v35, 8.507059e+37 }
 0xdaa   :  { %v5613_v25 = vpop.eup %5612 }
 0xdab   :  { %v7113_v48 = vpop.xlane.xlu2 %2678  ;;  %v2681_v9 = vmul.f32 %v5613_v25, %v2676_v5  ;;  %vm2686_vm15 = vweird.f32 %v5613_v25  ;;  %v1684_v5 = vld [vmem:[%s7989_s16 + $0x38] sm:$0xff] }
 0xdac   :  { %5614 = vrcp.f32 %v7113_v48  ;;  %vm7120_vm2 = vmor %vm2685_vm1, %vm2686_vm15  ;;  %v2706_v31 = vand.u32 2147483648, %v7113_v48  ;;  %vm2700_vm13 = vweird.f32 %v7113_v48  ;;  %v2704_v15 = vand.u32 2147483647, %v7113_v48 }
 0xdad   :  { %v2682_v44 = vsub.f32 1.0, %v2681_v9 }
 0xdae   :  { %vm2705_vm1 = vcmp.eq.f32.partialorder %v2704_v15, 8.507059e+37  ;;  %v3005_v15 = vld [vmem:[%s7993_s20 + $0x8] sm:$0xff] }
 0xdaf   :  { %v2683_v12 = vmul.f32 %v5613_v25, %v2682_v44 }
 0xdb0   :  { %v2833_v20 = vpop.xlane.xlu0 %2832 }
 0xdb1   :  { %5616 = vrcp.f32 %v2833_v20  ;;  %v2848_v46 = vand.u32 2147483648, %v2833_v20  ;;  %v2684_v51 = vadd.f32 %v5613_v25, %v2683_v12  ;;  %v2846_v41 = vand.u32 2147483647, %v2833_v20 }
 0xdb2   :  { %v7116_v60 = vpop.eup %5614  ;;  %vm2842_vm5 = vweird.f32 %v2833_v20 }
 0xdb3   :  { %v5440_v23 = vpop.permute.xlu2 %5439  ;;  %v2696_v34 = vmul.f32 %v7116_v60, %v7113_v48  ;;  %v2849_v39 = vor.u32 1.1754944e-38, %v2848_v46  ;;  %v2688_v42 = vsel %vm7120_vm2, %v5613_v25, %v2684_v51  ;;  %vm2847_vm7 = vcmp.eq.f32.partialorder %v2846_v41, 8.507059e+37 }
 0xdb4   :  { %v5441_v28 = vunpack.i.l.bf16 %v5440_v23  ;;  %v5442_v58 = vunpack.i.h.bf16 %v5440_v23  ;;  %v2693_v13 = vsel %vm2690_vm9, %v2692_v56, %v2688_v42  ;;  %vm2701_vm11 = vweird.f32 %v7116_v60  ;;  %v5483_v23 = vld [vmem:[%s7990_s17] ss:$0 sm:$0xff] }
 0xdb5   :  { %v2697_v57 = vsub.f32 1.0, %v2696_v34  ;;  %v2694_v27 = vmul.f32 %v7096_v2, %v2693_v13  ;;  %vm2702_vm15 = vmor %vm2700_vm13, %vm2701_vm11  ;;  %v5747_v51 = vmov 64.0   ;;  %v3014_v13 = vld [vmem:[%s7993_s20 + $0x50] sm:$0xff] }
 0xdb6   :  { %2893 = vmatpush.msra.mxu2 %v5441_v28 }
 0xdb7   :  { %v5617_v30 = vpop.eup %5616  ;;  %v2698_v59 = vmul.f32 %v7116_v60, %v2697_v57 }
 0xdb8   :  { %v2838_v22 = vmul.f32 %v5617_v30, %v2833_v20  ;;  %v2836_v14 = vpop.xlane.xlu1 %2835  ;;  %2894 = vmatpush.msra.mxu2 %v5442_v58  ;;  %vm2843_vm0 = vweird.f32 %v5617_v30 }
 0xdb9   :  { %5618 = vrcp.f32 %v2836_v14  ;;  %vm2844_vm6 = vmor %vm2842_vm5, %vm2843_vm0  ;;  %v2863_v45 = vand.u32 2147483648, %v2836_v14  ;;  %v2861_v6 = vand.u32 2147483647, %v2836_v14  ;;  %v2699_v10 = vadd.f32 %v7116_v60, %v2698_v59  ;;  %v3018_v59 = vld [vmem:[%s7993_s20 + $0x70] sm:$0xff] }
 0xdba   :  { %v2839_v33 = vsub.f32 1.0, %v2838_v22  ;;  %vm2857_vm12 = vweird.f32 %v2836_v14  ;;  %5620 = vrcp.f32 %v5747_v51  ;;  %3040 = vmatpush.msrb.mxu3 %v3018_v59 }
 0xdbb   :  { %v2864_v63 = vor.u32 1.1754944e-38, %v2863_v45  ;;  %vm2862_vm0 = vcmp.eq.f32.partialorder %v2861_v6, 8.507059e+37  ;;  %v2703_v17 = vsel %vm2702_vm15, %v7116_v60, %v2699_v10  ;;  %v3015_v45 = vld [vmem:[%s7993_s20 + $0x58] sm:$0xff]  ;;  %v3010_v6 = vld [vmem:[%s7993_s20 + $0x30] sm:$0xff]  ;;  %v3008_v10 = vld [vmem:[%s7993_s20 + $0x20] sm:$0xff] }
 0xdbc   :  { %v2840_v4 = vmul.f32 %v5617_v30, %v2839_v33 }
 0xdbe   :  { %v2841_v24 = vadd.f32 %v5617_v30, %v2840_v4 }
 0xdbf   :  { %v5619_v50 = vpop.eup %5618 }
 0xdc0   :  { %v2845_v37 = vsel %vm2844_vm6, %v5617_v30, %v2841_v24  ;;  %v2853_v55 = vmul.f32 %v5619_v50, %v2836_v14  ;;  %vm2858_vm10 = vweird.f32 %v5619_v50  ;;  %v5621_v4 = vpop.eup %5620 }
 0xdc1   :  { %v2850_v61 = vsel %vm2847_vm7, %v2849_v39, %v2845_v37  ;;  %vm2859_vm14 = vmor %vm2857_vm12, %vm2858_vm10  ;;  %v2950_v41 = vmul.f32 64.0, %v5621_v4  ;;  %vm2954_vm2 = vweird.f32 %v5621_v4 }
 0xdc2   :  { %v2851_v36 = vmul.f32 %v5609_v11, %v2850_v61  ;;  %v2854_v49 = vsub.f32 1.0, %v2853_v55  ;;  %v2707_v11 = vor.u32 1.1754944e-38, %v2706_v31  ;;  %v3019_v61 = vld [vmem:[%s7993_s20 + $0x78] sm:$0xff]  ;;  %v3009_v31 = vld [vmem:[%s7993_s20 + $0x28] sm:$0xff] }
 0xdc3   :  { %v5435_v0 = vpop.permute.xlu0 %5434  ;;  %v2951_v29 = vsub.f32 1.0, %v2950_v41  ;;  %3063 = vmatpush.msra.mxu0 %v3019_v61  ;;  %v3089_v41 = vld [vmem:[%s7995_s22 + $0x38] sm:$0xff] }
 0xdc4   :  { %v2855_v21 = vmul.f32 %v5619_v50, %v2854_v49  ;;  %v5436_v19 = vunpack.i.l.bf16 %v5435_v0  ;;  %5219 = vmatmul.msk.f32.vlgmr.msra.gmra.mxu2 %vm1727_vm4, %v2851_v36  ;;  %v5437_v3 = vunpack.i.h.bf16 %v5435_v0  ;;  %v2708_v2 = vsel %vm2705_vm1, %v2707_v11, %v2703_v17  ;;  %v3016_v36 = vld [vmem:[%s7993_s20 + $0x60] sm:$0xff]  ;;  %v3017_v49 = vld [vmem:[%s7993_s20 + $0x68] sm:$0xff]  ;;  %v3113_v17 = vld [vmem:[%s7995_s22 + $0xf8] sm:$0xff] }
 0xdc5   :  { %v2709_v18 = vmul.f32 %v7100_v47, %v2708_v2  ;;  %3041 = vmatpush.msrb.mxu3 %v3016_v36  ;;  %3064 = vmatpush.msra.mxu0 %v3017_v49  ;;  %v3012_v0 = vld [vmem:[%s7993_s20 + $0x40] sm:$0xff]  ;;  %v3112_v11 = vld [vmem:[%s7995_s22 + $0xf0] sm:$0xff] }
 0xdc6   :  { %v2856_v32 = vadd.f32 %v5619_v50, %v2855_v21  ;;  %2736 = vmatpush.msra.mxu1 %v5436_v19  ;;  %v3013_v21 = vld [vmem:[%s7993_s20 + $0x48] sm:$0xff]  ;;  %v3011_v19 = vld [vmem:[%s7993_s20 + $0x38] sm:$0xff]  ;;  %v3096_v2 = vld [vmem:[%s7995_s22 + $0x70] sm:$0xff] }
 0xdc7   :  { %3042 = vmatpush.msrb.mxu3 %v3014_v13  ;;  %3065 = vmatpush.msra.mxu0 %v3015_v45 }
 0xdc8   :  { %2737 = vmatpush.msra.mxu1 %v5437_v3  ;;  %v2860_v16 = vsel %vm2859_vm14, %v5619_v50, %v2856_v32  ;;  %v3006_v32 = vld [vmem:[%s7993_s20 + $0x10] sm:$0xff]  ;;  %v3007_v3 = vld [vmem:[%s7993_s20 + $0x18] sm:$0xff] }
 0xdc9   :  { %5211 = vmatmul.msk.f32.vlgmr.msra.gmra.mxu1 %vm1727_vm4, %v2694_v27  ;;  %v2865_v54 = vsel %vm2862_vm0, %v2864_v63, %v2860_v16  ;;  %3043 = vmatpush.msrb.mxu3 %v3012_v0  ;;  %v3004_v27 = vld [vmem:[%s7993_s20] sm:$0xff] }
 0xdca   :  { %v2866_v40 = vmul.f32 %v7105_v62, %v2865_v54  ;;  %2923 = vmatpush.msrb.mxu1 %v1684_v5  ;;  %3066 = vmatpush.msra.mxu0 %v3013_v21  ;;  %v3095_v5 = vld [vmem:[%s7995_s22 + $0x68] sm:$0xff] }
 0xdcb   :  { %3044 = vmatpush.msrb.mxu3 %v3010_v6  ;;  %v3087_v21 = vld [vmem:[%s7995_s22 + $0x28] sm:$0xff]  ;;  %v3100_v6 = vld [vmem:[%s7995_s22 + $0x90] sm:$0xff] }
 0xdcc   :  { %5220 = vmatmul.msk.f32.gmra.mxu2 %vm1727_vm4, %v2866_v40  ;;  %3067 = vmatpush.msra.mxu0 %v3011_v19  ;;  %v3097_v40 = vld [vmem:[%s7995_s22 + $0x78] sm:$0xff]  ;;  %v3086_v19 = vld [vmem:[%s7995_s22 + $0x20] sm:$0xff] }
 0xdcd   :  { %3045 = vmatpush.msrb.mxu3 %v3008_v10  ;;  %3141 = vmatpush.msra.mxu1 %v3113_v17  ;;  %v3085_v10 = vld [vmem:[%s7995_s22 + $0x18] sm:$0xff] }
 0xdce   :  { %3068 = vmatpush.msra.mxu0 %v3009_v31  ;;  %3118 = vmatpush.msrb.mxu2 %v3097_v40  ;;  %v3098_v31 = vld [vmem:[%s7995_s22 + $0x80] sm:$0xff] }
 0xdcf   :  { %3046 = vmatpush.msrb.mxu3 %v3006_v32  ;;  %3142 = vmatpush.msra.mxu1 %v3112_v11  ;;  %v3084_v32 = vld [vmem:[%s7995_s22 + $0x10] sm:$0xff] }
 0xdd0   :  { %3069 = vmatpush.msra.mxu0 %v3007_v3  ;;  %3119 = vmatpush.msrb.mxu2 %v3096_v2  ;;  %v3083_v3 = vld [vmem:[%s7995_s22 + $0x8] sm:$0xff] }
 0xdd1   :  { %5212 = vmatmul.msk.f32.gmra.mxu1 %vm1727_vm4, %v2709_v18  ;;  %3047 = vmatpush.msrb.mxu3 %v3004_v27  ;;  %v3111_v18 = vld [vmem:[%s7995_s22 + $0xe8] sm:$0xff]  ;;  %v3082_v27 = vld [vmem:[%s7995_s22] sm:$0xff] }
 0xdd2   :  { %3070 = vmatpush.msra.mxu0 %v3005_v15  ;;  %3143 = vmatpush.msra.mxu1 %v3111_v18  ;;  %v3020_v15 = vld [vmem:[%s7994_s21] sm:$0x3] }
 0xdd3   :  { %3120 = vmatpush.msrb.mxu2 %v3095_v5  ;;  %v3022_v11 = vperm.slane %v3020_v15, 0 }
 0xe46   :  { %v2739_v25 = vpop.f32.mrf.mxu1 }
 0xe47   :  { %5213 = vmatmul.msk.f32.vlgmr.msra.gmra.mxu3 %vm1691_vm3, %v2739_v25  ;;  %v2896_v62 = vpop.f32.mrf.mxu2 }
 0xe48   :  { %5221 = vmatmul.msk.f32.vlgmr.msrb.gmra.mxu1 %vm1691_vm3, %v2896_v62  ;;  %v3110_v62 = vld [vmem:[%s7995_s22 + $0xe0] sm:$0xff] }
 0xe49   :  { %3144 = vmatpush.msra.mxu1 %v3110_v62 }
 0xe4e   :  { %v2742_v48 = vpop.f32.mrf.mxu1 }
 0xe4f   :  { %5214 = vmatmul.msk.f32.gmra.mxu3 %vm1691_vm3, %v2742_v48  ;;  %v2899_v47 = vpop.f32.mrf.mxu2  ;;  %v3094_v48 = vld [vmem:[%s7995_s22 + $0x60] sm:$0xff] }
 0xe50   :  { %5222 = vmatmul.msk.f32.gmra.mxu1 %vm1691_vm3, %v2899_v47  ;;  %3121 = vmatpush.msrb.mxu2 %v3094_v48 }
 0xec5   :  { %v2925_v9 = vpop.f32.mrf.mxu1 }
 0xeca   :  { %v2768_v20 = vpop.f32.mrf.mxu3 }
 0xecb   :  { %v2774_v44 = vadd.f32 %v2768_v20, %v7074_v53  ;;  %v3109_v20 = vld [vmem:[%s7995_s22 + $0xd8] sm:$0xff] }
 0xecc   :  { %3145 = vmatpush.msra.mxu1 %v3109_v20 }
 0xecd   :  { %v2931_v60 = vadd.f32 %v2925_v9, %v2774_v44  ;;  %v2928_v14 = vpop.f32.mrf.mxu1 }
 0xecf   :  { %v2937_v28 = vadd.f32 %v5483_v23, %v2931_v60  ;;  %v3108_v60 = vld [vmem:[%s7995_s22 + $0xd0] sm:$0xff] }
 0xed0   :  { %3146 = vmatpush.msra.mxu1 %v3108_v60 }
 0xed1   :  { %v2939_v30 = vadd.f32 %v2937_v28, %v6773_v1  ;;  %v2952_v1 = vmul.f32 %v5621_v4, %v2951_v29  ;;  %v5484_v29 = vld [vmem:[%s7991_s18] ss:$0 sm:$0xff] }
 0xed2   :  { %v2771_v12 = vpop.f32.mrf.mxu3 }
 0xed3   :  { %v2775_v22 = vadd.f32 %v2771_v12, %v7082_v26  ;;  %v2943_v58 = vsel %vm773_vm8, %v2939_v30, 0.0  ;;  %v2953_v57 = vadd.f32 %v5621_v4, %v2952_v1  ;;  %v3107_v12 = vld [vmem:[%s7995_s22 + $0xc8] sm:$0xff]  ;;  %v3104_v1 = vld [vmem:[%s7995_s22 + $0xb0] sm:$0xff] }
 0xed4   :  { %2944 = vadd.xlane.f32.xlu1 %v2943_v58  ;;  %v3091_v58 = vld [vmem:[%s7995_s22 + $0x48] sm:$0xff]  ;;  %3147 = vmatpush.msra.mxu1 %v3107_v12 }
 0xed5   :  { %v2932_v34 = vadd.f32 %v2928_v14, %v2775_v22  ;;  %v7159_v26 = vsel %vm2954_vm2, %v5621_v4, %v2953_v57  ;;  %v3106_v14 = vld [vmem:[%s7995_s22 + $0xc0] sm:$0xff] }
 0xed6   :  { %3148 = vmatpush.msra.mxu1 %v3106_v14 }
 0xed7   :  { %v2938_v33 = vadd.f32 %v5483_v23, %v2932_v34  ;;  %v3093_v23 = vld [vmem:[%s7995_s22 + $0x58] sm:$0xff] }
 0xed8   :  { %3122 = vmatpush.msrb.mxu2 %v3093_v23 }
 0xed9   :  { %v2940_v46 = vadd.f32 %v2938_v33, %v6782_v8  ;;  %v3090_v33 = vld [vmem:[%s7995_s22 + $0x40] sm:$0xff] }
 0xedb   :  { %v2946_v53 = vsel %vm773_vm8, %v2940_v46, 0.0 }
 0xedc   :  { %2947 = vadd.xlane.f32.xlu1 %v2946_v53  ;;  %v3105_v53 = vld [vmem:[%s7995_s22 + $0xb8] sm:$0xff] }
 0xedd   :  { %3149 = vmatpush.msra.mxu1 %v3105_v53 }
 0xedf   :  { %3150 = vmatpush.msra.mxu1 %v3104_v1 }
 0xf47   :  { %v2945_v43 = vpop.xlane.xlu1 %2944 }
 0xf48   :  { %v2956_v35 = vmul.f32 %v7159_v26, %v2945_v43 }
 0xf4a   :  { %v7162_v24 = vsub.f32 %v2939_v30, %v2956_v35  ;;  %v3092_v30 = vld [vmem:[%s7995_s22 + $0x50] sm:$0xff] }
 0xf4b   :  { %3123 = vmatpush.msrb.mxu2 %v3092_v30  ;;  %v3088_v35 = vld [vmem:[%s7995_s22 + $0x30] sm:$0xff] }
 0xf4c   :  { %v2960_v8 = vmul.f32 %v7162_v24, %v7162_v24 }
 0xf4d   :  { %3124 = vmatpush.msrb.mxu2 %v3091_v58 }
 0xf4e   :  { %v2962_v50 = vsel %vm773_vm8, %v2960_v8, 0.0  ;;  %v5485_v8 = vld [vmem:[%s7992_s19] ss:$0 sm:$0xff] }
 0xf4f   :  { %2963 = vadd.xlane.f32.xlu0 %v2962_v50  ;;  %v2948_v39 = vpop.xlane.xlu1 %2947  ;;  %3125 = vmatpush.msrb.mxu2 %v3090_v33 }
 0xf50   :  { %v2957_v42 = vmul.f32 %v7159_v26, %v2948_v39  ;;  %v3103_v39 = vld [vmem:[%s7995_s22 + $0xa8] sm:$0xff] }
 0xf51   :  { %3126 = vmatpush.msrb.mxu2 %v3089_v41  ;;  %3151 = vmatpush.msra.mxu1 %v3103_v39  ;;  %v5239_v39 = vld [vmem:[%s7987_s14 + $0xe0] sm:$0xff] }
 0xf52   :  { %v7168_v37 = vsub.f32 %v2940_v46, %v2957_v42 }
 0xf53   :  { %3127 = vmatpush.msrb.mxu2 %v3088_v35 }
 0xf54   :  { %v2961_v55 = vmul.f32 %v7168_v37, %v7168_v37 }
 0xf55   :  { %3128 = vmatpush.msrb.mxu2 %v3087_v21  ;;  %v5227_v21 = vld [vmem:[%s7987_s14 + $0x80] sm:$0xff] }
 0xf56   :  { %v2965_v56 = vsel %vm773_vm8, %v2961_v55, 0.0 }
 0xf57   :  { %2966 = vadd.xlane.f32.xlu1 %v2965_v56  ;;  %v3102_v56 = vld [vmem:[%s7995_s22 + $0xa0] sm:$0xff]  ;;  %3129 = vmatpush.msrb.mxu2 %v3086_v19 }
 0xf58   :  { %3152 = vmatpush.msra.mxu1 %v3102_v56  ;;  %v5238_v56 = vld [vmem:[%s7987_s14 + $0xd8] sm:$0xff] }
 0xf59   :  { %3130 = vmatpush.msrb.mxu2 %v3085_v10 }
 0xf5b   :  { %3131 = vmatpush.msrb.mxu2 %v3084_v32 }
 0xf5d   :  { %3132 = vmatpush.msrb.mxu2 %v3083_v3 }
 0xf5f   :  { %3133 = vmatpush.msrb.mxu2 %v3082_v27 }
 0xfc2   :  { %v2964_v63 = vpop.xlane.xlu0 %2963 }
 0xfc3   :  { %v2968_v16 = vmul.f32 %v2964_v63, %v7159_v26  ;;  %v3023_v63 = vperm.slane %v3020_v15, 1 }
 0xfc5   :  { %v2970_v54 = vadd.f32 1e-05, %v2968_v16 }
 0xfc7   :  { %5622 = vrsqrt.f32 %v2970_v54  ;;  %vm2978_vm6 = vweird.f32 %v2970_v54 }
 0xfca   :  { %v2967_v7 = vpop.xlane.xlu1 %2966 }
 0xfcb   :  { %v2969_v25 = vmul.f32 %v2967_v7, %v7159_v26 }
 0xfcd   :  { %v5623_v47 = vpop.eup %5622  ;;  %v2971_v9 = vadd.f32 1e-05, %v2969_v25 }
 0xfce   :  { %v2973_v44 = vmul.f32 %v5623_v47, %v2970_v54  ;;  %vm2979_vm5 = vweird.f32 %v5623_v47 }
 0xfcf   :  { %5624 = vrsqrt.f32 %v2971_v9  ;;  %vm2980_vm7 = vmor %vm2978_vm6, %vm2979_vm5  ;;  %vm2988_vm10 = vweird.f32 %v2971_v9 }
 0xfd0   :  { %v2974_v28 = vmul.f32 %v5623_v47, %v2973_v44 }
 0xfd2   :  { %v2975_v22 = vmul.f32 0.5, %v2974_v28 }
 0xfd4   :  { %v2976_v34 = vsub.f32 1.5, %v2975_v22 }
 0xfd5   :  { %v5625_v46 = vpop.eup %5624 }
 0xfd6   :  { %v2977_v51 = vmul.f32 %v5623_v47, %v2976_v34  ;;  %v2983_v4 = vmul.f32 %v5625_v46, %v2971_v9  ;;  %vm2989_vm9 = vweird.f32 %v5625_v46  ;;  %v5486_v9 = vld [vmem:[%s7996_s23] ss:$0 sm:$0xff] }
 0xfd7   :  { %vm2990_vm11 = vmor %vm2988_vm10, %vm2989_vm9 }
 0xfd8   :  { %v2981_v57 = vsel %vm2980_vm7, %v5623_v47, %v2977_v51  ;;  %v2984_v43 = vmul.f32 %v5625_v46, %v2983_v4 }
 0xfd9   :  { %v2992_v50 = vmul.f32 %v2981_v57, %v7162_v24  ;;  %v3101_v24 = vld [vmem:[%s7995_s22 + $0x98] sm:$0xff] }
 0xfda   :  { %v2985_v42 = vmul.f32 0.5, %v2984_v43  ;;  %3153 = vmatpush.msra.mxu1 %v3101_v24  ;;  %v5233_v24 = vld [vmem:[%s7987_s14 + $0xb0] sm:$0xff] }
 0xfdb   :  { %v2997_v55 = vmul.f32 %v5484_v29, %v2992_v50  ;;  %v5242_v50 = vld [vmem:[%s7987_s14 + $0xf8] sm:$0xff] }
 0xfdc   :  { %v2986_v59 = vsub.f32 1.5, %v2985_v42  ;;  %3154 = vmatpush.msra.mxu1 %v3100_v6  ;;  %3283 = vmatpush.msrb.mxu0 %v5242_v50  ;;  %v5240_v42 = vld [vmem:[%s7987_s14 + $0xe8] sm:$0xff] }
 0xfdd   :  { %v3002_v61 = vadd.f32 %v5485_v8, %v2997_v55  ;;  %v5237_v55 = vld [vmem:[%s7987_s14 + $0xd0] sm:$0xff]  ;;  %v5228_v6 = vld [vmem:[%s7987_s14 + $0x88] sm:$0xff] }
 0xfde   :  { %v2987_v36 = vmul.f32 %v5625_v46, %v2986_v59  ;;  %3284 = vmatpush.msrb.mxu0 %v5240_v42  ;;  %v5235_v59 = vld [vmem:[%s7987_s14 + $0xc0] sm:$0xff] }
 0xfdf   :  { %5223 = vmatmul.msk.f32.vlgmr.msrb.gmra.mxu3 %vm773_vm8, %v3002_v61  ;;  %5225 = vmatmul.msk.f32.vlgmr.msra.gmra.mxu0 %vm773_vm8, %v3002_v61 }
 0xfe0   :  { %v2991_v49 = vsel %vm2990_vm11, %v5625_v46, %v2987_v36  ;;  %3285 = vmatpush.msrb.mxu0 %v5238_v56  ;;  %v5234_v36 = vld [vmem:[%s7987_s14 + $0xb8] sm:$0xff] }
 0xfe1   :  { %v2993_v13 = vmul.f32 %v2991_v49, %v7168_v37  ;;  %v3099_v37 = vld [vmem:[%s7995_s22 + $0x88] sm:$0xff]  ;;  %v5231_v49 = vld [vmem:[%s7987_s14 + $0xa0] sm:$0xff] }
 0xfe2   :  { %3155 = vmatpush.msra.mxu1 %v3099_v37 }
 0xfe3   :  { %v2998_v45 = vmul.f32 %v5484_v29, %v2993_v13  ;;  %v5232_v13 = vld [vmem:[%s7987_s14 + $0xa8] sm:$0xff] }
 0xfe4   :  { %3156 = vmatpush.msra.mxu1 %v3098_v31 }
 0xfe5   :  { %v3003_v0 = vadd.f32 %v5485_v8, %v2998_v45  ;;  %v5241_v8 = vld [vmem:[%s7987_s14 + $0xf0] sm:$0xff] }
 0xfe6   :  { %3260 = vmatpush.msra.mxu3 %v5241_v8  ;;  %v5229_v45 = vld [vmem:[%s7987_s14 + $0x90] sm:$0xff] }
 0xfe7   :  { %5224 = vmatmul.msk.f32.gmra.mxu3 %vm773_vm8, %v3003_v0  ;;  %5226 = vmatmul.msk.f32.gmra.mxu0 %vm773_vm8, %v3003_v0 }
 0xfe8   :  { %3261 = vmatpush.msra.mxu3 %v5239_v39 }
 0xfea   :  { %3262 = vmatpush.msra.mxu3 %v5237_v55 }
 0xfec   :  { %3263 = vmatpush.msra.mxu3 %v5235_v59 }
 0xfee   :  { %3264 = vmatpush.msra.mxu3 %v5233_v24 }
 0xff0   :  { %3265 = vmatpush.msra.mxu3 %v5231_v49 }
 0xff2   :  { %3266 = vmatpush.msra.mxu3 %v5229_v45 }
 0xff4   :  { %3267 = vmatpush.msra.mxu3 %v5227_v21 }
0x105c   :  { %v3072_v16 = vpop.f32.mrf.mxu0 }
0x105d   :  { %v3073_v54 = vadd.f32 %v3072_v16, %v3023_v63 }
0x105f   :  { %v3079_v17 = vmax.f32 %v3073_v54, 0.0 }
0x1061   :  { %3157 = vmatmul.f32.vlgmr.msra.gmra.mxu1 %v3079_v17 }
0x1062   :  { %v3049_v40 = vpop.f32.mrf.mxu3 }
0x1063   :  { %v3050_v2 = vadd.f32 %v3049_v40, %v3022_v11 }
0x1064   :  { %v3075_v18 = vpop.f32.mrf.mxu0 }
0x1065   :  { %v3078_v7 = vmax.f32 %v3050_v2, 0.0  ;;  %v3076_v5 = vadd.f32 %v3075_v18, %v3023_v63  ;;  %v5487_v2 = vld [vmem:[%s7997_s24] ss:$0 sm:$0xff] }
0x1067   :  { %v3081_v25 = vmax.f32 %v3076_v5, 0.0  ;;  %3134 = vmatmul.f32.vlgmr.msrb.gmra.mxu2 %v3078_v7  ;;  %v5488_v5 = vld [vmem:[%s7998_s25] ss:$0 sm:$0xff] }
0x1069   :  { %3160 = vmatmul.f32.gmra.mxu1 %v3081_v25 }
0x106a   :  { %v3052_v62 = vpop.f32.mrf.mxu3 }
0x106b   :  { %v3053_v48 = vadd.f32 %v3052_v62, %v3022_v11 }
0x106d   :  { %v3080_v47 = vmax.f32 %v3053_v48, 0.0 }
0x106f   :  { %3137 = vmatmul.f32.gmra.mxu2 %v3080_v47 }
0x10de   :  { %v3158_v20 = vpop.f32.mrf.mxu1 }
0x10e6   :  { %v3161_v58 = vpop.f32.mrf.mxu1 }
0x10ea   :  { %v3135_v44 = vpop.f32.mrf.mxu2 }
0x10eb   :  { %v3136_v23 = vadd.f32 %v5486_v9, %v3135_v44 }
0x10ed   :  { %v3159_v60 = vadd.f32 %v3158_v20, %v3136_v23 }
0x10ef   :  { %v3164_v28 = vadd.f32 %v3159_v60, %v3002_v61  ;;  %v5236_v61 = vld [vmem:[%s7987_s14 + $0xc8] sm:$0xff] }
0x10f0   :  { %3286 = vmatpush.msrb.mxu0 %v5236_v61 }
0x10f1   :  { %v3168_v30 = vsel %vm773_vm8, %v3164_v28, 0.0 }
0x10f2   :  { %3169 = vadd.xlane.f32.xlu2 %v3168_v30  ;;  %v3138_v12 = vpop.f32.mrf.mxu2  ;;  %3287 = vmatpush.msrb.mxu0 %v5234_v36 }
0x10f3   :  { %v3139_v22 = vadd.f32 %v5486_v9, %v3138_v12  ;;  %v5243_v12 = vld [vmem:[%s7988_s15 + $0x2] sm:$0x3]  ;;  %s8058_s15 = smov 40  }
0x10f4   :  { %3288 = vmatpush.msrb.mxu0 %v5232_v13 }
0x10f5   :  { %v3162_v14 = vadd.f32 %v3161_v58, %v3139_v22  ;;  %v3242_v22 = vperm.slane %v5243_v12, 0  ;;  %v3243_v58 = vperm.slane %v5243_v12, 1 }
0x10f7   :  { %v3165_v34 = vadd.f32 %v3162_v14, %v3003_v0  ;;  %v5230_v0 = vld [vmem:[%s7987_s14 + $0x98] sm:$0xff]  ;;  %s8063_s14 = smov 88  }
0x10f8   :  { %3289 = vmatpush.msrb.mxu0 %v5230_v0 }
0x10f9   :  { %v3171_v33 = vsel %vm773_vm8, %v3165_v34, 0.0 }
0x10fa   :  { %3172 = vadd.xlane.f32.xlu1 %v3171_v33  ;;  %3290 = vmatpush.msrb.mxu0 %v5228_v6  ;;  %v5248_v6 = vld [vmem:[%s7989_s16 + $0x40] sm:$0xff] }
0x1165   :  { %v3170_v46 = vpop.xlane.xlu2 %3169 }
0x1166   :  { %v3174_v53 = vmul.f32 %v3170_v46, %v7159_v26 }
0x1168   :  { %v7340_v51 = vsub.f32 %v3164_v28, %v3174_v53 }
0x116a   :  { %v3178_v4 = vmul.f32 %v7340_v51, %v7340_v51 }
0x116c   :  { %v3180_v41 = vsel %vm773_vm8, %v3178_v4, 0.0 }
0x116d   :  { %3181 = vadd.xlane.f32.xlu1 %v3180_v41  ;;  %v3173_v29 = vpop.xlane.xlu1 %3172 }
0x116e   :  { %v3175_v1 = vmul.f32 %v3173_v29, %v7159_v26 }
0x1170   :  { %v7346_v57 = vsub.f32 %v3165_v34, %v3175_v1 }
0x1172   :  { %v3179_v43 = vmul.f32 %v7346_v57, %v7346_v57 }
0x1174   :  { %v3183_v35 = vsel %vm773_vm8, %v3179_v43, 0.0 }
0x1175   :  { %3184 = vadd.xlane.f32.xlu1 %v3183_v35 }
0x11e0   :  { %v3182_v19 = vpop.xlane.xlu1 %3181 }
0x11e1   :  { %v3186_v37 = vmul.f32 %v3182_v19, %v7159_v26 }
0x11e3   :  { %v3188_v10 = vadd.f32 1e-05, %v3186_v37 }
0x11e5   :  { %5626 = vrsqrt.f32 %v3188_v10  ;;  %vm3196_vm13 = vweird.f32 %v3188_v10 }
0x11e8   :  { %v3185_v31 = vpop.xlane.xlu1 %3184 }
0x11e9   :  { %v3187_v32 = vmul.f32 %v3185_v31, %v7159_v26 }
0x11eb   :  { %v5627_v3 = vpop.eup %5626  ;;  %v3189_v27 = vadd.f32 1e-05, %v3187_v32 }
0x11ec   :  { %v3191_v15 = vmul.f32 %v5627_v3, %v3188_v10  ;;  %vm3197_vm12 = vweird.f32 %v5627_v3 }
0x11ed   :  { %5628 = vrsqrt.f32 %v3189_v27  ;;  %vm3198_vm14 = vmor %vm3196_vm13, %vm3197_vm12  ;;  %vm3206_vm0 = vweird.f32 %v3189_v27 }
0x11ee   :  { %v3192_v63 = vmul.f32 %v5627_v3, %v3191_v15 }
0x11f0   :  { %v3193_v16 = vmul.f32 0.5, %v3192_v63 }
0x11f2   :  { %v3194_v54 = vsub.f32 1.5, %v3193_v16 }
0x11f3   :  { %v5629_v17 = vpop.eup %5628 }
0x11f4   :  { %v3195_v11 = vmul.f32 %v5627_v3, %v3194_v54  ;;  %v3201_v40 = vmul.f32 %v5629_v17, %v3189_v27  ;;  %vm3207_vm15 = vweird.f32 %v5629_v17 }
0x11f5   :  { %vm3208_vm1 = vmor %vm3206_vm0, %vm3207_vm15 }
0x11f6   :  { %v3199_v18 = vsel %vm3198_vm14, %v5627_v3, %v3195_v11  ;;  %v3202_v7 = vmul.f32 %v5629_v17, %v3201_v40 }
0x11f7   :  { %v3210_v25 = vmul.f32 %v3199_v18, %v7340_v51 }
0x11f8   :  { %v3203_v62 = vmul.f32 0.5, %v3202_v7 }
0x11f9   :  { %v3215_v48 = vmul.f32 %v5487_v2, %v3210_v25 }
0x11fa   :  { %v3204_v47 = vsub.f32 1.5, %v3203_v62 }
0x11fb   :  { %v7408_v9 = vadd.f32 %v5488_v5, %v3215_v48 }
0x11fc   :  { %v3205_v20 = vmul.f32 %v5629_v17, %v3204_v47 }
0x11fd   :  { %5244 = vmatmul.msk.f32.vlgmr.msra.gmra.mxu3 %vm773_vm8, %v7408_v9  ;;  %5246 = vmatmul.msk.f32.vlgmr.msrb.gmra.mxu0 %vm773_vm8, %v7408_v9 }
0x11fe   :  { %v3209_v44 = vsel %vm3208_vm1, %v5629_v17, %v3205_v20 }
0x11ff   :  { %v3211_v23 = vmul.f32 %v3209_v44, %v7346_v57 }
0x1201   :  { %v3216_v60 = vmul.f32 %v5487_v2, %v3211_v23 }
0x1203   :  { %v7415_v28 = vadd.f32 %v5488_v5, %v3216_v60 }
0x1205   :  { %5245 = vmatmul.msk.f32.gmra.mxu3 %vm773_vm8, %v7415_v28  ;;  %5247 = vmatmul.msk.f32.gmra.mxu0 %vm773_vm8, %v7415_v28 }
0x127a   :  { %v3292_v30 = vpop.f32.mrf.mxu0 }
0x127b   :  { %v3293_v46 = vadd.f32 %v3292_v30, %v3243_v58 }
0x1280   :  { %v3269_v14 = vpop.f32.mrf.mxu3 }
0x1281   :  { %v7424_v34 = vadd.f32 %v3269_v14, %v3242_v22 }
0x1282   :  { %v3295_v33 = vpop.f32.mrf.mxu0 }
0x1283   :  { %v3296_v53 = vadd.f32 %v3295_v33, %v3243_v58  ;;  %3309 = vrot.lane.b32.xlu0 %v7424_v34, %s5733_s13 }
0x1285   :  { %3416 = vmatpush.msra.mxu0 %v3296_v53  ;;  %v7428_v51 = vpack.i.bf16 %v3293_v46, %v3296_v53 }
0x1287   :  { %3417 = vmatpush.msra.mxu0 %v3293_v46 }
0x1288   :  { %v3272_v4 = vpop.f32.mrf.mxu3 }
0x1289   :  { %v7430_v41 = vadd.f32 %v3272_v4, %v3242_v22  ;;  %3603 = vmatpush.msrb.mxu0 %v5248_v6 }
0x128b   :  { %3431 = vrot.lane.b32.xlu0 %v7430_v41, %s5734_s2  ;;  %3311 = vrot.lane.b32.xlu1 %v7430_v41, %s5733_s13  ;;  %s8066_s13 = smov 72  }
0x1293   :  { %3425 = vrot.lane.b32.xlu0 %v7424_v34, %s5732_s7 }
0x129b   :  { %3427 = vrot.lane.b32.xlu0 %v7430_v41, %s5732_s7 }
0x12a3   :  { %3617 = vrot.lane.b32.xlu0 %v7430_v41, %s5735_s5 }
0x12ab   :  { %3611 = vrot.lane.b32.xlu0 %v7424_v34, %s5736_s3 }
0x12b3   :  { %3772 = vrot.lane.b32.xlu0 %v7424_v34, %s8058_s15 }
0x12bb   :  { %3770 = vrot.lane.b32.xlu0 %v7430_v41, %s8059_s11 }
0x12f5   :  { %v3310_v29 = vpop.permute.xlu0 %3309 }
0x12fd   :  { %v3432_v1 = vpop.permute.xlu0 %3431  ;;  %v3312_v57 = vpop.permute.xlu1 %3311 }
0x12fe   :  { %5256 = vmatpush.xpose.msk.msrb.mxu3 %vm1691_vm3, %v3312_v57  ;;  %5262 = vmatpush.xpose.msk.msra.mxu2 %vm1691_vm3, %v3432_v1  ;;  %v7490_v1 = vld [vmem:[%s8053_s30] sm:$0xff] }
0x1302   :  { %5257 = vmatpush.xpose.msk.msrb.mxu3 %vm1691_vm3, %v3310_v29 }
0x1305   :  { %5258 = vmatmul.msk.f32.vlgmr.msrb.gmra.mxu3 %vm1691_vm3, %v7424_v34 }
0x130d   :  { %5259 = vmatmul.msk.f32.gmra.mxu3 %vm1691_vm3, %v7430_v41 }
0x1388   :  { %v3338_v43 = vpop.f32.mrf.mxu3 }
0x1389   :  { %v3344_v35 = vmul.f32 0.35355338, %v3338_v43 }
0x138b   :  { %v3346_v8 = vadd.f32 %v7079_v38, %v3344_v35 }
0x138d   :  { %v3348_v50 = vsel %vm1727_vm4, %v3346_v8, -inf }
0x138e   :  { %3349 = vmax.xlane.f32.xlu2 %v3348_v50 }
0x1390   :  { %v3341_v39 = vpop.f32.mrf.mxu3 }
0x1391   :  { %v3345_v42 = vmul.f32 0.35355338, %v3341_v39  ;;  %v7498_v39 = vld [vmem:[%s8053_s30 + $0x8] sm:$0xff]  ;;  %s8060_s30 = smov 32  }
0x1393   :  { %v3347_v55 = vadd.f32 %v7088_v52, %v3345_v42  ;;  %v3426_v52 = vpop.permute.xlu0 %3425 }
0x1395   :  { %v3351_v56 = vsel %vm1727_vm4, %v3347_v55, -inf }
0x1396   :  { %3352 = vmax.xlane.f32.xlu2 %v3351_v56 }
0x139b   :  { %v3428_v37 = vpop.permute.xlu0 %3427 }
0x13a3   :  { %v3618_v11 = vpop.permute.xlu0 %3617 }
0x13ab   :  { %v3612_v12 = vpop.permute.xlu0 %3611 }
0x13b3   :  { %v3773_v14 = vpop.permute.xlu0 %3772 }
0x1401   :  { %v3350_v59 = vpop.xlane.xlu2 %3349 }
0x1402   :  { %v3354_v61 = vsub.f32 %v3346_v8, %v3350_v59 }
0x1404   :  { %v3356_v24 = vmul.f32 1.442695, %v3354_v61  ;;  %v3771_v61 = vpop.permute.xlu0 %3770 }
0x1406   :  { %5630 = vpow2.f32 %v3356_v24 }
0x1409   :  { %v3353_v36 = vpop.xlane.xlu2 %3352 }
0x140a   :  { %v3355_v49 = vsub.f32 %v3347_v55, %v3353_v36 }
0x140c   :  { %v5631_v13 = vpop.eup %5630  ;;  %v3358_v45 = vmul.f32 1.442695, %v3355_v49 }
0x140d   :  { %v3360_v38 = vsel %vm1727_vm4, %v5631_v13, 0.0 }
0x140e   :  { %5632 = vpow2.f32 %v3358_v45  ;;  %3361 = vadd.xlane.f32.xlu1 %v3360_v38 }
0x1414   :  { %v5633_v0 = vpop.eup %5632 }
0x1415   :  { %v3363_v21 = vsel %vm1727_vm4, %v5633_v0, 0.0 }
0x1416   :  { %3364 = vadd.xlane.f32.xlu2 %v3363_v21 }
0x1427   :  { %3613 = vrot.lane.b32.xlu1 %v7430_v41, %s5736_s3 }
0x142e   :  { %3429 = vrot.lane.b32.xlu2 %v7424_v34, %s5734_s2 }
0x1436   :  { %3615 = vrot.lane.b32.xlu2 %v7424_v34, %s5735_s5 }
0x143e   :  { %3774 = vrot.lane.b32.xlu2 %v7430_v41, %s8058_s15  ;;  %s8064_s15 = smov 16  }
0x1446   :  { %3768 = vrot.lane.b32.xlu2 %v7424_v34, %s8059_s11 }
0x1481   :  { %v3362_v19 = vpop.xlane.xlu1 %3361 }
0x1482   :  { %5634 = vrcp.f32 %v3362_v19  ;;  %v3377_v27 = vand.u32 2147483648, %v3362_v19  ;;  %v3375_v63 = vand.u32 2147483647, %v3362_v19  ;;  %vm3371_vm5 = vweird.f32 %v3362_v19 }
0x1484   :  { %v3378_v17 = vor.u32 1.1754944e-38, %v3377_v27  ;;  %vm3376_vm7 = vcmp.eq.f32.partialorder %v3375_v63, 8.507059e+37 }
0x1488   :  { %v5635_v10 = vpop.eup %5634 }
0x1489   :  { %v3367_v31 = vmul.f32 %v5635_v10, %v3362_v19  ;;  %v3365_v32 = vpop.xlane.xlu2 %3364  ;;  %vm3372_vm2 = vweird.f32 %v5635_v10 }
0x148a   :  { %5636 = vrcp.f32 %v3365_v32  ;;  %vm3373_vm6 = vmor %vm3371_vm5, %vm3372_vm2  ;;  %v3392_v62 = vand.u32 2147483648, %v3365_v32  ;;  %v3390_v47 = vand.u32 2147483647, %v3365_v32  ;;  %vm3386_vm10 = vweird.f32 %v3365_v32 }
0x148b   :  { %v3368_v3 = vsub.f32 1.0, %v3367_v31 }
0x148c   :  { %v3393_v44 = vor.u32 1.1754944e-38, %v3392_v62  ;;  %vm3391_vm12 = vcmp.eq.f32.partialorder %v3390_v47, 8.507059e+37 }
0x148d   :  { %v3369_v15 = vmul.f32 %v5635_v10, %v3368_v3 }
0x148f   :  { %v3370_v16 = vadd.f32 %v5635_v10, %v3369_v15 }
0x1490   :  { %v5637_v54 = vpop.eup %5636 }
0x1491   :  { %v3374_v40 = vsel %vm3373_vm6, %v5635_v10, %v3370_v16  ;;  %v3382_v2 = vmul.f32 %v5637_v54, %v3365_v32  ;;  %v3430_v18 = vpop.permute.xlu2 %3429  ;;  %vm3387_vm9 = vweird.f32 %v5637_v54 }
0x1492   :  { %v3379_v7 = vsel %vm3376_vm7, %v3378_v17, %v3374_v40  ;;  %5263 = vmatpush.xpose.msk.msra.mxu2 %vm1691_vm3, %v3430_v18  ;;  %vm3388_vm11 = vmor %vm3386_vm10, %vm3387_vm9 }
0x1493   :  { %v3380_v5 = vmul.f32 %v5631_v13, %v3379_v7  ;;  %v3383_v25 = vsub.f32 1.0, %v3382_v2 }
0x1495   :  { %v3384_v48 = vmul.f32 %v5637_v54, %v3383_v25  ;;  %5260 = vmatmul.msk.f32.vlgmr.msra.gmra.mxu0 %vm1727_vm4, %v3380_v5  ;;  %5264 = vmatmul.msk.f32.vlgmr.msra.gmra.mxu2 %vm1691_vm3, %v3426_v52 }
0x1496   :  { %5272 = vmatpush.xpose.msk.msrb.mxu2 %vm1691_vm3, %v3618_v11 }
0x1497   :  { %v3385_v20 = vadd.f32 %v5637_v54, %v3384_v48 }
0x1499   :  { %v3616_v23 = vpop.permute.xlu2 %3615  ;;  %v3389_v60 = vsel %vm3388_vm11, %v5637_v54, %v3385_v20  ;;  %v3614_v33 = vpop.permute.xlu1 %3613 }
0x149a   :  { %5273 = vmatpush.xpose.msk.msrb.mxu2 %vm1691_vm3, %v3616_v23  ;;  %v3394_v30 = vsel %vm3391_vm12, %v3393_v44, %v3389_v60 }
0x149b   :  { %v3395_v22 = vmul.f32 %v5633_v0, %v3394_v30 }
0x149d   :  { %5261 = vmatmul.msk.f32.gmra.mxu0 %vm1727_vm4, %v3395_v22  ;;  %5265 = vmatmul.msk.f32.gmra.mxu2 %vm1691_vm3, %v3428_v37 }
0x14a1   :  { %v3775_v58 = vpop.permute.xlu2 %3774 }
0x14a2   :  { %5280 = vmatpush.xpose.msk.msra.mxu0 %vm1691_vm3, %v3775_v58 }
0x14a5   :  { %5274 = vmatmul.msk.f32.vlgmr.msrb.gmra.mxu2 %vm1691_vm3, %v3612_v12 }
0x14a6   :  { %5281 = vmatpush.xpose.msk.msra.mxu0 %vm1691_vm3, %v3773_v14 }
0x14a9   :  { %v3769_v50 = vpop.permute.xlu2 %3768 }
0x14ad   :  { %5275 = vmatmul.msk.f32.gmra.mxu2 %vm1691_vm3, %v3614_v33 }
0x1512   :  { %v3419_v46 = vpop.f32.mrf.mxu0 }
0x1513   :  { %5270 = vmatmul.msk.f32.vlgmr.msrb.gmra.mxu0 %vm1691_vm3, %v3419_v46 }
0x1518   :  { %v3458_v53 = vpop.f32.mrf.mxu2 }
0x1519   :  { %v3464_v4 = vmul.f32 0.35355338, %v3458_v53 }
0x151a   :  { %v3422_v29 = vpop.f32.mrf.mxu0 }
0x151b   :  { %5271 = vmatmul.msk.f32.gmra.mxu0 %vm1691_vm3, %v3422_v29  ;;  %v3466_v57 = vadd.f32 %v7490_v1, %v3464_v4 }
0x151d   :  { %v3468_v43 = vsel %vm1727_vm4, %v3466_v57, -inf }
0x151e   :  { %3469 = vmax.xlane.f32.xlu2 %v3468_v43 }
0x1520   :  { %v3461_v35 = vpop.f32.mrf.mxu2 }
0x1521   :  { %v3465_v8 = vmul.f32 0.35355338, %v3461_v35 }
0x1523   :  { %5282 = vmatmul.msk.f32.vlgmr.msra.gmra.mxu0 %vm1691_vm3, %v3769_v50  ;;  %v3467_v42 = vadd.f32 %v7498_v39, %v3465_v8 }
0x1525   :  { %v3471_v55 = vsel %vm1727_vm4, %v3467_v42, -inf }
0x1526   :  { %3472 = vmax.xlane.f32.xlu0 %v3471_v55 }
0x1528   :  { %v3644_v56 = vpop.f32.mrf.mxu2 }
0x1529   :  { %v3650_v59 = vmul.f32 0.35355338, %v3644_v56 }
0x152b   :  { %5283 = vmatmul.msk.f32.gmra.mxu0 %vm1691_vm3, %v3771_v61  ;;  %v3652_v24 = vadd.f32 %v7490_v1, %v3650_v59 }
0x152d   :  { %v3654_v36 = vsel %vm1727_vm4, %v3652_v24, -inf }
0x152e   :  { %3655 = vmax.xlane.f32.xlu1 %v3654_v36 }
0x1530   :  { %v3647_v49 = vpop.f32.mrf.mxu2 }
0x1531   :  { %v3651_v13 = vmul.f32 0.35355338, %v3647_v49 }
0x1533   :  { %v3653_v45 = vadd.f32 %v7498_v39, %v3651_v13 }
0x1535   :  { %v3657_v38 = vsel %vm1727_vm4, %v3653_v45, -inf }
0x1536   :  { %3658 = vmax.xlane.f32.xlu0 %v3657_v38 }
0x1590   :  { %v7507_v0 = vpop.f32.mrf.mxu0 }
0x1591   :  { %v3470_v21 = vpop.xlane.xlu2 %3469 }
0x1592   :  { %v3474_v52 = vsub.f32 %v3466_v57, %v3470_v21 }
0x1594   :  { %v3476_v6 = vmul.f32 1.442695, %v3474_v52 }
0x1596   :  { %5638 = vpow2.f32 %v3476_v6 }
0x1598   :  { %v7509_v19 = vpop.f32.mrf.mxu0 }
0x1599   :  { %v3473_v37 = vpop.xlane.xlu0 %3472 }
0x159a   :  { %v3475_v10 = vsub.f32 %v3467_v42, %v3473_v37 }
0x159c   :  { %v7511_v31 = vpop.eup %5638  ;;  %v3478_v32 = vmul.f32 1.442695, %v3475_v10 }
0x159d   :  { %v3480_v3 = vsel %vm1727_vm4, %v7511_v31, 0.0 }
0x159e   :  { %5640 = vpow2.f32 %v3478_v32  ;;  %3481 = vadd.xlane.f32.xlu0 %v3480_v3 }
0x15a0   :  { %v3801_v27 = vpop.f32.mrf.mxu0 }
0x15a1   :  { %v3807_v15 = vmul.f32 0.35355338, %v3801_v27  ;;  %v3656_v63 = vpop.xlane.xlu1 %3655 }
0x15a2   :  { %v3660_v17 = vsub.f32 %v3652_v24, %v3656_v63 }
0x15a3   :  { %v3809_v16 = vadd.f32 %v7490_v1, %v3807_v15 }
0x15a4   :  { %v7516_v54 = vpop.eup %5640  ;;  %v3662_v2 = vmul.f32 1.442695, %v3660_v17 }
0x15a5   :  { %v3483_v11 = vsel %vm1727_vm4, %v7516_v54, 0.0  ;;  %v3811_v40 = vsel %vm1727_vm4, %v3809_v16, -inf }
0x15a6   :  { %3484 = vadd.xlane.f32.xlu1 %v3483_v11  ;;  %3812 = vmax.xlane.f32.xlu2 %v3811_v40  ;;  %5642 = vpow2.f32 %v3662_v2 }
0x15a8   :  { %v3804_v18 = vpop.f32.mrf.mxu0 }
0x15a9   :  { %v3808_v7 = vmul.f32 0.35355338, %v3804_v18  ;;  %v3659_v5 = vpop.xlane.xlu0 %3658 }
0x15aa   :  { %v3661_v62 = vsub.f32 %v3653_v45, %v3659_v5 }
0x15ab   :  { %v3810_v25 = vadd.f32 %v7498_v39, %v3808_v7 }
0x15ac   :  { %v3664_v47 = vmul.f32 1.442695, %v3661_v62  ;;  %v7523_v20 = vpop.eup %5642 }
0x15ad   :  { %v3814_v48 = vsel %vm1727_vm4, %v3810_v25, -inf  ;;  %v3666_v44 = vsel %vm1727_vm4, %v7523_v20, 0.0 }
0x15ae   :  { %3815 = vmax.xlane.f32.xlu2 %v3814_v48  ;;  %5644 = vpow2.f32 %v3664_v47 }
0x15b2   :  { %5444 = vrot.lane.b32.xlu0 %v7428_v51, %s5732_s7  ;;  %s8062_s7 = smov 24  }
0x15b4   :  { %v7529_v23 = vpop.eup %5644 }
0x15b5   :  { %v3669_v60 = vsel %vm1727_vm4, %v7529_v23, 0.0 }
0x15b6   :  { %3667 = vadd.xlane.f32.xlu2 %v3666_v44 }
0x15ba   :  { %3931 = vrot.lane.b32.xlu0 %v7430_v41, %s8060_s30 }
0x15be   :  { %3670 = vadd.xlane.f32.xlu2 %v3669_v60 }
0x15c2   :  { %3929 = vrot.lane.b32.xlu0 %v7424_v34, %s8060_s30  ;;  %s5748_s30 = smov [#allocation2]  }
0x15ca   :  { %3925 = vrot.lane.b32.xlu0 %v7424_v34, %s8061_s29 }
0x15d2   :  { %3927 = vrot.lane.b32.xlu0 %v7430_v41, %s8061_s29 }
0x15d6   :  { %5449 = vrot.lane.b32.xlu2 %v7428_v51, %s5736_s3 }
0x15de   :  { %4088 = vrot.lane.b32.xlu2 %v7430_v41, %s8062_s7 }
0x15e6   :  { %4082 = vrot.lane.b32.xlu2 %v7424_v34, %s8063_s14 }
0x1611   :  { %v3482_v30 = vpop.xlane.xlu0 %3481 }
0x1612   :  { %5646 = vrcp.f32 %v3482_v30  ;;  %v3497_v57 = vand.u32 2147483648, %v3482_v30  ;;  %vm3491_vm14 = vweird.f32 %v3482_v30  ;;  %v3495_v35 = vand.u32 2147483647, %v3482_v30 }
0x1614   :  { %v3498_v56 = vor.u32 1.1754944e-38, %v3497_v57  ;;  %vm3496_vm0 = vcmp.eq.f32.partialorder %v3495_v35, 8.507059e+37 }
0x1618   :  { %v5647_v12 = vpop.eup %5646 }
0x1619   :  { %v3487_v22 = vmul.f32 %v5647_v12, %v3482_v30  ;;  %v3485_v58 = vpop.xlane.xlu1 %3484  ;;  %v3813_v14 = vpop.xlane.xlu2 %3812  ;;  %vm3492_vm13 = vweird.f32 %v5647_v12 }
0x161a   :  { %5648 = vrcp.f32 %v3485_v58  ;;  %v3817_v46 = vsub.f32 %v3809_v16, %v3813_v14  ;;  %vm3493_vm15 = vmor %vm3491_vm14, %vm3492_vm13  ;;  %v3512_v52 = vand.u32 2147483648, %v3485_v58  ;;  %vm3506_vm2 = vweird.f32 %v3485_v58 }
0x161b   :  { %v3488_v33 = vsub.f32 1.0, %v3487_v22  ;;  %v3510_v10 = vand.u32 2147483647, %v3485_v58 }
0x161c   :  { %v3819_v4 = vmul.f32 1.442695, %v3817_v46  ;;  %v3513_v27 = vor.u32 1.1754944e-38, %v3512_v52 }
0x161d   :  { %v3489_v53 = vmul.f32 %v5647_v12, %v3488_v33  ;;  %vm3511_vm6 = vcmp.eq.f32.partialorder %v3510_v10, 8.507059e+37 }
0x161e   :  { %5650 = vpow2.f32 %v3819_v4 }
0x161f   :  { %v3490_v29 = vadd.f32 %v5647_v12, %v3489_v53  ;;  %v5251_v53 = vld [vmem:[%s7989_s16 + $0x58] sm:$0xff] }
0x1620   :  { %v5649_v43 = vpop.eup %5648 }
0x1621   :  { %v3502_v8 = vmul.f32 %v5649_v43, %v3485_v58  ;;  %v3816_v50 = vpop.xlane.xlu2 %3815  ;;  %v3494_v42 = vsel %vm3493_vm15, %v5647_v12, %v3490_v29  ;;  %vm3507_vm1 = vweird.f32 %v5649_v43 }
0x1622   :  { %v3818_v55 = vsub.f32 %v3810_v25, %v3816_v50  ;;  %v3499_v49 = vsel %vm3496_vm0, %v3498_v56, %v3494_v42  ;;  %vm3508_vm5 = vmor %vm3506_vm2, %vm3507_vm1 }
0x1623   :  { %v3503_v59 = vsub.f32 1.0, %v3502_v8  ;;  %v3500_v37 = vmul.f32 %v7511_v31, %v3499_v49  ;;  %v5249_v8 = vld [vmem:[%s7989_s16 + $0x48] sm:$0xff] }
0x1624   :  { %v3821_v61 = vmul.f32 1.442695, %v3818_v55  ;;  %v5445_v24 = vpop.permute.xlu0 %5444  ;;  %v7547_v36 = vpop.eup %5650  ;;  %3574 = vmatpush.msra.mxu3 %v5249_v8 }
0x1625   :  { %v3504_v13 = vmul.f32 %v5649_v43, %v3503_v59  ;;  %v5446_v45 = vunpack.i.l.bf16 %v5445_v24  ;;  %v3823_v38 = vsel %vm1727_vm4, %v7547_v36, 0.0  ;;  %v5447_v6 = vunpack.i.h.bf16 %v5445_v24 }
0x1626   :  { %5652 = vpow2.f32 %v3821_v61  ;;  %3824 = vadd.xlane.f32.xlu1 %v3823_v38 }
0x1627   :  { %v3505_v21 = vadd.f32 %v5649_v43, %v3504_v13  ;;  %3544 = vmatpush.msrb.mxu1 %v5446_v45 }
0x1629   :  { %3545 = vmatpush.msrb.mxu1 %v5447_v6  ;;  %v3668_v32 = vpop.xlane.xlu2 %3667  ;;  %v3509_v3 = vsel %vm3508_vm5, %v5649_v43, %v3505_v21 }
0x162a   :  { %5654 = vrcp.f32 %v3668_v32  ;;  %5266 = vmatmul.msk.f32.vlgmr.msrb.gmra.mxu1 %vm1727_vm4, %v3500_v37  ;;  %v3514_v16 = vsel %vm3511_vm6, %v3513_v27, %v3509_v3  ;;  %v3683_v18 = vand.u32 2147483648, %v3668_v32  ;;  %v3681_v5 = vand.u32 2147483647, %v3668_v32 }
0x162b   :  { %v3515_v31 = vmul.f32 %v7516_v54, %v3514_v16  ;;  %vm3677_vm9 = vweird.f32 %v3668_v32 }
0x162c   :  { %v7553_v15 = vpop.eup %5652  ;;  %v3684_v48 = vor.u32 1.1754944e-38, %v3683_v18  ;;  %vm3682_vm11 = vcmp.eq.f32.partialorder %v3681_v5, 8.507059e+37  ;;  %v3932_v42 = vpop.permute.xlu0 %3931 }
0x162d   :  { %v3826_v63 = vsel %vm1727_vm4, %v7553_v15, 0.0 }
0x162e   :  { %3827 = vadd.xlane.f32.xlu1 %v3826_v63 }
0x1630   :  { %v5655_v17 = vpop.eup %5654 }
0x1631   :  { %v3673_v11 = vmul.f32 %v5655_v17, %v3668_v32  ;;  %v3671_v40 = vpop.xlane.xlu2 %3670  ;;  %vm3678_vm7 = vweird.f32 %v5655_v17 }
0x1632   :  { %5656 = vrcp.f32 %v3671_v40  ;;  %5267 = vmatmul.msk.f32.gmra.mxu1 %vm1727_vm4, %v3515_v31  ;;  %vm3679_vm10 = vmor %vm3677_vm9, %vm3678_vm7  ;;  %v3698_v22 = vand.u32 2147483648, %v3671_v40  ;;  %v3696_v46 = vand.u32 2147483647, %v3671_v40  ;;  %vm3692_vm13 = vweird.f32 %v3671_v40 }
0x1633   :  { %v3674_v2 = vsub.f32 1.0, %v3673_v11 }
0x1634   :  { %v3699_v29 = vor.u32 1.1754944e-38, %v3698_v22  ;;  %vm3697_vm15 = vcmp.eq.f32.partialorder %v3696_v46, 8.507059e+37  ;;  %v3930_v24 = vpop.permute.xlu0 %3929 }
0x1635   :  { %v3675_v7 = vmul.f32 %v5655_v17, %v3674_v2 }
0x1637   :  { %v3676_v25 = vadd.f32 %v5655_v17, %v3675_v7 }
0x1638   :  { %v5657_v62 = vpop.eup %5656 }
0x1639   :  { %v3680_v47 = vsel %vm3679_vm10, %v5655_v17, %v3676_v25  ;;  %v3688_v44 = vmul.f32 %v5657_v62, %v3671_v40  ;;  %v5450_v60 = vpop.permute.xlu2 %5449  ;;  %vm3693_vm12 = vweird.f32 %v5657_v62 }
0x163a   :  { %v3685_v54 = vsel %vm3682_vm11, %v3684_v48, %v3680_v47  ;;  %v5451_v30 = vunpack.i.l.bf16 %v5450_v60  ;;  %v5452_v58 = vunpack.i.h.bf16 %v5450_v60  ;;  %vm3694_vm14 = vmor %vm3692_vm13, %vm3693_vm12 }
0x163b   :  { %v3689_v12 = vsub.f32 1.0, %v3688_v44  ;;  %v3686_v14 = vmul.f32 %v7523_v20, %v3685_v54 }
0x163c   :  { %3728 = vmatpush.msra.mxu1 %v5451_v30 }
0x163d   :  { %v3690_v33 = vmul.f32 %v5657_v62, %v3689_v12 }
0x163e   :  { %3729 = vmatpush.msra.mxu1 %v5452_v58 }
0x163f   :  { %v3691_v4 = vadd.f32 %v5657_v62, %v3690_v33  ;;  %5276 = vmatmul.msk.f32.vlgmr.msra.gmra.mxu1 %vm1727_vm4, %v3686_v14 }
0x1640   :  { %3915 = vmatpush.msrb.mxu1 %v5251_v53 }
0x1641   :  { %v4089_v57 = vpop.permute.xlu2 %4088  ;;  %v3695_v43 = vsel %vm3694_vm14, %v5657_v62, %v3691_v4 }
0x1642   :  { %5296 = vmatpush.xpose.msk.msra.mxu1 %vm1691_vm3, %v4089_v57  ;;  %v3700_v20 = vsel %vm3697_vm15, %v3699_v29, %v3695_v43 }
0x1643   :  { %v3701_v35 = vmul.f32 %v7529_v23, %v3700_v20  ;;  %v5250_v23 = vld [vmem:[%s7989_s16 + $0x50] sm:$0xff] }
0x1644   :  { %3758 = vmatpush.msrb.mxu3 %v5250_v23 }
0x1647   :  { %5277 = vmatmul.msk.f32.gmra.mxu1 %vm1727_vm4, %v3701_v35  ;;  %5454 = vrot.lane.b32.xlu1 %v7428_v51, %s8059_s11  ;;  %s8065_s11 = smov 8  }
0x1649   :  { %v4083_v57 = vpop.permute.xlu2 %4082 }
0x164f   :  { %4086 = vrot.lane.b32.xlu1 %v7424_v34, %s8062_s7 }
0x1657   :  { %4084 = vrot.lane.b32.xlu1 %v7430_v41, %s8063_s14 }
0x1699   :  { %v3825_v50 = vpop.xlane.xlu1 %3824 }
0x169a   :  { %5658 = vrcp.f32 %v3825_v50  ;;  %v3840_v37 = vand.u32 2147483648, %v3825_v50  ;;  %vm3834_vm1 = vweird.f32 %v3825_v50  ;;  %v3838_v10 = vand.u32 2147483647, %v3825_v50 }
0x169c   :  { %v3841_v27 = vor.u32 1.1754944e-38, %v3840_v37  ;;  %vm3839_vm5 = vcmp.eq.f32.partialorder %v3838_v10, 8.507059e+37 }
0x16a0   :  { %v5659_v56 = vpop.eup %5658 }
0x16a1   :  { %v3828_v55 = vpop.xlane.xlu1 %3827  ;;  %v3830_v61 = vmul.f32 %v5659_v56, %v3825_v50  ;;  %vm3835_vm0 = vweird.f32 %v5659_v56 }
0x16a2   :  { %5660 = vrcp.f32 %v3828_v55  ;;  %vm3836_vm2 = vmor %vm3834_vm1, %vm3835_vm0  ;;  %v3855_v40 = vand.u32 2147483648, %v3828_v55  ;;  %vm3849_vm7 = vweird.f32 %v3828_v55  ;;  %v3853_v7 = vand.u32 2147483647, %v3828_v55 }
0x16a3   :  { %v3831_v49 = vsub.f32 1.0, %v3830_v61 }
0x16a4   :  { %v3856_v25 = vor.u32 1.1754944e-38, %v3855_v40  ;;  %vm3854_vm10 = vcmp.eq.f32.partialorder %v3853_v7, 8.507059e+37 }
0x16a5   :  { %v3832_v38 = vmul.f32 %v5659_v56, %v3831_v49 }
0x16a7   :  { %v3547_v59 = vpop.f32.mrf.mxu1  ;;  %v3833_v52 = vadd.f32 %v5659_v56, %v3832_v38 }
0x16a8   :  { %5268 = vmatmul.msk.f32.vlgmr.msra.gmra.mxu3 %vm1691_vm3, %v3547_v59  ;;  %v5661_v13 = vpop.eup %5660 }
0x16a9   :  { %5288 = vmatpush.xpose.msk.msra.mxu3 %vm1691_vm3, %v3932_v42  ;;  %v3845_v21 = vmul.f32 %v5661_v13, %v3828_v55  ;;  %v3837_v32 = vsel %vm3836_vm2, %v5659_v56, %v3833_v52  ;;  %vm3850_vm6 = vweird.f32 %v5661_v13 }
0x16aa   :  { %v3842_v16 = vsel %vm3839_vm5, %v3841_v27, %v3837_v32  ;;  %vm3851_vm9 = vmor %vm3849_vm7, %vm3850_vm6 }
0x16ab   :  { %v3846_v6 = vsub.f32 1.0, %v3845_v21  ;;  %v3843_v18 = vmul.f32 %v7547_v36, %v3842_v16  ;;  %v3926_v36 = vpop.permute.xlu0 %3925 }
0x16ad   :  { %5289 = vmatpush.xpose.msk.msra.mxu3 %vm1691_vm3, %v3930_v24  ;;  %v3847_v3 = vmul.f32 %v5661_v13, %v3846_v6 }
0x16af   :  { %v3550_v45 = vpop.f32.mrf.mxu1  ;;  %v3848_v31 = vadd.f32 %v5661_v13, %v3847_v3 }
0x16b0   :  { %5269 = vmatmul.msk.f32.gmra.mxu3 %vm1691_vm3, %v3550_v45 }
0x16b1   :  { %v3852_v5 = vsel %vm3851_vm9, %v5661_v13, %v3848_v31 }
0x16b2   :  { %v3857_v48 = vsel %vm3854_vm10, %v3856_v25, %v3852_v5 }
0x16b3   :  { %v3858_v44 = vmul.f32 %v7553_v15, %v3857_v48  ;;  %v3928_v60 = vpop.permute.xlu0 %3927 }
0x16b9   :  { %v5455_v63 = vpop.permute.xlu1 %5454 }
0x16ba   :  { %v5456_v17 = vunpack.i.l.bf16 %v5455_v63  ;;  %v5457_v2 = vunpack.i.h.bf16 %v5455_v63 }
0x16bc   :  { %v3731_v11 = vpop.f32.mrf.mxu1  ;;  %3885 = vmatpush.msra.mxu2 %v5456_v17 }
0x16bd   :  { %5278 = vmatmul.msk.f32.vlgmr.msrb.gmra.mxu3 %vm1691_vm3, %v3731_v11 }
0x16be   :  { %3886 = vmatpush.msra.mxu2 %v5457_v2 }
0x16bf   :  { %5284 = vmatmul.msk.f32.vlgmr.msra.gmra.mxu2 %vm1727_vm4, %v3843_v18 }
0x16c1   :  { %v4087_v62 = vpop.permute.xlu1 %4086 }
0x16c2   :  { %5297 = vmatpush.xpose.msk.msra.mxu1 %vm1691_vm3, %v4087_v62 }
0x16c4   :  { %v3734_v47 = vpop.f32.mrf.mxu1 }
0x16c5   :  { %5279 = vmatmul.msk.f32.gmra.mxu3 %vm1691_vm3, %v3734_v47 }
0x16c7   :  { %5285 = vmatmul.msk.f32.gmra.mxu2 %vm1727_vm4, %v3858_v44 }
0x16c9   :  { %v4085_v8 = vpop.permute.xlu1 %4084 }
0x16cd   :  { %5290 = vmatmul.msk.f32.vlgmr.msra.gmra.mxu3 %vm1691_vm3, %v3926_v36 }
0x16d5   :  { %5291 = vmatmul.msk.f32.gmra.mxu3 %vm1691_vm3, %v3928_v60 }
0x172b   :  { %v3576_v54 = vpop.f32.mrf.mxu3 }
0x172c   :  { %v3606_v12 = vadd.f32 %v7507_v0, %v3576_v54  ;;  %v5252_v54 = vld [vmem:[%s7989_s16 + $0x60] sm:$0xff] }
0x172d   :  { %4072 = vmatpush.msrb.mxu2 %v5252_v54 }
0x1733   :  { %v3579_v30 = vpop.f32.mrf.mxu3 }
0x1734   :  { %v3609_v33 = vadd.f32 %v7509_v19, %v3579_v30 }
0x1740   :  { %v3760_v22 = vpop.f32.mrf.mxu3 }
0x1741   :  { %v3766_v58 = vadd.f32 %v3760_v22, %v3606_v12 }
0x1742   :  { %v3888_v14 = vpop.f32.mrf.mxu2 }
0x1743   :  { %5286 = vmatmul.msk.f32.vlgmr.msrb.gmra.mxu1 %vm1691_vm3, %v3888_v14 }
0x1748   :  { %v3763_v15 = vpop.f32.mrf.mxu3 }
0x1749   :  { %v3767_v46 = vadd.f32 %v3763_v15, %v3609_v33 }
0x174a   :  { %v3891_v53 = vpop.f32.mrf.mxu2 }
0x174b   :  { %5287 = vmatmul.msk.f32.gmra.mxu1 %vm1691_vm3, %v3891_v53 }
0x1750   :  { %v3958_v4 = vpop.f32.mrf.mxu3 }
0x1751   :  { %v3964_v29 = vmul.f32 0.35355338, %v3958_v4 }
0x1753   :  { %v3966_v43 = vadd.f32 %v7490_v1, %v3964_v29  ;;  %5298 = vmatmul.msk.f32.vlgmr.msra.gmra.mxu1 %vm1691_vm3, %v4083_v57 }
0x1755   :  { %v3968_v0 = vsel %vm1727_vm4, %v3966_v43, -inf }
0x1756   :  { %3969 = vmax.xlane.f32.xlu0 %v3968_v0 }
0x1758   :  { %v3961_v20 = vpop.f32.mrf.mxu3 }
0x1759   :  { %v3965_v35 = vmul.f32 0.35355338, %v3961_v20 }
0x175b   :  { %v3967_v19 = vadd.f32 %v7498_v39, %v3965_v35  ;;  %5299 = vmatmul.msk.f32.gmra.mxu1 %vm1691_vm3, %v4085_v8 }
0x175d   :  { %v3971_v23 = vsel %vm1727_vm4, %v3967_v19, -inf }
0x175e   :  { %3972 = vmax.xlane.f32.xlu1 %v3971_v23 }
0x17c0   :  { %v3917_v50 = vpop.f32.mrf.mxu1 }
0x17c1   :  { %v7602_v42 = vadd.f32 %v3917_v50, %v3766_v58 }
0x17c8   :  { %v3920_v55 = vpop.f32.mrf.mxu1 }
0x17c9   :  { %v7604_v56 = vadd.f32 %v3920_v55, %v3767_v46  ;;  %v3970_v59 = vpop.xlane.xlu0 %3969 }
0x17ca   :  { %v3974_v61 = vsub.f32 %v3966_v43, %v3970_v59 }
0x17cc   :  { %v3976_v24 = vmul.f32 1.442695, %v3974_v61 }
0x17ce   :  { %5662 = vpow2.f32 %v3976_v24 }
0x17d0   :  { %v4115_v49 = vpop.f32.mrf.mxu1 }
0x17d1   :  { %v4121_v13 = vmul.f32 0.35355338, %v4115_v49  ;;  %v3973_v45 = vpop.xlane.xlu1 %3972 }
0x17d2   :  { %v3975_v21 = vsub.f32 %v3967_v19, %v3973_v45 }
0x17d3   :  { %v4123_v38 = vadd.f32 %v7490_v1, %v4121_v13 }
0x17d4   :  { %v3978_v6 = vmul.f32 1.442695, %v3975_v21  ;;  %v7608_v32 = vpop.eup %5662 }
0x17d5   :  { %v4125_v52 = vsel %vm1727_vm4, %v4123_v38, -inf  ;;  %v3980_v63 = vsel %vm1727_vm4, %v7608_v32, 0.0 }
0x17d6   :  { %4126 = vmax.xlane.f32.xlu2 %v4125_v52  ;;  %5664 = vpow2.f32 %v3978_v6 }
0x17d8   :  { %v4118_v37 = vpop.f32.mrf.mxu1 }
0x17d9   :  { %v4122_v10 = vmul.f32 0.35355338, %v4118_v37 }
0x17db   :  { %v4124_v3 = vadd.f32 %v7498_v39, %v4122_v10 }
0x17dc   :  { %v7614_v16 = vpop.eup %5664 }
0x17dd   :  { %v4128_v27 = vsel %vm1727_vm4, %v4124_v3, -inf  ;;  %v3983_v17 = vsel %vm1727_vm4, %v7614_v16, 0.0 }
0x17de   :  { %4129 = vmax.xlane.f32.xlu0 %v4128_v27  ;;  %3981 = vadd.xlane.f32.xlu2 %v3980_v63 }
0x17e6   :  { %3984 = vadd.xlane.f32.xlu0 %v3983_v17 }
0x17fa   :  { %5464 = vrot.lane.b32.xlu0 %v7428_v51, %s8063_s14 }
0x1802   :  { %4243 = vrot.lane.b32.xlu0 %v7424_v34, %s8064_s15 }
0x180a   :  { %4400 = vrot.lane.b32.xlu0 %v7424_v34, %s8065_s11 }
0x1812   :  { %4398 = vrot.lane.b32.xlu0 %v7430_v41, %s8066_s13 }
0x1849   :  { %v4127_v31 = vpop.xlane.xlu2 %4126 }
0x184a   :  { %v4131_v11 = vsub.f32 %v4123_v38, %v4127_v31 }
0x184c   :  { %v4133_v40 = vmul.f32 1.442695, %v4131_v11 }
0x184e   :  { %5666 = vpow2.f32 %v4133_v40 }
0x1851   :  { %v4130_v2 = vpop.xlane.xlu0 %4129  ;;  %v3982_v30 = vpop.xlane.xlu2 %3981 }
0x1852   :  { %v4132_v18 = vsub.f32 %v4124_v3, %v4130_v2  ;;  %v3997_v24 = vand.u32 2147483648, %v3982_v30  ;;  %vm3991_vm0 = vweird.f32 %v3982_v30  ;;  %v3995_v13 = vand.u32 2147483647, %v3982_v30 }
0x1854   :  { %v5667_v7 = vpop.eup %5666  ;;  %v4135_v5 = vmul.f32 1.442695, %v4132_v18  ;;  %v3998_v3 = vor.u32 1.1754944e-38, %v3997_v24  ;;  %vm3996_vm6 = vcmp.eq.f32.partialorder %v3995_v13, 8.507059e+37 }
0x1855   :  { %v4137_v25 = vsel %vm1727_vm4, %v5667_v7, 0.0 }
0x1856   :  { %4138 = vadd.xlane.f32.xlu1 %v4137_v25  ;;  %5668 = vpow2.f32 %v4135_v5 }
0x1857   :  { %5670 = vrcp.f32 %v3982_v30 }
0x1859   :  { %v7631_v47 = vpop.xlane.xlu0 %3984 }
0x185c   :  { %v7627_v62 = vpop.eup %5668 }
0x185d   :  { %v4140_v48 = vsel %vm1727_vm4, %v7627_v62, 0.0  ;;  %v5671_v22 = vpop.eup %5670 }
0x185e   :  { %4141 = vadd.xlane.f32.xlu2 %v4140_v48  ;;  %v3987_v58 = vmul.f32 %v5671_v22, %v3982_v30  ;;  %vm3992_vm15 = vweird.f32 %v5671_v22 }
0x185f   :  { %vm7655_vm1 = vmor %vm3991_vm0, %vm3992_vm15 }
0x186c   :  { %v5465_v44 = vpop.permute.xlu0 %5464 }
0x186d   :  { %v5466_v36 = vunpack.i.l.bf16 %v5465_v44  ;;  %v5467_v60 = vunpack.i.h.bf16 %v5465_v44  ;;  %v4010_v44 = vand.u32 2147483647, %v7631_v47 }
0x186f   :  { %5459 = vrot.lane.b32.xlu1 %v7428_v51, %s8061_s29  ;;  %4199 = vmatpush.msrb.mxu3 %v5466_v36  ;;  %v5253_v36 = vld [vmem:[%s7989_s16 + $0x68] sm:$0xff]  ;;  %s4909_s29 = sshll.u32 %s5748_s30, 4  ;;  %s4910_s29 = int_to_ptr.vmem [resolvable:$true] %s4909_s29 }
0x1871   :  { %4200 = vmatpush.msrb.mxu3 %v5467_v60 }
0x1874   :  { %v4244_v21 = vpop.permute.xlu0 %4243 }
0x1876   :  { %4245 = vrot.lane.b32.xlu2 %v7430_v41, %s8064_s15 }
0x1877   :  { %4239 = vrot.lane.b32.xlu1 %v7424_v34, %s8067_s12 }
0x187e   :  { %4402 = vrot.lane.b32.xlu2 %v7430_v41, %s8065_s11 }
0x187f   :  { %4241 = vrot.lane.b32.xlu1 %v7430_v41, %s8067_s12  ;;  %v3988_v41 = vsub.f32 1.0, %v3987_v58 }
0x1881   :  { %v3989_v57 = vmul.f32 %v5671_v22, %v3988_v41 }
0x1883   :  { %v3990_v55 = vadd.f32 %v5671_v22, %v3989_v57 }
0x1885   :  { %v3994_v37 = vsel %vm7655_vm1, %v5671_v22, %v3990_v55 }
0x1886   :  { %4396 = vrot.lane.b32.xlu2 %v7424_v34, %s8066_s13  ;;  %v3999_v31 = vsel %vm3996_vm6, %v3998_v3, %v3994_v37 }
0x1887   :  { %v4000_v48 = vmul.f32 %v7608_v32, %v3999_v31 }
0x18c9   :  { %v4139_v12 = vpop.xlane.xlu1 %4138 }
0x18ca   :  { %5672 = vrcp.f32 %v4139_v12  ;;  %v4154_v53 = vand.u32 2147483648, %v4139_v12  ;;  %v4152_v29 = vand.u32 2147483647, %v4139_v12  ;;  %vm4148_vm12 = vweird.f32 %v4139_v12 }
0x18cb   :  { %5674 = vrcp.f32 %v7631_v47 }
0x18cc   :  { %v4155_v20 = vor.u32 1.1754944e-38, %v4154_v53  ;;  %vm4153_vm14 = vcmp.eq.f32.partialorder %v4152_v29, 8.507059e+37 }
0x18d0   :  { %v5673_v14 = vpop.eup %5672 }
0x18d1   :  { %v4144_v33 = vmul.f32 %v5673_v14, %v4139_v12  ;;  %v4142_v15 = vpop.xlane.xlu2 %4141  ;;  %v7649_v34 = vpop.eup %5674  ;;  %vm4149_vm11 = vweird.f32 %v5673_v14 }
0x18d2   :  { %5676 = vrcp.f32 %v4142_v15  ;;  %v4002_v43 = vmul.f32 %v7649_v34, %v7631_v47  ;;  %vm4150_vm13 = vmor %vm4148_vm12, %vm4149_vm11  ;;  %v4169_v45 = vand.u32 2147483648, %v4142_v15  ;;  %v4167_v6 = vand.u32 2147483647, %v4142_v15 }
0x18d3   :  { %v4145_v46 = vsub.f32 1.0, %v4144_v33  ;;  %vm4163_vm5 = vweird.f32 %v4142_v15  ;;  %vm4007_vm10 = vweird.f32 %v7649_v34  ;;  %vm4006_vm11 = vweird.f32 %v7631_v47 }
0x18d4   :  { %v4003_v59 = vsub.f32 1.0, %v4002_v43  ;;  %v4170_v63 = vor.u32 1.1754944e-38, %v4169_v45  ;;  %vm4168_vm9 = vcmp.eq.f32.partialorder %v4167_v6, 8.507059e+37  ;;  %vm4008_vm12 = vmor %vm4006_vm11, %vm4007_vm10 }
0x18d5   :  { %v4146_v4 = vmul.f32 %v5673_v14, %v4145_v46 }
0x18d6   :  { %v4004_v10 = vmul.f32 %v7649_v34, %v4003_v59 }
0x18d7   :  { %v4147_v0 = vadd.f32 %v5673_v14, %v4146_v4 }
0x18d8   :  { %v5677_v35 = vpop.eup %5676  ;;  %v4005_v2 = vadd.f32 %v7649_v34, %v4004_v10 }
0x18d9   :  { %v4151_v8 = vsel %vm4150_vm13, %v5673_v14, %v4147_v0  ;;  %v4159_v23 = vmul.f32 %v5677_v35, %v4142_v15  ;;  %v4246_v50 = vpop.permute.xlu2 %4245  ;;  %vm4164_vm2 = vweird.f32 %v5677_v35  ;;  %vm4011_vm13 = vcmp.eq.f32.partialorder %v4010_v44, 8.507059e+37 }
0x18da   :  { %v4156_v19 = vsel %vm4153_vm14, %v4155_v20, %v4151_v8  ;;  %5304 = vmatpush.xpose.msk.msra.mxu2 %vm1691_vm3, %v4246_v50  ;;  %vm4165_vm7 = vmor %vm4163_vm5, %vm4164_vm2  ;;  %v4009_v60 = vsel %vm4008_vm12, %v7649_v34, %v4005_v2 }
0x18db   :  { %v4157_v61 = vmul.f32 %v5667_v7, %v4156_v19  ;;  %v4160_v49 = vsub.f32 1.0, %v4159_v23  ;;  %v4012_v7 = vand.u32 2147483648, %v7631_v47  ;;  %v4401_v47 = vpop.permute.xlu0 %4400 }
0x18dd   :  { %5300 = vmatmul.msk.f32.vlgmr.msrb.gmra.mxu3 %vm1727_vm4, %v4157_v61  ;;  %v4161_v52 = vmul.f32 %v5677_v35, %v4160_v49  ;;  %v4013_v54 = vor.u32 1.1754944e-38, %v4012_v7 }
0x18de   :  { %5305 = vmatpush.xpose.msk.msra.mxu2 %vm1691_vm3, %v4244_v21 }
0x18df   :  { %v4162_v27 = vadd.f32 %v5677_v35, %v4161_v52  ;;  %v4014_v32 = vsel %vm4011_vm13, %v4013_v54, %v4009_v60 }
0x18e0   :  { %v4015_v30 = vmul.f32 %v7614_v16, %v4014_v32 }
0x18e1   :  { %v5460_v17 = vpop.permute.xlu1 %5459  ;;  %v4166_v40 = vsel %vm4165_vm7, %v5677_v35, %v4162_v27 }
0x18e2   :  { %v5461_v11 = vunpack.i.l.bf16 %v5460_v17  ;;  %v4171_v18 = vsel %vm4168_vm9, %v4170_v63, %v4166_v40  ;;  %v5462_v5 = vunpack.i.h.bf16 %v5460_v17 }
0x18e3   :  { %v4172_v25 = vmul.f32 %v7627_v62, %v4171_v18  ;;  %v4403_v62 = vpop.permute.xlu2 %4402  ;;  %v4399_v16 = vpop.permute.xlu0 %4398 }
0x18e4   :  { %4042 = vmatpush.msrb.mxu0 %v5461_v11 }
0x18e5   :  { %5301 = vmatmul.msk.f32.gmra.mxu3 %vm1727_vm4, %v4172_v25 }
0x18e6   :  { %4043 = vmatpush.msrb.mxu0 %v5462_v5 }
0x18e7   :  { %5292 = vmatmul.msk.f32.vlgmr.msrb.gmra.mxu0 %vm1727_vm4, %v4000_v48 }
0x18e8   :  { %4229 = vmatpush.msra.mxu0 %v5253_v36 }
0x18e9   :  { %v4240_v15 = vpop.permute.xlu1 %4239 }
0x18ea   :  { %5312 = vmatpush.xpose.msk.msrb.mxu0 %vm1691_vm3, %v4403_v62 }
0x18eb   :  { %v4397_v33 = vpop.permute.xlu2 %4396 }
0x18ee   :  { %5313 = vmatpush.xpose.msk.msrb.mxu0 %vm1691_vm3, %v4401_v47 }
0x18ef   :  { %5293 = vmatmul.msk.f32.gmra.mxu0 %vm1727_vm4, %v4015_v30 }
0x18f1   :  { %v4242_v41 = vpop.permute.xlu1 %4241 }
0x1960   :  { %v4202_v12 = vpop.f32.mrf.mxu3 }
0x1961   :  { %5302 = vmatmul.msk.f32.vlgmr.msra.gmra.mxu0 %vm1691_vm3, %v4202_v12 }
0x1964   :  { %v4045_v22 = vpop.f32.mrf.mxu0 }
0x1965   :  { %5294 = vmatmul.msk.f32.vlgmr.msrb.gmra.mxu2 %vm1691_vm3, %v4045_v22 }
0x1968   :  { %v4205_v58 = vpop.f32.mrf.mxu3 }
0x1969   :  { %5303 = vmatmul.msk.f32.gmra.mxu0 %vm1691_vm3, %v4205_v58 }
0x196c   :  { %v4048_v14 = vpop.f32.mrf.mxu0 }
0x196d   :  { %5295 = vmatmul.msk.f32.gmra.mxu2 %vm1691_vm3, %v4048_v14 }
0x1971   :  { %5314 = vmatmul.msk.f32.vlgmr.msrb.gmra.mxu0 %vm1691_vm3, %v4397_v33 }
0x1975   :  { %5306 = vmatmul.msk.f32.vlgmr.msra.gmra.mxu2 %vm1691_vm3, %v4240_v15 }
0x1979   :  { %5315 = vmatmul.msk.f32.gmra.mxu0 %vm1691_vm3, %v4399_v16 }
0x197d   :  { %5307 = vmatmul.msk.f32.gmra.mxu2 %vm1691_vm3, %v4242_v41 }
0x19de   :  { %v4231_v46 = vpop.f32.mrf.mxu0 }
0x19e6   :  { %v4234_v34 = vpop.f32.mrf.mxu0 }
0x19e8   :  { %v4074_v53 = vpop.f32.mrf.mxu2 }
0x19e9   :  { %v4080_v4 = vadd.f32 %v4074_v53, %v7602_v42 }
0x19eb   :  { %v7689_v29 = vadd.f32 %v4231_v46, %v4080_v4 }
0x19ee   :  { %v4429_v57 = vpop.f32.mrf.mxu0 }
0x19ef   :  { %v4435_v43 = vmul.f32 0.35355338, %v4429_v57 }
0x19f0   :  { %v4077_v0 = vpop.f32.mrf.mxu2 }
0x19f1   :  { %v4081_v20 = vadd.f32 %v4077_v0, %v7604_v56  ;;  %v4437_v35 = vadd.f32 %v7490_v1, %v4435_v43 }
0x19f3   :  { %v7693_v8 = vadd.f32 %v4234_v34, %v4081_v20  ;;  %v4439_v19 = vsel %vm1727_vm4, %v4437_v35, -inf }
0x19f4   :  { %4440 = vmax.xlane.f32.xlu2 %v4439_v19 }
0x19f6   :  { %v4432_v55 = vpop.f32.mrf.mxu0 }
0x19f7   :  { %v4436_v42 = vmul.f32 0.35355338, %v4432_v55 }
0x19f8   :  { %v4272_v23 = vpop.f32.mrf.mxu2 }
0x19f9   :  { %v4278_v50 = vmul.f32 0.35355338, %v4272_v23  ;;  %v4438_v56 = vadd.f32 %v7498_v39, %v4436_v42 }
0x19fb   :  { %v4280_v59 = vadd.f32 %v7490_v1, %v4278_v50  ;;  %v4442_v45 = vsel %vm1727_vm4, %v4438_v56, -inf }
0x19fd   :  { %v4282_v61 = vsel %vm1727_vm4, %v4280_v59, -inf }
0x19fe   :  { %4283 = vmax.xlane.f32.xlu1 %v4282_v61 }
0x1a00   :  { %v4275_v24 = vpop.f32.mrf.mxu2 }
0x1a01   :  { %v4279_v49 = vmul.f32 0.35355338, %v4275_v24 }
0x1a03   :  { %v4281_v13 = vadd.f32 %v7498_v39, %v4279_v49 }
0x1a05   :  { %v4285_v38 = vsel %vm1727_vm4, %v4281_v13, -inf }
0x1a06   :  { %4443 = vmax.xlane.f32.xlu1 %v4442_v45  ;;  %4286 = vmax.xlane.f32.xlu0 %v4285_v38 }
0x1a67   :  { %v4441_v21 = vpop.xlane.xlu2 %4440 }
0x1a68   :  { %v4445_v52 = vsub.f32 %v4437_v35, %v4441_v21 }
0x1a6a   :  { %v4447_v6 = vmul.f32 1.442695, %v4445_v52 }
0x1a6c   :  { %5678 = vpow2.f32 %v4447_v6 }
0x1a71   :  { %v4284_v1 = vpop.xlane.xlu1 %4283 }
0x1a72   :  { %v4288_v37 = vsub.f32 %v4280_v59, %v4284_v1  ;;  %v7702_v10 = vpop.eup %5678 }
0x1a73   :  { %v4451_v27 = vsel %vm1727_vm4, %v7702_v10, 0.0 }
0x1a74   :  { %v4290_v3 = vmul.f32 1.442695, %v4288_v37  ;;  %4452 = vadd.xlane.f32.xlu0 %v4451_v27 }
0x1a76   :  { %5680 = vpow2.f32 %v4290_v3 }
0x1a79   :  { %v4444_v39 = vpop.xlane.xlu1 %4443  ;;  %v4287_v63 = vpop.xlane.xlu0 %4286 }
0x1a7a   :  { %v4446_v17 = vsub.f32 %v4438_v56, %v4444_v39  ;;  %v4289_v31 = vsub.f32 %v4281_v13, %v4287_v63 }
0x1a7c   :  { %v5681_v11 = vpop.eup %5680  ;;  %v4449_v40 = vmul.f32 1.442695, %v4446_v17  ;;  %v4292_v2 = vmul.f32 1.442695, %v4289_v31 }
0x1a7d   :  { %v4294_v18 = vsel %vm1727_vm4, %v5681_v11, 0.0 }
0x1a7e   :  { %5682 = vpow2.f32 %v4449_v40  ;;  %4295 = vadd.xlane.f32.xlu2 %v4294_v18 }
0x1a7f   :  { %5684 = vpow2.f32 %v4292_v2 }
0x1a84   :  { %v7707_v7 = vpop.eup %5682 }
0x1a85   :  { %v5685_v5 = vpop.eup %5684  ;;  %v4454_v25 = vsel %vm1727_vm4, %v7707_v7, 0.0 }
0x1a86   :  { %4455 = vadd.xlane.f32.xlu2 %v4454_v25  ;;  %v4297_v48 = vsel %vm1727_vm4, %v5685_v5, 0.0 }
0x1a87   :  { %4298 = vadd.xlane.f32.xlu1 %v4297_v48 }
0x1a88   :  { %5469 = vrot.lane.b32.xlu0 %v7428_v51, %s8067_s12 }
0x1aa0   :  { %5474 = vrot.lane.b32.xlu1 %v7428_v51, %s8066_s13 }
0x1ae7   :  { %v4453_v36 = vpop.xlane.xlu0 %4452 }
0x1ae8   :  { %v4468_v45 = vand.u32 2147483648, %v4453_v36  ;;  %vm4462_vm10 = vweird.f32 %v4453_v36  ;;  %v4466_v38 = vand.u32 2147483647, %v4453_v36 }
0x1aea   :  { %v4469_v6 = vor.u32 1.1754944e-38, %v4468_v45  ;;  %vm4467_vm12 = vcmp.eq.f32.partialorder %v4466_v38, 8.507059e+37  ;;  %v5324_v45 = vld [vmem:[%s7993_s20 + $0x88] sm:$0xff] }
0x1af1   :  { %v4296_v44 = vpop.xlane.xlu2 %4295 }
0x1af2   :  { %5686 = vrcp.f32 %v4296_v44  ;;  %v4311_v30 = vand.u32 2147483648, %v4296_v44  ;;  %v4309_v14 = vand.u32 2147483647, %v4296_v44  ;;  %vm4305_vm15 = vweird.f32 %v4296_v44 }
0x1af3   :  { %5688 = vrcp.f32 %v4453_v36 }
0x1af4   :  { %v4312_v41 = vor.u32 1.1754944e-38, %v4311_v30  ;;  %vm4310_vm1 = vcmp.eq.f32.partialorder %v4309_v14, 8.507059e+37 }
0x1af8   :  { %v5687_v60 = vpop.eup %5686 }
0x1af9   :  { %v4301_v54 = vmul.f32 %v5687_v60, %v4296_v44  ;;  %v7716_v12 = vpop.xlane.xlu2 %4455  ;;  %v5689_v22 = vpop.eup %5688  ;;  %vm4306_vm14 = vweird.f32 %v5687_v60 }
0x1afa   :  { %v4299_v62 = vpop.xlane.xlu1 %4298  ;;  %v5470_v47 = vpop.permute.xlu0 %5469  ;;  %v4458_v16 = vmul.f32 %v5689_v22, %v4453_v36  ;;  %vm4307_vm0 = vmor %vm4305_vm15, %vm4306_vm14  ;;  %vm4463_vm9 = vweird.f32 %v5689_v22  ;;  %v4483_v39 = vand.u32 2147483648, %v7716_v12  ;;  %vm4477_vm14 = vweird.f32 %v7716_v12 }
0x1afb   :  { %v4302_v32 = vsub.f32 1.0, %v4301_v54  ;;  %5690 = vrcp.f32 %v4299_v62  ;;  %v5471_v33 = vunpack.i.l.bf16 %v5470_v47  ;;  %v5472_v51 = vunpack.i.h.bf16 %v5470_v47  ;;  %vm4464_vm11 = vmor %vm4462_vm10, %vm4463_vm9  ;;  %v5489_v54 = vld [vmem:[%s7990_s17 + $0x1] ss:$0 sm:$0xff] }
0x1afc   :  { %5692 = vrcp.f32 %v7716_v12  ;;  %v4459_v43 = vsub.f32 1.0, %v4458_v16  ;;  %v4326_v35 = vand.u32 2147483648, %v4299_v62  ;;  %v4324_v23 = vand.u32 2147483647, %v4299_v62 }
0x1afd   :  { %v4303_v58 = vmul.f32 %v5687_v60, %v4302_v32  ;;  %4356 = vmatpush.msrb.mxu1 %v5471_v33  ;;  %vm4320_vm5 = vweird.f32 %v4299_v62  ;;  %v4481_v31 = vand.u32 2147483647, %v7716_v12  ;;  %v4484_v40 = vor.u32 1.1754944e-38, %v4483_v39 }
0x1afe   :  { %v4460_v50 = vmul.f32 %v5689_v22, %v4459_v43  ;;  %v4327_v42 = vor.u32 1.1754944e-38, %v4326_v35  ;;  %vm4325_vm7 = vcmp.eq.f32.partialorder %v4324_v23, 8.507059e+37  ;;  %v5337_v43 = vld [vmem:[%s7993_s20 + $0xf0] sm:$0xff]  ;;  %v5336_v35 = vld [vmem:[%s7993_s20 + $0xe8] sm:$0xff]  ;;  %v5334_v23 = vld [vmem:[%s7993_s20 + $0xd8] sm:$0xff] }
0x1aff   :  { %v4304_v15 = vadd.f32 %v5687_v60, %v4303_v58  ;;  %4357 = vmatpush.msrb.mxu1 %v5472_v51 }
0x1b00   :  { %v4461_v49 = vadd.f32 %v5689_v22, %v4460_v50  ;;  %v5331_v50 = vld [vmem:[%s7993_s20 + $0xc0] sm:$0xff] }
0x1b01   :  { %v5691_v46 = vpop.eup %5690  ;;  %v4308_v34 = vsel %vm4307_vm0, %v5687_v60, %v4304_v15  ;;  %vm4482_vm0 = vcmp.eq.f32.partialorder %v4481_v31, 8.507059e+37  ;;  %v5372_v31 = vld [vmem:[%s7995_s22 + $0x1e0] sm:$0xff] }
0x1b02   :  { %v4313_v53 = vsel %vm4310_vm1, %v4312_v41, %v4308_v34  ;;  %v4316_v4 = vmul.f32 %v5691_v46, %v4299_v62  ;;  %v5693_v20 = vpop.eup %5692  ;;  %vm4321_vm2 = vweird.f32 %v5691_v46  ;;  %v4465_v21 = vsel %vm4464_vm11, %v5689_v22, %v4461_v49  ;;  %v5325_v49 = vld [vmem:[%s7993_s20 + $0x90] sm:$0xff] }
0x1b03   :  { %v4314_v57 = vmul.f32 %v5681_v11, %v4313_v53  ;;  %v4473_v55 = vmul.f32 %v5693_v20, %v7716_v12  ;;  %vm4322_vm6 = vmor %vm4320_vm5, %vm4321_vm2  ;;  %v4470_v37 = vsel %vm4467_vm12, %v4469_v6, %v4465_v21  ;;  %vm4478_vm13 = vweird.f32 %v5693_v20  ;;  %v5375_v6 = vld [vmem:[%s7995_s22 + $0x1f8] sm:$0xff] }
0x1b04   :  { %v4317_v0 = vsub.f32 1.0, %v4316_v4  ;;  %v4471_v17 = vmul.f32 %v7702_v10, %v4470_v37  ;;  %vm4479_vm15 = vmor %vm4477_vm14, %vm4478_vm13  ;;  %v5254_v10 = vld [vmem:[%s7989_s16 + $0x70] sm:$0xff]  ;;  %v5359_v37 = vld [vmem:[%s7995_s22 + $0x178] sm:$0xff] }
0x1b05   :  { %5308 = vmatmul.msk.f32.vlgmr.msrb.gmra.mxu1 %vm1727_vm4, %v4314_v57  ;;  %v4474_v56 = vsub.f32 1.0, %v4473_v55  ;;  %4386 = vmatpush.msra.mxu3 %v5254_v10  ;;  %v5332_v55 = vld [vmem:[%s7993_s20 + $0xc8] sm:$0xff] }
0x1b06   :  { %v4318_v19 = vmul.f32 %v5691_v46, %v4317_v0  ;;  %v5338_v0 = vld [vmem:[%s7993_s20 + $0xf8] sm:$0xff] }
0x1b07   :  { %v4475_v52 = vmul.f32 %v5693_v20, %v4474_v56  ;;  %4658 = vmatpush.msrb.mxu3 %v5337_v43  ;;  %4681 = vmatpush.msra.mxu0 %v5338_v0  ;;  %v5326_v56 = vld [vmem:[%s7993_s20 + $0x98] sm:$0xff] }
0x1b08   :  { %v4319_v59 = vadd.f32 %v5691_v46, %v4318_v19  ;;  %v5333_v19 = vld [vmem:[%s7993_s20 + $0xd0] sm:$0xff] }
0x1b09   :  { %v4476_v27 = vadd.f32 %v5693_v20, %v4475_v52  ;;  %4682 = vmatpush.msra.mxu0 %v5336_v35 }
0x1b0a   :  { %v4323_v61 = vsel %vm4322_vm6, %v5691_v46, %v4319_v59  ;;  %v5329_v59 = vld [vmem:[%s7993_s20 + $0xb0] sm:$0xff] }
0x1b0b   :  { %v4328_v24 = vsel %vm4325_vm7, %v4327_v42, %v4323_v61  ;;  %v4480_v11 = vsel %vm4479_vm15, %v5693_v20, %v4476_v27  ;;  %v5335_v20 = vld [vmem:[%s7993_s20 + $0xe0] sm:$0xff]  ;;  %4683 = vmatpush.msra.mxu0 %v5334_v23  ;;  %v5330_v42 = vld [vmem:[%s7993_s20 + $0xb8] sm:$0xff]  ;;  %v5373_v27 = vld [vmem:[%s7995_s22 + $0x1e8] sm:$0xff] }
0x1b0c   :  { %v4329_v13 = vmul.f32 %v5685_v5, %v4328_v24  ;;  %v4485_v2 = vsel %vm4482_vm0, %v4484_v40, %v4480_v11  ;;  %v5255_v5 = vld [vmem:[%s7989_s16 + $0x78] sm:$0xff]  ;;  %4659 = vmatpush.msrb.mxu3 %v5335_v20  ;;  %v5327_v61 = vld [vmem:[%s7993_s20 + $0xa0] sm:$0xff]  ;;  %v5328_v24 = vld [vmem:[%s7993_s20 + $0xa8] sm:$0xff] }
0x1b0d   :  { %v4486_v18 = vmul.f32 %v7707_v7, %v4485_v2  ;;  %4543 = vmatpush.msra.mxu1 %v5255_v5  ;;  %4684 = vmatpush.msra.mxu0 %v5332_v55  ;;  %v5356_v11 = vld [vmem:[%s7995_s22 + $0x160] sm:$0xff]  ;;  %v5355_v5 = vld [vmem:[%s7995_s22 + $0x158] sm:$0xff]  ;;  %v5349_v23 = vld [vmem:[%s7995_s22 + $0x128] sm:$0xff] }
0x1b0e   :  { %5309 = vmatmul.msk.f32.gmra.mxu1 %vm1727_vm4, %v4329_v13  ;;  %4660 = vmatpush.msrb.mxu3 %v5333_v19  ;;  %v5323_v13 = vld [vmem:[%s7993_s20 + $0x80] sm:$0xff]  ;;  %v5361_v55 = vld [vmem:[%s7995_s22 + $0x188] sm:$0xff] }
0x1b0f   :  { %4685 = vmatpush.msra.mxu0 %v5330_v42  ;;  %4761 = vmatpush.msrb.mxu1 %v5375_v6  ;;  %v5360_v42 = vld [vmem:[%s7995_s22 + $0x180] sm:$0xff] }
0x1b10   :  { %4661 = vmatpush.msrb.mxu3 %v5331_v50  ;;  %v5362_v50 = vld [vmem:[%s7995_s22 + $0x190] sm:$0xff] }
0x1b11   :  { %4686 = vmatpush.msra.mxu0 %v5328_v24  ;;  %v5345_v24 = vld [vmem:[%s7995_s22 + $0x108] sm:$0xff] }
0x1b12   :  { %v5475_v1 = vpop.permute.xlu1 %5474  ;;  %4662 = vmatpush.msrb.mxu3 %v5329_v59  ;;  %v5347_v59 = vld [vmem:[%s7995_s22 + $0x118] sm:$0xff] }
0x1b13   :  { %v5476_v3 = vunpack.i.l.bf16 %v5475_v1  ;;  %v5477_v63 = vunpack.i.h.bf16 %v5475_v1  ;;  %4687 = vmatpush.msra.mxu0 %v5326_v56  ;;  %v5374_v1 = vld [vmem:[%s7995_s22 + $0x1f0] sm:$0xff]  ;;  %v5339_v56 = vld [vmem:[%s7994_s21 + $0x2] sm:$0x3] }
0x1b14   :  { %4663 = vmatpush.msrb.mxu3 %v5327_v61  ;;  %4762 = vmatpush.msrb.mxu1 %v5374_v1  ;;  %v5346_v61 = vld [vmem:[%s7995_s22 + $0x110] sm:$0xff] }
0x1b15   :  { %4513 = vmatpush.msrb.mxu2 %v5476_v3  ;;  %4688 = vmatpush.msra.mxu0 %v5324_v45  ;;  %v5358_v3 = vld [vmem:[%s7995_s22 + $0x170] sm:$0xff] }
0x1b16   :  { %4664 = vmatpush.msrb.mxu3 %v5325_v49  ;;  %4763 = vmatpush.msrb.mxu1 %v5373_v27  ;;  %v5344_v49 = vld [vmem:[%s7995_s22 + $0x100] sm:$0xff] }
0x1b17   :  { %4514 = vmatpush.msrb.mxu2 %v5477_v63  ;;  %v5357_v63 = vld [vmem:[%s7995_s22 + $0x168] sm:$0xff] }
0x1b18   :  { %5316 = vmatmul.msk.f32.vlgmr.msrb.gmra.mxu2 %vm1727_vm4, %v4471_v17  ;;  %4665 = vmatpush.msrb.mxu3 %v5323_v13  ;;  %v4641_v13 = vperm.slane %v5339_v56, 1 }
0x1b19   :  { %4738 = vmatpush.msra.mxu2 %v5359_v37  ;;  %4764 = vmatpush.msrb.mxu1 %v5372_v31 }
0x1b1b   :  { %4739 = vmatpush.msra.mxu2 %v5358_v3 }
0x1b1d   :  { %4740 = vmatpush.msra.mxu2 %v5357_v63 }
0x1b1f   :  { %4741 = vmatpush.msra.mxu2 %v5356_v11  ;;  %v5492_v11 = vld [vmem:[%s7996_s23 + $0x1] ss:$0 sm:$0xff]  ;;  %s4911_s23 = sshll.u32 %s8001_s28, 4  ;;  %s4912_s23 = int_to_ptr.hbm [resolvable:$true] %s4911_s23 }
0x1b20   :  { %5317 = vmatmul.msk.f32.gmra.mxu2 %vm1727_vm4, %v4486_v18  ;;  %v5371_v18 = vld [vmem:[%s7995_s22 + $0x1d8] sm:$0xff] }
0x1b21   :  { %4765 = vmatpush.msrb.mxu1 %v5371_v18  ;;  %4742 = vmatpush.msra.mxu2 %v5355_v5 }
0x1b82   :  { %v4359_v25 = vpop.f32.mrf.mxu1 }
0x1b83   :  { %5310 = vmatmul.msk.f32.vlgmr.msra.gmra.mxu3 %vm1691_vm3, %v4359_v25  ;;  %v5370_v25 = vld [vmem:[%s7995_s22 + $0x1d0] sm:$0xff] }
0x1b84   :  { %4766 = vmatpush.msrb.mxu1 %v5370_v25 }
0x1b8b   :  { %v4362_v48 = vpop.f32.mrf.mxu1 }
0x1b8c   :  { %5311 = vmatmul.msk.f32.gmra.mxu3 %vm1691_vm3, %v4362_v48 }
0x1b9b   :  { %v4516_v44 = vpop.f32.mrf.mxu2 }
0x1b9c   :  { %5318 = vmatmul.msk.f32.vlgmr.msra.gmra.mxu1 %vm1691_vm3, %v4516_v44  ;;  %v5354_v44 = vld [vmem:[%s7995_s22 + $0x150] sm:$0xff] }
0x1b9d   :  { %4743 = vmatpush.msra.mxu2 %v5354_v44 }
0x1ba3   :  { %v4519_v7 = vpop.f32.mrf.mxu2 }
0x1ba4   :  { %5319 = vmatmul.msk.f32.gmra.mxu1 %vm1691_vm3, %v4519_v7  ;;  %v5369_v7 = vld [vmem:[%s7995_s22 + $0x1c8] sm:$0xff] }
0x1ba5   :  { %4767 = vmatpush.msrb.mxu1 %v5369_v7 }
0x1c06   :  { %v4388_v36 = vpop.f32.mrf.mxu3 }
0x1c07   :  { %v4394_v60 = vadd.f32 %v4388_v36, %v7689_v29 }
0x1c0f   :  { %v4391_v30 = vpop.f32.mrf.mxu3 }
0x1c10   :  { %v4395_v22 = vadd.f32 %v4391_v30, %v7693_v8  ;;  %v5367_v30 = vld [vmem:[%s7995_s22 + $0x1b8] sm:$0xff] }
0x1c19   :  { %v4545_v62 = vpop.f32.mrf.mxu1 }
0x1c1a   :  { %v4551_v32 = vadd.f32 %v4545_v62, %v4394_v60  ;;  %v5353_v60 = vld [vmem:[%s7995_s22 + $0x148] sm:$0xff] }
0x1c1b   :  { %4744 = vmatpush.msra.mxu2 %v5353_v60 }
0x1c1c   :  { %v4558_v47 = vadd.f32 %v5489_v54, %v4551_v32  ;;  %v5352_v32 = vld [vmem:[%s7995_s22 + $0x140] sm:$0xff] }
0x1c1d   :  { %4745 = vmatpush.msra.mxu2 %v5352_v32 }
0x1c1e   :  { %v4560_v12 = vadd.f32 %v4558_v47, %v7408_v9 }
0x1c20   :  { %v4566_v58 = vsel %vm773_vm8, %v4560_v12, 0.0 }
0x1c21   :  { %4567 = vadd.xlane.f32.xlu2 %v4566_v58  ;;  %v4548_v14 = vpop.f32.mrf.mxu1  ;;  %v5351_v58 = vld [vmem:[%s7995_s22 + $0x138] sm:$0xff] }
0x1c22   :  { %v4552_v33 = vadd.f32 %v4548_v14, %v4395_v22  ;;  %v5490_v14 = vld [vmem:[%s7991_s18 + $0x1] ss:$0 sm:$0xff]  ;;  %4746 = vmatpush.msra.mxu2 %v5351_v58 }
0x1c24   :  { %v4559_v15 = vadd.f32 %v5489_v54, %v4552_v33  ;;  %v5368_v54 = vld [vmem:[%s7995_s22 + $0x1c0] sm:$0xff]  ;;  %v5366_v33 = vld [vmem:[%s7995_s22 + $0x1b0] sm:$0xff] }
0x1c25   :  { %4768 = vmatpush.msrb.mxu1 %v5368_v54 }
0x1c26   :  { %v4561_v29 = vadd.f32 %v4559_v15, %v7415_v28 }
0x1c27   :  { %4769 = vmatpush.msrb.mxu1 %v5367_v30 }
0x1c28   :  { %v4569_v51 = vsel %vm773_vm8, %v4561_v29, 0.0 }
0x1c29   :  { %4570 = vadd.xlane.f32.xlu2 %v4569_v51  ;;  %v5350_v51 = vld [vmem:[%s7995_s22 + $0x130] sm:$0xff]  ;;  %4770 = vmatpush.msrb.mxu1 %v5366_v33 }
0x1c2a   :  { %4747 = vmatpush.msra.mxu2 %v5350_v51 }
0x1c2c   :  { %4748 = vmatpush.msra.mxu2 %v5349_v23 }
0x1c94   :  { %v4568_v16 = vpop.xlane.xlu2 %4567 }
0x1c95   :  { %v4572_v41 = vmul.f32 %v4568_v16, %v7159_v26  ;;  %v5491_v16 = vld [vmem:[%s7992_s19 + $0x1] ss:$0 sm:$0xff] }
0x1c97   :  { %v7749_v46 = vsub.f32 %v4560_v12, %v4572_v41 }
0x1c99   :  { %v4576_v9 = vmul.f32 %v7749_v46, %v7749_v46 }
0x1c9b   :  { %v4578_v8 = vsel %vm773_vm8, %v4576_v9, 0.0  ;;  %v5365_v9 = vld [vmem:[%s7995_s22 + $0x1a8] sm:$0xff] }
0x1c9c   :  { %4579 = vadd.xlane.f32.xlu0 %v4578_v8  ;;  %v4571_v34 = vpop.xlane.xlu2 %4570  ;;  %4771 = vmatpush.msrb.mxu1 %v5365_v9  ;;  %v4874_v9 = vld [vmem:[%s7999_s26 + $0x30] sm:$0xff] }
0x1c9d   :  { %v4573_v53 = vmul.f32 %v4571_v34, %v7159_v26 }
0x1c9f   :  { %v7755_v4 = vsub.f32 %v4561_v29, %v4573_v53  ;;  %v5364_v53 = vld [vmem:[%s7995_s22 + $0x1a0] sm:$0xff] }
0x1ca0   :  { %4772 = vmatpush.msrb.mxu1 %v5364_v53 }
0x1ca1   :  { %v4577_v28 = vmul.f32 %v7755_v4, %v7755_v4 }
0x1ca3   :  { %v4581_v57 = vsel %vm773_vm8, %v4577_v28, 0.0 }
0x1ca4   :  { %4582 = vadd.xlane.f32.xlu2 %v4581_v57 }
0x1d0f   :  { %v4580_v38 = vpop.xlane.xlu0 %4579 }
0x1d10   :  { %v4584_v21 = vmul.f32 %v4580_v38, %v7159_v26 }
0x1d12   :  { %v4586_v52 = vadd.f32 1e-05, %v4584_v21 }
0x1d14   :  { %5694 = vrsqrt.f32 %v4586_v52  ;;  %vm4594_vm1 = vweird.f32 %v4586_v52 }
0x1d17   :  { %v4583_v39 = vpop.xlane.xlu2 %4582 }
0x1d18   :  { %v4585_v17 = vmul.f32 %v4583_v39, %v7159_v26 }
0x1d1a   :  { %v5695_v40 = vpop.eup %5694  ;;  %v4587_v2 = vadd.f32 1e-05, %v4585_v17 }
0x1d1b   :  { %v4589_v10 = vmul.f32 %v5695_v40, %v4586_v52  ;;  %vm4595_vm3 = vweird.f32 %v5695_v40  ;;  %v4640_v52 = vperm.slane %v5339_v56, 0  ;;  %v5494_v56 = vld [vmem:[%s7998_s25 + $0x1] ss:$0 sm:$0xff] }
0x1d1c   :  { %5696 = vrsqrt.f32 %v4587_v2  ;;  %vm4596_vm2 = vmor %vm4594_vm1, %vm4595_vm3  ;;  %vm4604_vm6 = vweird.f32 %v4587_v2 }
0x1d1d   :  { %v4590_v48 = vmul.f32 %v5695_v40, %v4589_v10 }
0x1d1f   :  { %v4591_v36 = vmul.f32 0.5, %v4590_v48 }
0x1d21   :  { %v4592_v62 = vsub.f32 1.5, %v4591_v36 }
0x1d22   :  { %v5697_v47 = vpop.eup %5696 }
0x1d23   :  { %v4593_v12 = vmul.f32 %v5695_v40, %v4592_v62  ;;  %v4599_v22 = vmul.f32 %v5697_v47, %v4587_v2  ;;  %vm4605_vm5 = vweird.f32 %v5697_v47 }
0x1d24   :  { %vm4606_vm7 = vmor %vm4604_vm6, %vm4605_vm5 }
0x1d25   :  { %v4597_v15 = vsel %vm4596_vm2, %v5695_v40, %v4593_v12  ;;  %v4600_v29 = vmul.f32 %v5697_v47, %v4599_v22 }
0x1d26   :  { %v4608_v41 = vmul.f32 %v4597_v15, %v7749_v46  ;;  %v5363_v46 = vld [vmem:[%s7995_s22 + $0x198] sm:$0xff] }
0x1d27   :  { %v4601_v8 = vmul.f32 0.5, %v4600_v29  ;;  %4773 = vmatpush.msrb.mxu1 %v5363_v46 }
0x1d28   :  { %v4613_v34 = vmul.f32 %v5490_v14, %v4608_v41  ;;  %v4875_v41 = vld [vmem:[%s7999_s26 + $0x38] sm:$0xff] }
0x1d29   :  { %v4602_v28 = vsub.f32 1.5, %v4601_v8  ;;  %4774 = vmatpush.msrb.mxu1 %v5362_v50  ;;  %4891 = vmatpush.msrb.mxu0 %v4875_v41  ;;  %v4868_v50 = vld [vmem:[%s7999_s26] sm:$0xff] }
0x1d2a   :  { %v4618_v57 = vadd.f32 %v5491_v16, %v4613_v34  ;;  %v4873_v34 = vld [vmem:[%s7999_s26 + $0x28] sm:$0xff] }
0x1d2b   :  { %v4603_v43 = vmul.f32 %v5697_v47, %v4602_v28  ;;  %4775 = vmatpush.msrb.mxu1 %v5361_v55  ;;  %4892 = vmatpush.msrb.mxu0 %v4874_v9  ;;  %v4872_v28 = vld [vmem:[%s7999_s26 + $0x20] sm:$0xff] }
0x1d2c   :  { %5340 = vmatmul.msk.f32.vlgmr.msrb.gmra.mxu3 %vm773_vm8, %v4618_v57  ;;  %5342 = vmatmul.msk.f32.vlgmr.msra.gmra.mxu0 %vm773_vm8, %v4618_v57 }
0x1d2d   :  { %v4607_v0 = vsel %vm4606_vm7, %v5697_v47, %v4603_v43  ;;  %4776 = vmatpush.msrb.mxu1 %v5360_v42  ;;  %4893 = vmatpush.msrb.mxu0 %v4873_v34  ;;  %v5493_v42 = vld [vmem:[%s7997_s24 + $0x1] ss:$0 sm:$0xff] }
0x1d2e   :  { %v4609_v20 = vmul.f32 %v4607_v0, %v7755_v4  ;;  %v5348_v4 = vld [vmem:[%s7995_s22 + $0x120] sm:$0xff]  ;;  %v4871_v0 = vld [vmem:[%s7999_s26 + $0x18] sm:$0xff] }
0x1d2f   :  { %4749 = vmatpush.msra.mxu2 %v5348_v4  ;;  %4894 = vmatpush.msrb.mxu0 %v4872_v28 }
0x1d30   :  { %v4614_v35 = vmul.f32 %v5490_v14, %v4609_v20 }
0x1d31   :  { %4750 = vmatpush.msra.mxu2 %v5347_v59  ;;  %4895 = vmatpush.msrb.mxu0 %v4871_v0 }
0x1d32   :  { %v4619_v19 = vadd.f32 %v5491_v16, %v4614_v35 }
0x1d33   :  { %4751 = vmatpush.msra.mxu2 %v5346_v61 }
0x1d34   :  { %5341 = vmatmul.msk.f32.gmra.mxu3 %vm773_vm8, %v4619_v19  ;;  %5343 = vmatmul.msk.f32.gmra.mxu0 %vm773_vm8, %v4619_v19 }
0x1d35   :  { %4752 = vmatpush.msra.mxu2 %v5345_v24 }
0x1d37   :  { %4753 = vmatpush.msra.mxu2 %v5344_v49 }
0x1da9   :  { %v4690_v45 = vpop.f32.mrf.mxu0 }
0x1daa   :  { %v4691_v38 = vadd.f32 %v4690_v45, %v4641_v13 }
0x1dac   :  { %v4697_v21 = vmax.f32 %v4691_v38, 0.0 }
0x1dae   :  { %4777 = vmatmul.f32.vlgmr.msrb.gmra.mxu1 %v4697_v21 }
0x1daf   :  { %v4667_v6 = vpop.f32.mrf.mxu3 }
0x1db0   :  { %v4668_v1 = vadd.f32 %v4667_v6, %v4640_v52 }
0x1db1   :  { %v4693_v37 = vpop.f32.mrf.mxu0 }
0x1db2   :  { %v4696_v3 = vmax.f32 %v4668_v1, 0.0  ;;  %v4694_v27 = vadd.f32 %v4693_v37, %v4641_v13 }
0x1db4   :  { %v4699_v39 = vmax.f32 %v4694_v27, 0.0  ;;  %4754 = vmatmul.f32.vlgmr.msra.gmra.mxu2 %v4696_v3  ;;  %v4844_v27 = vld [vmem:[%s8070_s8] sm:$0x3] }
0x1db6   :  { %4780 = vmatmul.f32.gmra.mxu1 %v4699_v39 }
0x1db7   :  { %v4670_v63 = vpop.f32.mrf.mxu3 }
0x1db8   :  { %v4671_v17 = vadd.f32 %v4670_v63, %v4640_v52  ;;  %v5495_v63 = vld [vmem:[%s8000_s27] ss:$0 sm:$0xff] }
0x1dba   :  { %v4698_v31 = vmax.f32 %v4671_v17, 0.0 }
0x1dbc   :  { %4757 = vmatmul.f32.gmra.mxu2 %v4698_v31 }
0x1e2b   :  { %v4778_v40 = vpop.f32.mrf.mxu1 }
0x1e33   :  { %v4781_v7 = vpop.f32.mrf.mxu1 }
0x1e37   :  { %v4755_v2 = vpop.f32.mrf.mxu2 }
0x1e38   :  { %v4756_v18 = vadd.f32 %v5492_v11, %v4755_v2 }
0x1e3a   :  { %v4779_v10 = vadd.f32 %v4778_v40, %v4756_v18 }
0x1e3c   :  { %v4784_v5 = vadd.f32 %v4779_v10, %v4618_v57 }
0x1e3e   :  { %v4790_v25 = vsel %vm773_vm8, %v4784_v5, 0.0 }
0x1e3f   :  { %4791 = vadd.xlane.f32.xlu2 %v4790_v25  ;;  %v4758_v48 = vpop.f32.mrf.mxu2 }
0x1e40   :  { %v4759_v44 = vadd.f32 %v5492_v11, %v4758_v48 }
0x1e42   :  { %v4782_v36 = vadd.f32 %v4781_v7, %v4759_v44 }
0x1e44   :  { %v4785_v60 = vadd.f32 %v4782_v36, %v4619_v19  ;;  %v4869_v19 = vld [vmem:[%s7999_s26 + $0x8] sm:$0xff] }
0x1e46   :  { %v4793_v54 = vsel %vm773_vm8, %v4785_v60, 0.0 }
0x1e47   :  { %4794 = vadd.xlane.f32.xlu1 %v4793_v54 }
0x1eb2   :  { %v4792_v62 = vpop.xlane.xlu2 %4791 }
0x1eb3   :  { %v4796_v30 = vmul.f32 %v4792_v62, %v7159_v26 }
0x1eb5   :  { %v4798_v58 = vsub.f32 %v4784_v5, %v4796_v30 }
0x1eb7   :  { %v4800_v33 = vmul.f32 %v4798_v58, %v4798_v58 }
0x1eb9   :  { %v4802_v15 = vsel %vm773_vm8, %v4800_v33, 0.0 }
0x1eba   :  { %v4795_v32 = vpop.xlane.xlu1 %4794 }
0x1ebb   :  { %v4797_v47 = vmul.f32 %v4795_v32, %v7159_v26 }
0x1ebd   :  { %v4799_v12 = vsub.f32 %v4785_v60, %v4797_v47 }
0x1ebf   :  { %v4801_v22 = vmul.f32 %v4799_v12, %v4799_v12 }
0x1ec1   :  { %v4805_v14 = vsel %vm773_vm8, %v4801_v22, 0.0 }
0x1ec2   :  { %4806 = vadd.xlane.f32.xlu2 %v4805_v14 }
0x1eca   :  { %4803 = vadd.xlane.f32.xlu2 %v4802_v15 }
0x1f35   :  { %v4807_v29 = vpop.xlane.xlu2 %4806 }
0x1f36   :  { %v4809_v51 = vmul.f32 %v4807_v29, %v7159_v26 }
0x1f38   :  { %v4811_v16 = vadd.f32 1e-05, %v4809_v51 }
0x1f3a   :  { %5698 = vrsqrt.f32 %v4811_v16  ;;  %vm4828_vm10 = vweird.f32 %v4811_v16 }
0x1f3d   :  { %v4804_v8 = vpop.xlane.xlu2 %4803 }
0x1f3e   :  { %v4808_v53 = vmul.f32 %v4804_v8, %v7159_v26  ;;  %v4870_v26 = vld [vmem:[%s7999_s26 + $0x10] sm:$0xff] }
0x1f3f   :  { %4896 = vmatpush.msrb.mxu0 %v4870_v26 }
0x1f40   :  { %v5699_v57 = vpop.eup %5698  ;;  %v4810_v46 = vadd.f32 1e-05, %v4808_v53 }
0x1f41   :  { %v4823_v43 = vmul.f32 %v5699_v57, %v4811_v16  ;;  %vm4829_vm9 = vweird.f32 %v5699_v57  ;;  %4897 = vmatpush.msrb.mxu0 %v4869_v19 }
0x1f42   :  { %5700 = vrsqrt.f32 %v4810_v46  ;;  %vm4830_vm11 = vmor %vm4828_vm10, %vm4829_vm9  ;;  %vm4818_vm13 = vweird.f32 %v4810_v46 }
0x1f43   :  { %v4824_v20 = vmul.f32 %v5699_v57, %v4823_v43  ;;  %4898 = vmatpush.msrb.mxu0 %v4868_v50 }
0x1f45   :  { %v4825_v35 = vmul.f32 0.5, %v4824_v20 }
0x1f47   :  { %v4826_v23 = vsub.f32 1.5, %v4825_v35 }
0x1f48   :  { %v5701_v4 = vpop.eup %5700 }
0x1f49   :  { %v4827_v55 = vmul.f32 %v5699_v57, %v4826_v23  ;;  %v4813_v59 = vmul.f32 %v5701_v4, %v4810_v46  ;;  %vm4819_vm12 = vweird.f32 %v5701_v4 }
0x1f4a   :  { %vm4820_vm14 = vmor %vm4818_vm13, %vm4819_vm12 }
0x1f4b   :  { %v4831_v61 = vsel %vm4830_vm11, %v5699_v57, %v4827_v55  ;;  %v4814_v24 = vmul.f32 %v5701_v4, %v4813_v59 }
0x1f4c   :  { %v4833_v49 = vmul.f32 %v4831_v61, %v4799_v12 }
0x1f4d   :  { %v4815_v13 = vmul.f32 0.5, %v4814_v24 }
0x1f4e   :  { %v4838_v45 = vmul.f32 %v5493_v42, %v4833_v49 }
0x1f4f   :  { %v4816_v38 = vsub.f32 1.5, %v4815_v13 }
0x1f50   :  { %v4843_v21 = vadd.f32 %v5494_v56, %v4838_v45 }
0x1f51   :  { %v4817_v52 = vmul.f32 %v5701_v4, %v4816_v38 }
0x1f52   :  { %4862 = vmatpush.msra.mxu3 %v4843_v21 }
0x1f53   :  { %v4821_v6 = vsel %vm4820_vm14, %v5701_v4, %v4817_v52 }
0x1f54   :  { %v4832_v1 = vmul.f32 %v4821_v6, %v4798_v58 }
0x1f56   :  { %v4837_v37 = vmul.f32 %v5493_v42, %v4832_v1 }
0x1f58   :  { %v4842_v3 = vadd.f32 %v5494_v56, %v4837_v37 }
0x1f5a   :  { %4863 = vmatpush.msra.mxu3 %v4842_v3 }
0x1f5b   :  { %5379 = vmatmul.msk.f32.vlgmr.msra.gmra.mxu3 %vm1727_vm4, %v4844_v27 }
0x1fde   :  { %v4865_v39 = vpop.f32.mrf.mxu3 }
0x1fdf   :  { %5380 = vmatmul.msk.f32.vlgmr.msrb.gmra.mxu0 %vm773_vm8, %v4865_v39 }
0x205c   :  { %v4900_v17 = vpop.f32.mrf.mxu0 }
0x205d   :  { %v4901_v31 = vadd.f32 %v5495_v63, %v4900_v17 }
0x205f   :  { %4903 = vst [vmem:[#allocation2] sm:$0x3] %v4901_v31 }
0x2060   :  { %4914 = dma.vmem_to_hbm [thread:$0]  %s4910_s29, 32, %s4912_s23, [#allocation3]  }
0x2061   :  { %5730 = dma.done.wait [#allocation3], 32  }
0x2062   :  { %5731 = vsyncadd [#allocation3], 4294967264 }
0x2063   :  { %4919 = vsyncpa [#allocation3], 1 }

</bundles_post_ra>
